<compile_context>
chip_gen: v7x
topology: tpu7x:2x2x1
jax: 0.10.0
libtpu: 0.0.40
codegen_flags: <defaults>
</compile_context>

<pallas_src>
import functools

import jax
import jax.numpy as jnp
from jax.experimental import pallas as pl
from jax.experimental.pallas import tpu as pltpu


def mlp_kernel(x_ref, w1_ref, b1_ref, w2_ref, b2_ref, w3_ref, b3_ref,
               o_ref, acc_ref):
    """fc1 (K-tiled, f32 accumulated) -> relu -> (shared fc2 -> relu) x4 -> fc3.

    Grid = (batch_tiles, k_tiles).  fc1 partial products accumulate into the f32
    VMEM scratch `acc_ref`; the shared-weight epilogue runs only on the last K
    step (P3 accumulator init/finalize pattern).
    """
    k = pl.program_id(1)

    @pl.when(k == 0)
    def _():
        acc_ref[...] = jnp.zeros_like(acc_ref)

    # fc1 partial matmul on the MXU: bf16 operands, f32 accumulation.
    acc_ref[...] += jnp.dot(x_ref[...], w1_ref[...],
                            preferred_element_type=jnp.float32)

    @pl.when(k == pl.num_programs(1) - 1)
    def _():
        h = jnp.maximum(acc_ref[...] + b1_ref[...], 0.0).astype(jnp.bfloat16)

        # fc2 + relu applied 4 times with shared weights (loads hoisted).
        w2 = w2_ref[...]
        b2 = b2_ref[...]
        for _ in range(4):
            h = jnp.dot(h, w2, preferred_element_type=jnp.float32)
            h = jnp.maximum(h + b2, 0.0).astype(jnp.bfloat16)

        out = jnp.dot(h, w3_ref[...], preferred_element_type=jnp.float32)
        o_ref[...] = (out + b3_ref[...]).astype(o_ref.dtype)


def _round_up(n, m):
    return ((n + m - 1) // m) * m


def _pad_to(a, target_shape):
    pads = [(0, t - s) for s, t in zip(a.shape, target_shape)]
    return jnp.pad(a, pads)


@functools.partial(jax.jit, static_argnames=("num_classes", "tm", "tk"))
def _forward_padded(x, w1p, b1p, w2p, b2p, w3p, b3p, *, num_classes, tm, tk):
    """Per-call forward on pre-padded / pre-cast parameters."""
    B, _ = x.shape
    Kp, Hp = w1p.shape
    Cp = w3p.shape[1]

    if tm is None:
        tm = 256 if B >= 256 else 128   # fill the 256-wide MXU M dim when possible
    Bp = _round_up(B, tm)

    # Per-call input prep only (weights were prepped once in make_forward).
    # Zero padding keeps fc1/ReLU/fc2/fc3 exact; padding is sliced off below.
    # NOTE: this x pad/cast could additionally be fused into the pallas_call via
    # CompilerParams(allow_input_fusion=...) if it shows up as exposed HBM traffic.
    xb = _pad_to(x, (Bp, Kp)).astype(jnp.bfloat16)

    n_batch_tiles = Bp // tm
    grid = (n_batch_tiles, Kp // tk)

    flops = 2 * Bp * (Kp * Hp + 4 * Hp * Hp + Hp * Cp)
    # w1 is re-streamed from HBM once per batch tile (dominant bytes).
    bytes_accessed = (
        xb.size * 2
        + n_batch_tiles * w1p.size * 2
        + w2p.size * 2 + w3p.size * 2
        + (b1p.size + b2p.size + b3p.size) * 4
        + Bp * Cp * 4)

    # Grid-invariant operands: single pipeline buffer (their index_map is constant).
    invariant = dict(pipeline_mode=pl.Buffered(1))

    out = pl.pallas_call(
        mlp_kernel,
        out_shape=jax.ShapeDtypeStruct((Bp, Cp), jnp.float32),
        grid_spec=pltpu.PrefetchScalarGridSpec(
            num_scalar_prefetch=0,
            grid=grid,
            in_specs=[
                pl.BlockSpec((tm, tk), lambda i, k: (i, k)),                # x
                pl.BlockSpec((tk, Hp), lambda i, k: (k, 0)),                # w1 (K-tiled)
                pl.BlockSpec((1, Hp), lambda i, k: (0, 0), **invariant),    # b1
                pl.BlockSpec((Hp, Hp), lambda i, k: (0, 0), **invariant),   # w2 (shared)
                pl.BlockSpec((1, Hp), lambda i, k: (0, 0), **invariant),    # b2
                pl.BlockSpec((Hp, Cp), lambda i, k: (0, 0), **invariant),   # w3
                pl.BlockSpec((1, Cp), lambda i, k: (0, 0), **invariant),    # b3
            ],
            out_specs=pl.BlockSpec((tm, Cp), lambda i, k: (i, 0)),
            scratch_shapes=[pltpu.VMEM((tm, Hp), jnp.float32)],
        ),
        compiler_params=pltpu.CompilerParams(
            dimension_semantics=("parallel", "arbitrary")),
        cost_estimate=pl.CostEstimate(
            flops=flops, transcendentals=0, bytes_accessed=bytes_accessed),
    )(xb, w1p, b1p, w2p, b2p, w3p, b3p)

    return out[:B, :num_classes]


def make_forward(w1, b1, w2, b2, w3, b3, *, tm=None, tk=2048):
    """One-time parameter prep (lane-dense zero-padding to multiples of 128 and
    bf16 cast), hoisted out of the per-call forward.  Returns forward(x)->logits.
    """
    K, H = w1.shape
    C = w3.shape[1]

    tk_eff = min(tk, _round_up(K, 128))   # don't over-tile small inputs
    Kp = _round_up(K, tk_eff)
    Hp = _round_up(H, 128)
    Cp = _round_up(C, 128)

    w1p = _pad_to(jnp.asarray(w1), (Kp, Hp)).astype(jnp.bfloat16)
    w2p = _pad_to(jnp.asarray(w2), (Hp, Hp)).astype(jnp.bfloat16)
    w3p = _pad_to(jnp.asarray(w3), (Hp, Cp)).astype(jnp.bfloat16)
    b1p = _pad_to(jnp.asarray(b1).reshape(1, -1), (1, Hp)).astype(jnp.float32)
    b2p = _pad_to(jnp.asarray(b2).reshape(1, -1), (1, Hp)).astype(jnp.float32)
    b3p = _pad_to(jnp.asarray(b3).reshape(1, -1), (1, Cp)).astype(jnp.float32)
    params = jax.block_until_ready((w1p, b1p, w2p, b2p, w3p, b3p))

    def forward(x):
        return _forward_padded(x, *params, num_classes=C, tm=tm, tk=tk_eff)

    return forward


def init_linear_params(key, in_features, out_features):
    """PyTorch-style uniform init U(-1/sqrt(fan_in), 1/sqrt(fan_in)).
    Weight is returned pre-transposed to (in_features, out_features)."""
    kw, kb = jax.random.split(key)
    bound = 1.0 / jnp.sqrt(jnp.float32(in_features))
    w = jax.random.uniform(kw, (in_features, out_features), jnp.float32, -bound, bound)
    b = jax.random.uniform(kb, (1, out_features), jnp.float32, -bound, bound)
    return w, b


def ref_forward(x, w1, b1, w2, b2, w3, b3):
    """Pure-JAX reference reproducing the same bf16-operand / f32-accum math."""
    xb = x.astype(jnp.bfloat16)
    w1b, w2b, w3b = (w.astype(jnp.bfloat16) for w in (w1, w2, w3))
    h = jnp.dot(xb, w1b, preferred_element_type=jnp.float32)
    h = jnp.maximum(h + b1.reshape(1, -1), 0.0).astype(jnp.bfloat16)
    for _ in range(4):
        h = jnp.dot(h, w2b, preferred_element_type=jnp.float32)
        h = jnp.maximum(h + b2.reshape(1, -1), 0.0).astype(jnp.bfloat16)
    return jnp.dot(h, w3b, preferred_element_type=jnp.float32) + b3.reshape(1, -1)


if __name__ == "__main__":
    # Small shapes consistent with the module's forward (x is pre-flattened).
    # Real model: input_size=3*100*100, hidden=500, classes=120 — handled by the
    # same wrapper (defaults tk=2048, tm auto) via padding + K-tiling.
    batch = 384              # -> 2 batch tiles of tm=256 (parallel axis + row padding)
    input_size = 3 * 10 * 10 # stand-in for 3*100*100
    hidden_size = 256        # stand-in for 500
    num_classes = 120

    key = jax.random.PRNGKey(0)
    kx, k1, k2, k3 = jax.random.split(key, 4)

    x = jax.random.normal(kx, (batch, input_size), jnp.float32)
    w1, b1 = init_linear_params(k1, input_size, hidden_size)
    w2, b2 = init_linear_params(k2, hidden_size, hidden_size)
    w3, b3 = init_linear_params(k3, hidden_size, num_classes)

    # tk=128 here so the small test exercises >1 K tile of the fc1 accumulator.
    forward = make_forward(w1, b1, w2, b2, w3, b3, tk=128)
    out = jax.block_until_ready(forward(x))

    ref = ref_forward(x, w1, b1, w2, b2, w3, b3)
    assert out.shape == (batch, num_classes)
    assert jnp.allclose(out, ref, atol=1e-2, rtol=1e-2)

    print("KERNEL_OK")
</pallas_src>

<mosaic_0001>
module attributes {stable_mosaic.version = 11 : i64} {
  func.func @mlp_kernel(%arg0: i32, %arg1: i32, %arg2: memref<256x128xbf16, #tpu.memory_space<vmem>>, %arg3: memref<128x256xbf16, #tpu.memory_space<vmem>>, %arg4: memref<1x256xf32, #tpu.memory_space<vmem>>, %arg5: memref<256x256xbf16, #tpu.memory_space<vmem>>, %arg6: memref<1x256xf32, #tpu.memory_space<vmem>>, %arg7: memref<256x128xbf16, #tpu.memory_space<vmem>>, %arg8: memref<1x128xf32, #tpu.memory_space<vmem>>, %arg9: memref<256x128xf32, #tpu.memory_space<vmem>>, %arg10: memref<256x256xf32, #tpu.memory_space<vmem>>) attributes {dimension_semantics = [#tpu.dimension_semantics<parallel>, #tpu.dimension_semantics<arbitrary>], iteration_bounds = array<i64: 2, 3>, scalar_prefetch = 0 : i64, scratch_operands = 1 : i64, tpu.core_type = #tpu.core_type<tc>, window_params = [{transform_indices = @transform_0, window_bounds = array<i64: 256, 128>}, {transform_indices = @transform_1, window_bounds = array<i64: 128, 256>}, {pipeline_mode = #tpu.pipeline_mode<synchronous>, transform_indices = @transform_2, window_bounds = array<i64: 1, 256>}, {pipeline_mode = #tpu.pipeline_mode<synchronous>, transform_indices = @transform_3, window_bounds = array<i64: 256, 256>}, {pipeline_mode = #tpu.pipeline_mode<synchronous>, transform_indices = @transform_4, window_bounds = array<i64: 1, 256>}, {pipeline_mode = #tpu.pipeline_mode<synchronous>, transform_indices = @transform_5, window_bounds = array<i64: 256, 128>}, {pipeline_mode = #tpu.pipeline_mode<synchronous>, transform_indices = @transform_6, window_bounds = array<i64: 1, 128>}, {transform_indices = @transform_7, window_bounds = array<i64: 256, 128>}]} {
    %c0_i32 = arith.constant 0 : i32
    %0 = arith.cmpi eq, %arg1, %c0_i32 : i32
    %1 = arith.extui %0 : i1 to i32
    %c0_i32_0 = arith.constant 0 : i32
    %2 = arith.cmpi ne, %1, %c0_i32_0 : i32
    scf.if %2 {
      %cst_9 = arith.constant 0.000000e+00 : f32
      %12 = vector.broadcast %cst_9 : f32 to vector<256x256xf32>
      %c0_10 = arith.constant 0 : index
      %c0_11 = arith.constant 0 : index
      %13 = vector.load %arg10[%c0_10, %c0_11] : memref<256x256xf32, #tpu.memory_space<vmem>>, vector<256x256xf32>
      tpu.vector_store %arg10[%c0_10, %c0_11], %12 {strides = array<i32>} : memref<256x256xf32, #tpu.memory_space<vmem>>, vector<256x256xf32>,
    } else {
    }
    %c0 = arith.constant 0 : index
    %c0_1 = arith.constant 0 : index
    %3 = vector.load %arg10[%c0, %c0_1] : memref<256x256xf32, #tpu.memory_space<vmem>>, vector<256x256xf32>
    %c0_2 = arith.constant 0 : index
    %c0_3 = arith.constant 0 : index
    %4 = vector.load %arg2[%c0_2, %c0_3] : memref<256x128xbf16, #tpu.memory_space<vmem>>, vector<256x128xbf16>
    %c0_4 = arith.constant 0 : index
    %c0_5 = arith.constant 0 : index
    %5 = vector.load %arg3[%c0_4, %c0_5] : memref<128x256xbf16, #tpu.memory_space<vmem>>, vector<128x256xbf16>
    %cst = arith.constant dense<0.000000e+00> : vector<256x256xf32>
    %6 = tpu.matmul %4, %5, %cst {dimension_numbers = #tpu.dot_dimension_numbers<[1], [0], [0], [1], [0, 0, 1, 1], [], []>} : vector<256x128xbf16>, vector<128x256xbf16>, vector<256x256xf32> -> vector<256x256xf32>
    %7 = arith.addf %3, %6 : vector<256x256xf32>
    %c0_6 = arith.constant 0 : index
    %c0_7 = arith.constant 0 : index
    %8 = vector.load %arg10[%c0_6, %c0_7] : memref<256x256xf32, #tpu.memory_space<vmem>>, vector<256x256xf32>
    tpu.vector_store %arg10[%c0_6, %c0_7], %7 {strides = array<i32>} : memref<256x256xf32, #tpu.memory_space<vmem>>, vector<256x256xf32>,
    %c2_i32 = arith.constant 2 : i32
    %9 = arith.cmpi eq, %arg1, %c2_i32 : i32
    %10 = arith.extui %9 : i1 to i32
    %c0_i32_8 = arith.constant 0 : i32
    %11 = arith.cmpi ne, %10, %c0_i32_8 : i32
    scf.if %11 {
      %c0_9 = arith.constant 0 : index
      %c0_10 = arith.constant 0 : index
      %12 = vector.load %arg10[%c0_9, %c0_10] : memref<256x256xf32, #tpu.memory_space<vmem>>, vector<256x256xf32>
      %c0_11 = arith.constant 0 : index
      %c0_12 = arith.constant 0 : index
      %13 = vector.load %arg4[%c0_11, %c0_12] : memref<1x256xf32, #tpu.memory_space<vmem>>, vector<1x256xf32>
      %14 = vector.broadcast %13 : vector<1x256xf32> to vector<256x256xf32>
      %15 = arith.addf %12, %14 : vector<256x256xf32>
      %cst_13 = arith.constant 0.000000e+00 : f32
      %16 = vector.broadcast %cst_13 : f32 to vector<256x256xf32>
      %17 = arith.maximumf %15, %16 : vector<256x256xf32>
      %18 = arith.truncf %17 : vector<256x256xf32> to vector<256x256xbf16>
      %c0_14 = arith.constant 0 : index
      %c0_15 = arith.constant 0 : index
      %19 = vector.load %arg5[%c0_14, %c0_15] : memref<256x256xbf16, #tpu.memory_space<vmem>>, vector<256x256xbf16>
      %c0_16 = arith.constant 0 : index
      %c0_17 = arith.constant 0 : index
      %20 = vector.load %arg6[%c0_16, %c0_17] : memref<1x256xf32, #tpu.memory_space<vmem>>, vector<1x256xf32>
      %cst_18 = arith.constant dense<0.000000e+00> : vector<256x256xf32>
      %21 = tpu.matmul %18, %19, %cst_18 {dimension_numbers = #tpu.dot_dimension_numbers<[1], [0], [0], [1], [0, 0, 1, 1], [], []>} : vector<256x256xbf16>, vector<256x256xbf16>, vector<256x256xf32> -> vector<256x256xf32>
      %22 = vector.broadcast %20 : vector<1x256xf32> to vector<256x256xf32>
      %23 = arith.addf %21, %22 : vector<256x256xf32>
      %cst_19 = arith.constant 0.000000e+00 : f32
      %24 = vector.broadcast %cst_19 : f32 to vector<256x256xf32>
      %25 = arith.maximumf %23, %24 : vector<256x256xf32>
      %26 = arith.truncf %25 : vector<256x256xf32> to vector<256x256xbf16>
      %cst_20 = arith.constant dense<0.000000e+00> : vector<256x256xf32>
      %27 = tpu.matmul %26, %19, %cst_20 {dimension_numbers = #tpu.dot_dimension_numbers<[1], [0], [0], [1], [0, 0, 1, 1], [], []>} : vector<256x256xbf16>, vector<256x256xbf16>, vector<256x256xf32> -> vector<256x256xf32>
      %28 = vector.broadcast %20 : vector<1x256xf32> to vector<256x256xf32>
      %29 = arith.addf %27, %28 : vector<256x256xf32>
      %cst_21 = arith.constant 0.000000e+00 : f32
      %30 = vector.broadcast %cst_21 : f32 to vector<256x256xf32>
      %31 = arith.maximumf %29, %30 : vector<256x256xf32>
      %32 = arith.truncf %31 : vector<256x256xf32> to vector<256x256xbf16>
      %cst_22 = arith.constant dense<0.000000e+00> : vector<256x256xf32>
      %33 = tpu.matmul %32, %19, %cst_22 {dimension_numbers = #tpu.dot_dimension_numbers<[1], [0], [0], [1], [0, 0, 1, 1], [], []>} : vector<256x256xbf16>, vector<256x256xbf16>, vector<256x256xf32> -> vector<256x256xf32>
      %34 = vector.broadcast %20 : vector<1x256xf32> to vector<256x256xf32>
      %35 = arith.addf %33, %34 : vector<256x256xf32>
      %cst_23 = arith.constant 0.000000e+00 : f32
      %36 = vector.broadcast %cst_23 : f32 to vector<256x256xf32>
      %37 = arith.maximumf %35, %36 : vector<256x256xf32>
      %38 = arith.truncf %37 : vector<256x256xf32> to vector<256x256xbf16>
      %cst_24 = arith.constant dense<0.000000e+00> : vector<256x256xf32>
      %39 = tpu.matmul %38, %19, %cst_24 {dimension_numbers = #tpu.dot_dimension_numbers<[1], [0], [0], [1], [0, 0, 1, 1], [], []>} : vector<256x256xbf16>, vector<256x256xbf16>, vector<256x256xf32> -> vector<256x256xf32>
      %40 = vector.broadcast %20 : vector<1x256xf32> to vector<256x256xf32>
      %41 = arith.addf %39, %40 : vector<256x256xf32>
      %cst_25 = arith.constant 0.000000e+00 : f32
      %42 = vector.broadcast %cst_25 : f32 to vector<256x256xf32>
      %43 = arith.maximumf %41, %42 : vector<256x256xf32>
      %44 = arith.truncf %43 : vector<256x256xf32> to vector<256x256xbf16>
      %c0_26 = arith.constant 0 : index
      %c0_27 = arith.constant 0 : index
      %45 = vector.load %arg7[%c0_26, %c0_27] : memref<256x128xbf16, #tpu.memory_space<vmem>>, vector<256x128xbf16>
      %cst_28 = arith.constant dense<0.000000e+00> : vector<256x128xf32>
      %46 = tpu.matmul %44, %45, %cst_28 {dimension_numbers = #tpu.dot_dimension_numbers<[1], [0], [0], [1], [0, 0, 1, 1], [], []>} : vector<256x256xbf16>, vector<256x128xbf16>, vector<256x128xf32> -> vector<256x128xf32>
      %c0_29 = arith.constant 0 : index
      %c0_30 = arith.constant 0 : index
      %47 = vector.load %arg8[%c0_29, %c0_30] : memref<1x128xf32, #tpu.memory_space<vmem>>, vector<1x128xf32>
      %48 = vector.broadcast %47 : vector<1x128xf32> to vector<256x128xf32>
      %49 = arith.addf %46, %48 : vector<256x128xf32>
      %c0_31 = arith.constant 0 : index
      %c0_32 = arith.constant 0 : index
      %50 = vector.load %arg9[%c0_31, %c0_32] : memref<256x128xf32, #tpu.memory_space<vmem>>, vector<256x128xf32>
      tpu.vector_store %arg9[%c0_31, %c0_32], %49 {strides = array<i32>} : memref<256x128xf32, #tpu.memory_space<vmem>>, vector<256x128xf32>,
    } else {
    }
    return
  }
  func.func @transform_0(%arg0: i32, %arg1: i32) -> (i32, i32) {
    %c0_i32 = arith.constant 0 : i32
    return %arg0, %arg1 : i32, i32
  }
  func.func @transform_1(%arg0: i32, %arg1: i32) -> (i32, i32) {
    %c0_i32 = arith.constant 0 : i32
    %c0_i32_0 = arith.constant 0 : i32
    return %arg1, %c0_i32 : i32, i32
  }
  func.func @transform_2(%arg0: i32, %arg1: i32) -> (i32, i32) {
    %c0_i32 = arith.constant 0 : i32
    %c0_i32_0 = arith.constant 0 : i32
    %c0_i32_1 = arith.constant 0 : i32
    return %c0_i32, %c0_i32_0 : i32, i32
  }
  func.func @transform_3(%arg0: i32, %arg1: i32) -> (i32, i32) {
    %c0_i32 = arith.constant 0 : i32
    %c0_i32_0 = arith.constant 0 : i32
    %c0_i32_1 = arith.constant 0 : i32
    return %c0_i32, %c0_i32_0 : i32, i32
  }
  func.func @transform_4(%arg0: i32, %arg1: i32) -> (i32, i32) {
    %c0_i32 = arith.constant 0 : i32
    %c0_i32_0 = arith.constant 0 : i32
    %c0_i32_1 = arith.constant 0 : i32
    return %c0_i32, %c0_i32_0 : i32, i32
  }
  func.func @transform_5(%arg0: i32, %arg1: i32) -> (i32, i32) {
    %c0_i32 = arith.constant 0 : i32
    %c0_i32_0 = arith.constant 0 : i32
    %c0_i32_1 = arith.constant 0 : i32
    return %c0_i32, %c0_i32_0 : i32, i32
  }
  func.func @transform_6(%arg0: i32, %arg1: i32) -> (i32, i32) {
    %c0_i32 = arith.constant 0 : i32
    %c0_i32_0 = arith.constant 0 : i32
    %c0_i32_1 = arith.constant 0 : i32
    return %c0_i32, %c0_i32_0 : i32, i32
  }
  func.func @transform_7(%arg0: i32, %arg1: i32) -> (i32, i32) {
    %c0_i32 = arith.constant 0 : i32
    %c0_i32_0 = arith.constant 0 : i32
    return %arg0, %c0_i32 : i32, i32
  }
}

</mosaic_0001>

<bundles_post_ra>
// kernel: _forward_padded.1
= control target key start
LH: loop header
LB: loop body
LE: loop exit
PB: predicated region body
PF: predicated region fallthrough
CT: control target
= control target key end

     0   :  { %s3735_s24 = smov 0   ;;  %s3737_s25 = smov 0   ;;  %s4899_s0 = inlined_call_operand.vmem [shape: bf16[512,384], index: 0, kind: input, shape index: {}]   ;;  %s4900_s1 = inlined_call_operand.vmem [shape: bf16[384,256], index: 1, kind: input, shape index: {}]   ;;  %s4901_s2 = inlined_call_operand.vmem [shape: f32[1,256], index: 2, kind: input, shape index: {}]   ;;  %s4902_s3 = inlined_call_operand.vmem [shape: bf16[256,256], index: 3, kind: input, shape index: {}]   ;;  %s4903_s4 = inlined_call_operand.vmem [shape: f32[1,256], index: 4, kind: input, shape index: {}]   ;;  %s4904_s5 = inlined_call_operand.vmem [shape: bf16[256,128], index: 5, kind: input, shape index: {}]   ;;  %s4905_s6 = inlined_call_operand.vmem [shape: f32[1,128], index: 6, kind: input, shape index: {}]   ;;  %s4906_s7 = inlined_call_operand.vmem [shape: f32[512,128], index: 7, kind: output, shape index: {}]  }
   0x1   :  { %s3739_s26 = smov 0   ;;  %s3741_s27 = smov 0  }
   0x2   :  { %s3743_s28 = smov 0   ;;  %s3745_s29 = smov 0  }
   0x3   :  { %s3747_s30 = smov 0  }
   0x4 LB: > { %s26_s8 = sadd.s32 1, %s3683_s28  ;;  %s29_s9 = sadd.s32 1, %s3687_s29  ;;  %s3691_s30 = sphi %s3747_s30, %s17_s30   ;;  %s3687_s29 = sphi %s3745_s29, %s4912_s29   ;;  %s3683_s28 = sphi %s3743_s28, %s4911_s28   ;;  %s3679_s27 = sphi %s3741_s27, %s4910_s27   ;;  %s3675_s26 = sphi %s3739_s26, %s4909_s26   ;;  %s3671_s25 = sphi %s3737_s25, %s4908_s25   ;;  %s3667_s24 = sphi %s3735_s24, %s4907_s24  }
   0x5   : > { %p27_p0 = scmp.ge.s32.totalorder %s26_s8, 3  ;;  %p45_p1 = scmp.ne.s32.totalorder %s3671_s25, %s3667_s24 }
   0x6   : > { %p46_p2 = scmp.eq.s32.totalorder %s3691_s30, 0  ;;  %s38_s13 = sadd.s32 1, %s3671_s25 }
   0x7   : > { %s4914_s8 = smov (%p27_p0, %s26_s8), 0  ;;  %s4916_s9 = smov (!%p27_p0, %s29_s9), %s3687_s29 }
   0x8   : > { %p47_p3 = por %p46_p2, %p45_p1  ;;  %p31_p4 = scmp.ge.s32.totalorder %s4916_s9, 2 }
   0x9   : > { %s34_s10 = ssub.s32 %s3683_s28, %s4914_s8  ;;  %p3185_p6 = scmp.ge.s32.totalorder %s3691_s30, 6 }
   0xa   : > { %s4918_s9 = smov (%p31_p4, %s4916_s9), 0 }
   0xb   : > { %s33_s11 = ssub.s32 %s3687_s29, %s4918_s9  ;;  %243 = sbr.rel (%p3185_p6) target bundleno = 46 (0x2e), region = 36 }
   0xc   : > { %s35_s12 = sor.u32 %s34_s10, %s33_s11 }
   0xd   : > { %p36_p5 = scmp.eq.s32.totalorder %s35_s12, 0 }
   0xf   : > { %s3786_s14 = scalar_select %p36_p5, %s3671_s25, %s38_s13  }
  0x12   : > { %246 = sbr.rel (!%p47_p3) target bundleno = 46 (0x2e), region = 40  ;;  %s248_s15 = sand.u32 (%p47_p3), 1, %s3671_s25  }
  0x13   : > { %s3443_s16 = smul.u32 (%p47_p3), 96, %s3687_s29  ;;  %s3186_s17 = sshll.u32 (%p47_p3), %s248_s15, 7 }
  0x14   : > { %s3800_s23 = scalar_lea.vmem (%p47_p3), [#allocation3], %s3186_s17 }
  0x15   : > { %s253_s18 = sadd.s32 (%p47_p3), %s3683_s28, %s3443_s16 }
  0x16   : > { %s3189_s19 = sshll.u32 (%p47_p3), %s253_s18, 2 }
  0x17   : > { %s3795_s22 = scalar_lea.vmem (%p47_p3), %s4899_s0, %s3189_s19 }
  0x18   : > { %v271_v0 = vld [vmem:[%s3795_s22] sm:$0xf] (%p47_p3)  ;;  %v273_v1 = vld [vmem:[%s3795_s22 + $0xc] sm:$0xf] (%p47_p3)  ;;  %v275_v2 = vld [vmem:[%s3795_s22 + $0x18] sm:$0xf] (%p47_p3) }
  0x19   : > { %272 = vst [vmem:[%s3800_s23] sm:$0xf] %v271_v0  ;;  %274 = vst [vmem:[%s3800_s23 + $0x4] sm:$0xf] %v273_v1  ;;  %v277_v3 = vld [vmem:[%s3795_s22 + $0x24] sm:$0xf] }
  0x1a   : > { %276 = vst [vmem:[%s3800_s23 + $0x8] sm:$0xf] %v275_v2  ;;  %v279_v4 = vld [vmem:[%s3795_s22 + $0x30] sm:$0xf]  ;;  %v281_v5 = vld [vmem:[%s3795_s22 + $0x3c] sm:$0xf] }
  0x1b   : > { %278 = vst [vmem:[%s3800_s23 + $0xc] sm:$0xf] %v277_v3  ;;  %280 = vst [vmem:[%s3800_s23 + $0x10] sm:$0xf] %v279_v4  ;;  %v283_v6 = vld [vmem:[%s3795_s22 + $0x48] sm:$0xf] }
  0x1c   : > { %282 = vst [vmem:[%s3800_s23 + $0x14] sm:$0xf] %v281_v5  ;;  %v285_v7 = vld [vmem:[%s3795_s22 + $0x54] sm:$0xf]  ;;  %v287_v8 = vld [vmem:[%s3795_s22 + $0x60] sm:$0xf] }
  0x1d   : > { %284 = vst [vmem:[%s3800_s23 + $0x18] sm:$0xf] %v283_v6  ;;  %286 = vst [vmem:[%s3800_s23 + $0x1c] sm:$0xf] %v285_v7  ;;  %v289_v9 = vld [vmem:[%s3795_s22 + $0x6c] sm:$0xf] }
  0x1e   : > { %288 = vst [vmem:[%s3800_s23 + $0x20] sm:$0xf] %v287_v8  ;;  %v291_v10 = vld [vmem:[%s3795_s22 + $0x78] sm:$0xf]  ;;  %v293_v11 = vld [vmem:[%s3795_s22 + $0x84] sm:$0xf] }
  0x1f   : > { %290 = vst [vmem:[%s3800_s23 + $0x24] sm:$0xf] %v289_v9  ;;  %292 = vst [vmem:[%s3800_s23 + $0x28] sm:$0xf] %v291_v10  ;;  %v295_v12 = vld [vmem:[%s3795_s22 + $0x90] sm:$0xf] }
  0x20   : > { %294 = vst [vmem:[%s3800_s23 + $0x2c] sm:$0xf] %v293_v11  ;;  %v297_v13 = vld [vmem:[%s3795_s22 + $0x9c] sm:$0xf]  ;;  %v299_v14 = vld [vmem:[%s3795_s22 + $0xa8] sm:$0xf] }
  0x21   : > { %296 = vst [vmem:[%s3800_s23 + $0x30] sm:$0xf] %v295_v12  ;;  %298 = vst [vmem:[%s3800_s23 + $0x34] sm:$0xf] %v297_v13  ;;  %v301_v15 = vld [vmem:[%s3795_s22 + $0xb4] sm:$0xf] }
  0x22   : > { %300 = vst [vmem:[%s3800_s23 + $0x38] sm:$0xf] %v299_v14  ;;  %v303_v16 = vld [vmem:[%s3795_s22 + $0xc0] sm:$0xf]  ;;  %v305_v17 = vld [vmem:[%s3795_s22 + $0xcc] sm:$0xf] }
  0x23   : > { %302 = vst [vmem:[%s3800_s23 + $0x3c] sm:$0xf] %v301_v15  ;;  %304 = vst [vmem:[%s3800_s23 + $0x40] sm:$0xf] %v303_v16  ;;  %v307_v18 = vld [vmem:[%s3795_s22 + $0xd8] sm:$0xf] }
  0x24   : > { %306 = vst [vmem:[%s3800_s23 + $0x44] sm:$0xf] %v305_v17  ;;  %v309_v19 = vld [vmem:[%s3795_s22 + $0xe4] sm:$0xf]  ;;  %v311_v20 = vld [vmem:[%s3795_s22 + $0xf0] sm:$0xf] }
  0x25   : > { %308 = vst [vmem:[%s3800_s23 + $0x48] sm:$0xf] %v307_v18  ;;  %310 = vst [vmem:[%s3800_s23 + $0x4c] sm:$0xf] %v309_v19  ;;  %v313_v21 = vld [vmem:[%s3795_s22 + $0xfc] sm:$0xf] }
  0x26   : > { %312 = vst [vmem:[%s3800_s23 + $0x50] sm:$0xf] %v311_v20  ;;  %v315_v22 = vld [vmem:[%s3795_s22 + $0x108] sm:$0xf]  ;;  %v317_v23 = vld [vmem:[%s3795_s22 + $0x114] sm:$0xf] }
  0x27   : > { %314 = vst [vmem:[%s3800_s23 + $0x54] sm:$0xf] %v313_v21  ;;  %316 = vst [vmem:[%s3800_s23 + $0x58] sm:$0xf] %v315_v22  ;;  %v319_v24 = vld [vmem:[%s3795_s22 + $0x120] sm:$0xf] }
  0x28   : > { %318 = vst [vmem:[%s3800_s23 + $0x5c] sm:$0xf] %v317_v23  ;;  %v321_v25 = vld [vmem:[%s3795_s22 + $0x12c] sm:$0xf]  ;;  %v323_v26 = vld [vmem:[%s3795_s22 + $0x138] sm:$0xf] }
  0x29   : > { %320 = vst [vmem:[%s3800_s23 + $0x60] sm:$0xf] %v319_v24  ;;  %322 = vst [vmem:[%s3800_s23 + $0x64] sm:$0xf] %v321_v25  ;;  %v325_v27 = vld [vmem:[%s3795_s22 + $0x144] sm:$0xf] }
  0x2a   : > { %324 = vst [vmem:[%s3800_s23 + $0x68] sm:$0xf] %v323_v26  ;;  %v327_v28 = vld [vmem:[%s3795_s22 + $0x150] sm:$0xf]  ;;  %v329_v29 = vld [vmem:[%s3795_s22 + $0x15c] sm:$0xf] }
  0x2b   : > { %326 = vst [vmem:[%s3800_s23 + $0x6c] sm:$0xf] %v325_v27  ;;  %328 = vst [vmem:[%s3800_s23 + $0x70] sm:$0xf] %v327_v28  ;;  %v331_v30 = vld [vmem:[%s3795_s22 + $0x168] sm:$0xf] }
  0x2c   : > { %330 = vst [vmem:[%s3800_s23 + $0x74] sm:$0xf] %v329_v29  ;;  %v333_v31 = vld [vmem:[%s3795_s22 + $0x174] sm:$0xf]  ;;  %332 = vst [vmem:[%s3800_s23 + $0x78] sm:$0xf] %v331_v30 }
  0x2d   : > { %334 = vst [vmem:[%s3800_s23 + $0x7c] sm:$0xf] %v333_v31 }
  0x2e PF: > { %p3190_p7 = scmp.ge.s32.totalorder %s3691_s30, 1  ;;  %p430_p8 = scmp.lt.s32.totalorder %s3691_s30, 7 }
  0x30   : > { %p431_p9 = pnand %p3190_p7, %p430_p8 }
  0x31   : > { %s437_s10 = sand.u32 (!%p431_p9), 1, %s3667_s24   ;;  %s3192_s11 = sshll.u32 (!%p431_p9), %s3675_s26, 4 }
  0x32   : > { %434 = sbr.rel (%p431_p9) target bundleno = 1672 (0x688), region = 85  ;;  %s3191_s12 = sshll.u32 (!%p431_p9), %s437_s10, 7 }
  0x33   : > { %p476_p10 = scmp.lt.s32.totalorder (!%p431_p9), %s3192_s11, 47  ;;  %s3195_s13 = sshll.u32 (!%p431_p9), %s3679_s27, 5 }
  0x34   : > { %p483_p11 = scmp.lt.s32.totalorder (!%p431_p9), %s3195_s13, 63  ;;  %s3878_s24 = scalar_lea.vmem (!%p431_p9), [#allocation3], %s3191_s12 }
  0x35   : > { %p3197_p12 = scmp.ne.s32.totalorder (!%p431_p9), %s3675_s26, 0 }
  0x39   : > { %s4920_s11 = smov (!%p476_p10, %s3192_s11), 47  ;;  %s4922_s13 = smov (!%p483_p11, %s3195_s13), 63 }
  0x3a   : > { %s3282_s15 = sshll.u32 %s4920_s11, 3  ;;  %s3196_s19 = sshll.u32 %s4922_s13, 3  ;;  %v3693_v32 = vmov (!%p3197_p12), 0.0  }
  0x3b   : > { %s3871_s18 = scalar_lea.vmem %s4900_s1, %s3282_s15  ;;  %s3876_s22 = scalar_lea.vmem %s4906_s7, %s3196_s19  ;;  %493 = vst [vmem:[#allocation2] sm:$0xff] (!%p3197_p12), %v3693_v32  ;;  %494 = vst [vmem:[#allocation2 + $0x8] sm:$0xff] (!%p3197_p12), %v3693_v32 }
  0x3c   : > { %492 = sbr.rel (%p3197_p12) target bundleno = 91 (0x5b), region = 93  ;;  %495 = vst [vmem:[#allocation2 + $0x10] sm:$0xff] (!%p3197_p12), %v3693_v32  ;;  %496 = vst [vmem:[#allocation2 + $0x18] sm:$0xff] (!%p3197_p12), %v3693_v32 }
  0x3d   : > { %497 = vst [vmem:[#allocation2 + $0x20] sm:$0xff] (!%p3197_p12), %v3693_v32  ;;  %498 = vst [vmem:[#allocation2 + $0x28] sm:$0xff] (!%p3197_p12), %v3693_v32 }
  0x3e   : > { %499 = vst [vmem:[#allocation2 + $0x30] sm:$0xff] (!%p3197_p12), %v3693_v32  ;;  %500 = vst [vmem:[#allocation2 + $0x38] sm:$0xff] (!%p3197_p12), %v3693_v32 }
  0x3f   : > { %501 = vst [vmem:[#allocation2 + $0x40] sm:$0xff] (!%p3197_p12), %v3693_v32  ;;  %502 = vst [vmem:[#allocation2 + $0x48] sm:$0xff] (!%p3197_p12), %v3693_v32 }
  0x40   : > { %503 = vst [vmem:[#allocation2 + $0x50] sm:$0xff] (!%p3197_p12), %v3693_v32  ;;  %504 = vst [vmem:[#allocation2 + $0x58] sm:$0xff] (!%p3197_p12), %v3693_v32 }
  0x41   : > { %505 = vst [vmem:[#allocation2 + $0x60] sm:$0xff] (!%p3197_p12), %v3693_v32  ;;  %506 = vst [vmem:[#allocation2 + $0x68] sm:$0xff] (!%p3197_p12), %v3693_v32 }
  0x42   : > { %507 = vst [vmem:[#allocation2 + $0x70] sm:$0xff] (!%p3197_p12), %v3693_v32  ;;  %508 = vst [vmem:[#allocation2 + $0x78] sm:$0xff] (!%p3197_p12), %v3693_v32 }
  0x43   : > { %509 = vst [vmem:[#allocation2 + $0x80] sm:$0xff] %v3693_v32  ;;  %510 = vst [vmem:[#allocation2 + $0x88] sm:$0xff] %v3693_v32 }
  0x44   : > { %511 = vst [vmem:[#allocation2 + $0x90] sm:$0xff] %v3693_v32  ;;  %512 = vst [vmem:[#allocation2 + $0x98] sm:$0xff] %v3693_v32 }
  0x45   : > { %513 = vst [vmem:[#allocation2 + $0xa0] sm:$0xff] %v3693_v32  ;;  %514 = vst [vmem:[#allocation2 + $0xa8] sm:$0xff] %v3693_v32 }
  0x46   : > { %515 = vst [vmem:[#allocation2 + $0xb0] sm:$0xff] %v3693_v32  ;;  %516 = vst [vmem:[#allocation2 + $0xb8] sm:$0xff] %v3693_v32 }
  0x47   : > { %517 = vst [vmem:[#allocation2 + $0xc0] sm:$0xff] %v3693_v32  ;;  %518 = vst [vmem:[#allocation2 + $0xc8] sm:$0xff] %v3693_v32 }
  0x48   : > { %519 = vst [vmem:[#allocation2 + $0xd0] sm:$0xff] %v3693_v32  ;;  %520 = vst [vmem:[#allocation2 + $0xd8] sm:$0xff] %v3693_v32 }
  0x49   : > { %521 = vst [vmem:[#allocation2 + $0xe0] sm:$0xff] %v3693_v32  ;;  %522 = vst [vmem:[#allocation2 + $0xe8] sm:$0xff] %v3693_v32 }
  0x4a   : > { %523 = vst [vmem:[#allocation2 + $0xf0] sm:$0xff] %v3693_v32  ;;  %524 = vst [vmem:[#allocation2 + $0xf8] sm:$0xff] %v3693_v32 }
  0x4b   : > { %525 = vst [vmem:[#allocation2 + $0x100] sm:$0xff] %v3693_v32  ;;  %526 = vst [vmem:[#allocation2 + $0x108] sm:$0xff] %v3693_v32 }
  0x4c   : > { %527 = vst [vmem:[#allocation2 + $0x110] sm:$0xff] %v3693_v32  ;;  %528 = vst [vmem:[#allocation2 + $0x118] sm:$0xff] %v3693_v32 }
  0x4d   : > { %529 = vst [vmem:[#allocation2 + $0x120] sm:$0xff] %v3693_v32  ;;  %530 = vst [vmem:[#allocation2 + $0x128] sm:$0xff] %v3693_v32 }
  0x4e   : > { %531 = vst [vmem:[#allocation2 + $0x130] sm:$0xff] %v3693_v32  ;;  %532 = vst [vmem:[#allocation2 + $0x138] sm:$0xff] %v3693_v32 }
  0x4f   : > { %533 = vst [vmem:[#allocation2 + $0x140] sm:$0xff] %v3693_v32  ;;  %534 = vst [vmem:[#allocation2 + $0x148] sm:$0xff] %v3693_v32 }
  0x50   : > { %535 = vst [vmem:[#allocation2 + $0x150] sm:$0xff] %v3693_v32  ;;  %536 = vst [vmem:[#allocation2 + $0x158] sm:$0xff] %v3693_v32 }
  0x51   : > { %537 = vst [vmem:[#allocation2 + $0x160] sm:$0xff] %v3693_v32  ;;  %538 = vst [vmem:[#allocation2 + $0x168] sm:$0xff] %v3693_v32 }
  0x52   : > { %539 = vst [vmem:[#allocation2 + $0x170] sm:$0xff] %v3693_v32  ;;  %540 = vst [vmem:[#allocation2 + $0x178] sm:$0xff] %v3693_v32 }
  0x53   : > { %541 = vst [vmem:[#allocation2 + $0x180] sm:$0xff] %v3693_v32  ;;  %542 = vst [vmem:[#allocation2 + $0x188] sm:$0xff] %v3693_v32 }
  0x54   : > { %543 = vst [vmem:[#allocation2 + $0x190] sm:$0xff] %v3693_v32  ;;  %544 = vst [vmem:[#allocation2 + $0x198] sm:$0xff] %v3693_v32 }
  0x55   : > { %545 = vst [vmem:[#allocation2 + $0x1a0] sm:$0xff] %v3693_v32  ;;  %546 = vst [vmem:[#allocation2 + $0x1a8] sm:$0xff] %v3693_v32 }
  0x56   : > { %547 = vst [vmem:[#allocation2 + $0x1b0] sm:$0xff] %v3693_v32  ;;  %548 = vst [vmem:[#allocation2 + $0x1b8] sm:$0xff] %v3693_v32 }
  0x57   : > { %549 = vst [vmem:[#allocation2 + $0x1c0] sm:$0xff] %v3693_v32  ;;  %550 = vst [vmem:[#allocation2 + $0x1c8] sm:$0xff] %v3693_v32 }
  0x58   : > { %551 = vst [vmem:[#allocation2 + $0x1d0] sm:$0xff] %v3693_v32  ;;  %552 = vst [vmem:[#allocation2 + $0x1d8] sm:$0xff] %v3693_v32 }
  0x59   : > { %553 = vst [vmem:[#allocation2 + $0x1e0] sm:$0xff] %v3693_v32  ;;  %554 = vst [vmem:[#allocation2 + $0x1e8] sm:$0xff] %v3693_v32 }
  0x5a   : > { %555 = vst [vmem:[#allocation2 + $0x1f0] sm:$0xff] %v3693_v32  ;;  %556 = vst [vmem:[#allocation2 + $0x1f8] sm:$0xff] %v3693_v32 }
  0x5b PF: > { %v3502_v33 = vld [vmem:[%s3871_s18 + $0x4] ss:$8 sps:$4 sm:$0xff]   ;;  %v3504_v34 = vld [vmem:[%s3871_s18] ss:$8 sps:$4 sm:$0xff]   ;;  %v3694_v35 = vmov 0   ;;  %v3530_v54 = vld [vmem:[%s3878_s24 + $0x10] sm:$0xff]  }
  0x5c   : > { %877 = vmatprep.mubr.bf16.mxu0 %v3694_v35  ;;  %957 = vmatprep.mubr.bf16.mxu1 %v3694_v35  ;;  %v3505_v36 = vld [vmem:[%s3871_s18 + $0x14] ss:$8 sps:$4 sm:$0xff]   ;;  %v3507_v37 = vld [vmem:[%s3871_s18 + $0x10] ss:$8 sps:$4 sm:$0xff]   ;;  %v3508_v38 = vld [vmem:[%s3871_s18 + $0x24] ss:$8 sps:$4 sm:$0xff]  }
  0x5d   : > { %845 = vmatprep.subr.bf16.mxu0 %v3502_v33  ;;  %3395 = vmatprep.subr.bf16.mxu1 %v3502_v33  ;;  %v3510_v39 = vld [vmem:[%s3871_s18 + $0x20] ss:$8 sps:$4 sm:$0xff]   ;;  %v3511_v40 = vld [vmem:[%s3871_s18 + $0x34] ss:$8 sps:$4 sm:$0xff]   ;;  %v3513_v41 = vld [vmem:[%s3871_s18 + $0x30] ss:$8 sps:$4 sm:$0xff]  }
  0x5e   : > { %846 = vmatpush1.bf16.msra.mxu0 %v3504_v34  ;;  %3403 = vmatpush1.bf16.msra.mxu1 %v3504_v34  ;;  %v3514_v42 = vld [vmem:[%s3871_s18 + $0x44] ss:$8 sps:$4 sm:$0xff]   ;;  %v3516_v43 = vld [vmem:[%s3871_s18 + $0x40] ss:$8 sps:$4 sm:$0xff]   ;;  %v3517_v44 = vld [vmem:[%s3871_s18 + $0x54] ss:$8 sps:$4 sm:$0xff]  }
  0x5f   : > { %847 = vmatprep.subr.bf16.mxu0 %v3505_v36  ;;  %3396 = vmatprep.subr.bf16.mxu1 %v3505_v36  ;;  %v3519_v45 = vld [vmem:[%s3871_s18 + $0x50] ss:$8 sps:$4 sm:$0xff]   ;;  %v3520_v46 = vld [vmem:[%s3871_s18 + $0x64] ss:$8 sps:$4 sm:$0xff]   ;;  %v3522_v47 = vld [vmem:[%s3871_s18 + $0x60] ss:$8 sps:$4 sm:$0xff]  }
  0x60   : > { %v3523_v48 = vld [vmem:[%s3871_s18 + $0x74] ss:$8 sps:$4 sm:$0xff]   ;;  %v3525_v49 = vld [vmem:[%s3871_s18 + $0x70] ss:$8 sps:$4 sm:$0xff]   ;;  %v3526_v50 = vld [vmem:[%s3878_s24] sm:$0xff]   ;;  %p3230_p13 = scmp.ne.s32.totalorder %s3675_s26, 2 }
  0x61   : > { %v3527_v51 = vld [vmem:[%s3878_s24 + $0x40] sm:$0xff]   ;;  %v3528_v52 = vld [vmem:[%s3878_s24 + $0x8] sm:$0xff]   ;;  %v3531_v55 = vld [vmem:[%s3878_s24 + $0x50] sm:$0xff]  }
  0x62   : > { %848 = vmatpush1.bf16.msra.mxu0 %v3507_v37  ;;  %3404 = vmatpush1.bf16.msra.mxu1 %v3507_v37  ;;  %v3529_v53 = vld [vmem:[%s3878_s24 + $0x48] sm:$0xff]   ;;  %v3532_v56 = vld [vmem:[%s3878_s24 + $0x18] sm:$0xff]   ;;  %v3534_v58 = vld [vmem:[%s3878_s24 + $0x20] sm:$0xff]  }
  0x63   : > { %849 = vmatprep.subr.bf16.mxu0 %v3508_v38  ;;  %3397 = vmatprep.subr.bf16.mxu1 %v3508_v38  ;;  %v3533_v57 = vld [vmem:[%s3878_s24 + $0x58] sm:$0xff]   ;;  %v3535_v59 = vld [vmem:[%s3878_s24 + $0x60] sm:$0xff]   ;;  %v3536_v60 = vld [vmem:[%s3878_s24 + $0x28] sm:$0xff]  }
  0x64   : > { %v3537_v61 = vld [vmem:[%s3878_s24 + $0x68] sm:$0xff]   ;;  %v3538_v62 = vld [vmem:[%s3878_s24 + $0x30] sm:$0xff]   ;;  %v3540_v0 = vld [vmem:[%s3878_s24 + $0x38] sm:$0xff]  }
  0x65   : > { %v3539_v63 = vld [vmem:[%s3878_s24 + $0x70] sm:$0xff]   ;;  %v3541_v1 = vld [vmem:[%s3878_s24 + $0x78] sm:$0xff]   ;;  %v557_v2 = vld [vmem:[#allocation2] sm:$0xff] }
  0x66   : > { %850 = vmatpush1.bf16.msra.mxu0 %v3510_v39  ;;  %3405 = vmatpush1.bf16.msra.mxu1 %v3510_v39  ;;  %v589_v3 = vld [vmem:[#allocation2 + $0x100] sm:$0xff]  ;;  %v558_v4 = vld [vmem:[#allocation2 + $0x8] sm:$0xff]  ;;  %v559_v8 = vld [vmem:[#allocation2 + $0x10] sm:$0xff] }
  0x67   : > { %851 = vmatprep.subr.bf16.mxu0 %v3511_v40  ;;  %3398 = vmatprep.subr.bf16.mxu1 %v3511_v40  ;;  %v590_v5 = vld [vmem:[#allocation2 + $0x108] sm:$0xff]  ;;  %v591_v9 = vld [vmem:[#allocation2 + $0x110] sm:$0xff]  ;;  %v560_v14 = vld [vmem:[#allocation2 + $0x18] sm:$0xff] }
  0x68   : > { %v592_v15 = vld [vmem:[#allocation2 + $0x118] sm:$0xff]  ;;  %v561_v26 = vld [vmem:[#allocation2 + $0x20] sm:$0xff]  ;;  %v562_v28 = vld [vmem:[#allocation2 + $0x28] sm:$0xff] }
  0x69   : > { %v593_v27 = vld [vmem:[#allocation2 + $0x120] sm:$0xff]  ;;  %v594_v29 = vld [vmem:[#allocation2 + $0x128] sm:$0xff]  ;;  %v563_v32 = vld [vmem:[#allocation2 + $0x30] sm:$0xff] }
  0x6a   : > { %852 = vmatpush1.bf16.msra.mxu0 %v3513_v41  ;;  %3406 = vmatpush1.bf16.msra.mxu1 %v3513_v41  ;;  %v595_v33 = vld [vmem:[#allocation2 + $0x130] sm:$0xff]  ;;  %v564_v38 = vld [vmem:[#allocation2 + $0x38] sm:$0xff] }
  0x6b   : > { %853 = vmatprep.subr.bf16.mxu0 %v3514_v42  ;;  %3399 = vmatprep.subr.bf16.mxu1 %v3514_v42  ;;  %v596_v39 = vld [vmem:[#allocation2 + $0x138] sm:$0xff] }
  0x6e   : > { %854 = vmatpush1.bf16.msra.mxu0 %v3516_v43  ;;  %3407 = vmatpush1.bf16.msra.mxu1 %v3516_v43 }
  0x6f   : > { %855 = vmatprep.subr.bf16.mxu0 %v3517_v44  ;;  %3400 = vmatprep.subr.bf16.mxu1 %v3517_v44 }
  0x72   : > { %856 = vmatpush1.bf16.msra.mxu0 %v3519_v45  ;;  %3408 = vmatpush1.bf16.msra.mxu1 %v3519_v45 }
  0x73   : > { %857 = vmatprep.subr.bf16.mxu0 %v3520_v46  ;;  %3401 = vmatprep.subr.bf16.mxu1 %v3520_v46 }
  0x76   : > { %858 = vmatpush1.bf16.msra.mxu0 %v3522_v47  ;;  %3409 = vmatpush1.bf16.msra.mxu1 %v3522_v47 }
  0x77   : > { %859 = vmatprep.subr.bf16.mxu0 %v3523_v48  ;;  %3402 = vmatprep.subr.bf16.mxu1 %v3523_v48 }
  0x7a   : > { %860 = vmatpush1.bf16.msra.mxu0 %v3525_v49  ;;  %3410 = vmatpush1.bf16.msra.mxu1 %v3525_v49 }
  0x7d   : > { %878 = vmatmul.mubr.bf16.vlgmr.msra.gmra.mrb[0].mxu0 %v3526_v50  ;;  %958 = vmatmul.mubr.bf16.vlgmr.msra.gmra.mrb[0].mxu1 %v3527_v51  ;;  %v565_v50 = vld [vmem:[#allocation2 + $0x40] sm:$0xff] }
  0x7e   : > { %887 = vmatprep.mubr.bf16.mxu0 %v3694_v35  ;;  %967 = vmatprep.mubr.bf16.mxu1 %v3694_v35  ;;  %v597_v51 = vld [vmem:[#allocation2 + $0x140] sm:$0xff] }
  0x85   : > { %888 = vmatmul.mubr.bf16.gmra.mrb[4].mxu0 %v3528_v52  ;;  %968 = vmatmul.mubr.bf16.gmra.mrb[4].mxu1 %v3529_v53  ;;  %v566_v52 = vld [vmem:[#allocation2 + $0x48] sm:$0xff] }
  0x86   : > { %897 = vmatprep.mubr.bf16.mxu0 %v3694_v35  ;;  %977 = vmatprep.mubr.bf16.mxu1 %v3694_v35  ;;  %v598_v53 = vld [vmem:[#allocation2 + $0x148] sm:$0xff] }
  0x8d   : > { %898 = vmatmul.mubr.bf16.gmra.mrb[8].mxu0 %v3530_v54  ;;  %978 = vmatmul.mubr.bf16.gmra.mrb[8].mxu1 %v3531_v55 }
  0x8e   : > { %907 = vmatprep.mubr.bf16.mxu0 %v3694_v35  ;;  %987 = vmatprep.mubr.bf16.mxu1 %v3694_v35 }
  0x95   : > { %908 = vmatmul.mubr.bf16.gmra.mrb[12].mxu0 %v3532_v56  ;;  %988 = vmatmul.mubr.bf16.gmra.mrb[12].mxu1 %v3533_v57  ;;  %v567_v56 = vld [vmem:[#allocation2 + $0x50] sm:$0xff] }
  0x96   : > { %917 = vmatprep.mubr.bf16.mxu0 %v3694_v35  ;;  %997 = vmatprep.mubr.bf16.mxu1 %v3694_v35  ;;  %v599_v57 = vld [vmem:[#allocation2 + $0x150] sm:$0xff] }
  0x9d   : > { %918 = vmatmul.mubr.bf16.gmra.mrb[16].mxu0 %v3534_v58  ;;  %998 = vmatmul.mubr.bf16.gmra.mrb[16].mxu1 %v3535_v59 }
  0x9e   : > { %927 = vmatprep.mubr.bf16.mxu0 %v3694_v35  ;;  %1007 = vmatprep.mubr.bf16.mxu1 %v3694_v35 }
  0xa5   : > { %928 = vmatmul.mubr.bf16.gmra.mrb[20].mxu0 %v3536_v60  ;;  %1008 = vmatmul.mubr.bf16.gmra.mrb[20].mxu1 %v3537_v61 }
  0xa6   : > { %937 = vmatprep.mubr.bf16.mxu0 %v3694_v35  ;;  %1017 = vmatprep.mubr.bf16.mxu1 %v3694_v35 }
  0xad   : > { %938 = vmatmul.mubr.bf16.gmra.mrb[24].mxu0 %v3538_v62  ;;  %1018 = vmatmul.mubr.bf16.gmra.mrb[24].mxu1 %v3539_v63  ;;  %v568_v62 = vld [vmem:[#allocation2 + $0x58] sm:$0xff] }
  0xae   : > { %947 = vmatprep.mubr.bf16.mxu0 %v3694_v35  ;;  %1027 = vmatprep.mubr.bf16.mxu1 %v3694_v35  ;;  %v600_v63 = vld [vmem:[#allocation2 + $0x158] sm:$0xff] }
  0xb5   : > { %948 = vmatmul.mubr.bf16.gmra.mrb[28].mxu0 %v3540_v0  ;;  %1028 = vmatmul.mubr.bf16.gmra.mrb[28].mxu1 %v3541_v1 }
 0x150   : > { %v879_v6 = vpop.f32.mrb[0].mxu0  ;;  %v959_v7 = vpop.f32.mrb[0].mxu1 }
 0x151   : > { %v1038_v10 = vadd.f32 %v879_v6, %v557_v2  ;;  %v1070_v11 = vadd.f32 %v959_v7, %v589_v3  ;;  %v881_v12 = vpop.f32.mrb[1].mxu0  ;;  %v961_v13 = vpop.f32.mrb[1].mxu1 }
 0x152   : > { %v1039_v16 = vadd.f32 %v881_v12, %v558_v4  ;;  %v1071_v17 = vadd.f32 %v961_v13, %v590_v5  ;;  %v883_v18 = vpop.f32.mrb[2].mxu0  ;;  %v963_v19 = vpop.f32.mrb[2].mxu1  ;;  %v570_v12 = vld [vmem:[#allocation2 + $0x68] sm:$0xff] }
 0x153   : > { %1102 = vst [vmem:[#allocation2] sm:$0xff] %v1038_v10  ;;  %1134 = vst [vmem:[#allocation2 + $0x100] sm:$0xff] %v1070_v11  ;;  %v1040_v20 = vadd.f32 %v883_v18, %v559_v8  ;;  %v1072_v21 = vadd.f32 %v963_v19, %v591_v9  ;;  %v885_v22 = vpop.f32.mrb[3].mxu0  ;;  %v965_v23 = vpop.f32.mrb[3].mxu1  ;;  %v569_v10 = vld [vmem:[#allocation2 + $0x60] sm:$0xff]  ;;  %v602_v13 = vld [vmem:[#allocation2 + $0x168] sm:$0xff] }
 0x154   : > { %1103 = vst [vmem:[#allocation2 + $0x8] sm:$0xff] %v1039_v16  ;;  %1135 = vst [vmem:[#allocation2 + $0x108] sm:$0xff] %v1071_v17  ;;  %v1041_v24 = vadd.f32 %v885_v22, %v560_v14  ;;  %v1073_v25 = vadd.f32 %v965_v23, %v592_v15  ;;  %v601_v11 = vld [vmem:[#allocation2 + $0x160] sm:$0xff]  ;;  %v571_v16 = vld [vmem:[#allocation2 + $0x70] sm:$0xff] }
 0x155   : > { %1104 = vst [vmem:[#allocation2 + $0x10] sm:$0xff] %v1040_v20  ;;  %1136 = vst [vmem:[#allocation2 + $0x110] sm:$0xff] %v1072_v21  ;;  %v603_v17 = vld [vmem:[#allocation2 + $0x170] sm:$0xff]  ;;  %v572_v22 = vld [vmem:[#allocation2 + $0x78] sm:$0xff] }
 0x156   : > { %1105 = vst [vmem:[#allocation2 + $0x18] sm:$0xff] %v1041_v24  ;;  %1137 = vst [vmem:[#allocation2 + $0x118] sm:$0xff] %v1073_v25  ;;  %v604_v23 = vld [vmem:[#allocation2 + $0x178] sm:$0xff] }
 0x158   : > { %v889_v30 = vpop.f32.mrb[4].mxu0  ;;  %v969_v31 = vpop.f32.mrb[4].mxu1 }
 0x159   : > { %v1042_v34 = vadd.f32 %v889_v30, %v561_v26  ;;  %v1074_v35 = vadd.f32 %v969_v31, %v593_v27  ;;  %v891_v36 = vpop.f32.mrb[5].mxu0  ;;  %v971_v37 = vpop.f32.mrb[5].mxu1 }
 0x15a   : > { %v1043_v40 = vadd.f32 %v891_v36, %v562_v28  ;;  %v1075_v41 = vadd.f32 %v971_v37, %v594_v29  ;;  %v893_v42 = vpop.f32.mrb[6].mxu0  ;;  %v973_v43 = vpop.f32.mrb[6].mxu1  ;;  %v574_v36 = vld [vmem:[#allocation2 + $0x88] sm:$0xff] }
 0x15b   : > { %1106 = vst [vmem:[#allocation2 + $0x20] sm:$0xff] %v1042_v34  ;;  %1138 = vst [vmem:[#allocation2 + $0x120] sm:$0xff] %v1074_v35  ;;  %v1044_v44 = vadd.f32 %v893_v42, %v563_v32  ;;  %v1076_v45 = vadd.f32 %v973_v43, %v595_v33  ;;  %v895_v46 = vpop.f32.mrb[7].mxu0  ;;  %v975_v47 = vpop.f32.mrb[7].mxu1  ;;  %v573_v34 = vld [vmem:[#allocation2 + $0x80] sm:$0xff]  ;;  %v606_v37 = vld [vmem:[#allocation2 + $0x188] sm:$0xff] }
 0x15c   : > { %1107 = vst [vmem:[#allocation2 + $0x28] sm:$0xff] %v1043_v40  ;;  %1139 = vst [vmem:[#allocation2 + $0x128] sm:$0xff] %v1075_v41  ;;  %v1045_v48 = vadd.f32 %v895_v46, %v564_v38  ;;  %v1077_v49 = vadd.f32 %v975_v47, %v596_v39  ;;  %v605_v35 = vld [vmem:[#allocation2 + $0x180] sm:$0xff]  ;;  %v575_v40 = vld [vmem:[#allocation2 + $0x90] sm:$0xff] }
 0x15d   : > { %1108 = vst [vmem:[#allocation2 + $0x30] sm:$0xff] %v1044_v44  ;;  %1140 = vst [vmem:[#allocation2 + $0x130] sm:$0xff] %v1076_v45  ;;  %v607_v41 = vld [vmem:[#allocation2 + $0x190] sm:$0xff]  ;;  %v576_v46 = vld [vmem:[#allocation2 + $0x98] sm:$0xff] }
 0x15e   : > { %1109 = vst [vmem:[#allocation2 + $0x38] sm:$0xff] %v1045_v48  ;;  %1141 = vst [vmem:[#allocation2 + $0x138] sm:$0xff] %v1077_v49  ;;  %v608_v47 = vld [vmem:[#allocation2 + $0x198] sm:$0xff] }
 0x160   : > { %v899_v54 = vpop.f32.mrb[8].mxu0  ;;  %v979_v55 = vpop.f32.mrb[8].mxu1 }
 0x161   : > { %v1046_v58 = vadd.f32 %v899_v54, %v565_v50  ;;  %v1078_v59 = vadd.f32 %v979_v55, %v597_v51  ;;  %v901_v60 = vpop.f32.mrb[9].mxu0  ;;  %v981_v61 = vpop.f32.mrb[9].mxu1 }
 0x162   : > { %v1047_v0 = vadd.f32 %v901_v60, %v566_v52  ;;  %v1079_v1 = vadd.f32 %v981_v61, %v598_v53  ;;  %v903_v2 = vpop.f32.mrb[10].mxu0  ;;  %v983_v3 = vpop.f32.mrb[10].mxu1  ;;  %v578_v60 = vld [vmem:[#allocation2 + $0xa8] sm:$0xff] }
 0x163   : > { %1110 = vst [vmem:[#allocation2 + $0x40] sm:$0xff] %v1046_v58  ;;  %1142 = vst [vmem:[#allocation2 + $0x140] sm:$0xff] %v1078_v59  ;;  %v1048_v4 = vadd.f32 %v903_v2, %v567_v56  ;;  %v1080_v5 = vadd.f32 %v983_v3, %v599_v57  ;;  %v905_v6 = vpop.f32.mrb[11].mxu0  ;;  %v985_v7 = vpop.f32.mrb[11].mxu1  ;;  %v577_v58 = vld [vmem:[#allocation2 + $0xa0] sm:$0xff]  ;;  %v610_v61 = vld [vmem:[#allocation2 + $0x1a8] sm:$0xff] }
 0x164   : > { %1111 = vst [vmem:[#allocation2 + $0x48] sm:$0xff] %v1047_v0  ;;  %1143 = vst [vmem:[#allocation2 + $0x148] sm:$0xff] %v1079_v1  ;;  %v1049_v8 = vadd.f32 %v905_v6, %v568_v62  ;;  %v1081_v9 = vadd.f32 %v985_v7, %v600_v63  ;;  %v609_v59 = vld [vmem:[#allocation2 + $0x1a0] sm:$0xff]  ;;  %v579_v0 = vld [vmem:[#allocation2 + $0xb0] sm:$0xff] }
 0x165   : > { %1112 = vst [vmem:[#allocation2 + $0x50] sm:$0xff] %v1048_v4  ;;  %1144 = vst [vmem:[#allocation2 + $0x150] sm:$0xff] %v1080_v5  ;;  %v611_v1 = vld [vmem:[#allocation2 + $0x1b0] sm:$0xff]  ;;  %v580_v6 = vld [vmem:[#allocation2 + $0xb8] sm:$0xff] }
 0x166   : > { %1113 = vst [vmem:[#allocation2 + $0x58] sm:$0xff] %v1049_v8  ;;  %1145 = vst [vmem:[#allocation2 + $0x158] sm:$0xff] %v1081_v9  ;;  %v612_v7 = vld [vmem:[#allocation2 + $0x1b8] sm:$0xff] }
 0x168   : > { %v909_v14 = vpop.f32.mrb[12].mxu0  ;;  %v989_v15 = vpop.f32.mrb[12].mxu1 }
 0x169   : > { %v1050_v18 = vadd.f32 %v909_v14, %v569_v10  ;;  %v1082_v19 = vadd.f32 %v989_v15, %v601_v11  ;;  %v911_v20 = vpop.f32.mrb[13].mxu0  ;;  %v991_v21 = vpop.f32.mrb[13].mxu1 }
 0x16a   : > { %v1051_v24 = vadd.f32 %v911_v20, %v570_v12  ;;  %v1083_v25 = vadd.f32 %v991_v21, %v602_v13  ;;  %v913_v26 = vpop.f32.mrb[14].mxu0  ;;  %v993_v27 = vpop.f32.mrb[14].mxu1  ;;  %v582_v20 = vld [vmem:[#allocation2 + $0xc8] sm:$0xff] }
 0x16b   : > { %1114 = vst [vmem:[#allocation2 + $0x60] sm:$0xff] %v1050_v18  ;;  %1146 = vst [vmem:[#allocation2 + $0x160] sm:$0xff] %v1082_v19  ;;  %v1052_v28 = vadd.f32 %v913_v26, %v571_v16  ;;  %v1084_v29 = vadd.f32 %v993_v27, %v603_v17  ;;  %v915_v30 = vpop.f32.mrb[15].mxu0  ;;  %v995_v31 = vpop.f32.mrb[15].mxu1  ;;  %v581_v18 = vld [vmem:[#allocation2 + $0xc0] sm:$0xff]  ;;  %v614_v21 = vld [vmem:[#allocation2 + $0x1c8] sm:$0xff] }
 0x16c   : > { %1115 = vst [vmem:[#allocation2 + $0x68] sm:$0xff] %v1051_v24  ;;  %1147 = vst [vmem:[#allocation2 + $0x168] sm:$0xff] %v1083_v25  ;;  %v1053_v32 = vadd.f32 %v915_v30, %v572_v22  ;;  %v1085_v33 = vadd.f32 %v995_v31, %v604_v23  ;;  %v613_v19 = vld [vmem:[#allocation2 + $0x1c0] sm:$0xff]  ;;  %v583_v24 = vld [vmem:[#allocation2 + $0xd0] sm:$0xff] }
 0x16d   : > { %1116 = vst [vmem:[#allocation2 + $0x70] sm:$0xff] %v1052_v28  ;;  %1148 = vst [vmem:[#allocation2 + $0x170] sm:$0xff] %v1084_v29  ;;  %v615_v25 = vld [vmem:[#allocation2 + $0x1d0] sm:$0xff]  ;;  %v584_v30 = vld [vmem:[#allocation2 + $0xd8] sm:$0xff] }
 0x16e   : > { %1117 = vst [vmem:[#allocation2 + $0x78] sm:$0xff] %v1053_v32  ;;  %1149 = vst [vmem:[#allocation2 + $0x178] sm:$0xff] %v1085_v33  ;;  %v616_v31 = vld [vmem:[#allocation2 + $0x1d8] sm:$0xff] }
 0x170   : > { %v919_v38 = vpop.f32.mrb[16].mxu0  ;;  %v999_v39 = vpop.f32.mrb[16].mxu1 }
 0x171   : > { %v1054_v42 = vadd.f32 %v919_v38, %v573_v34  ;;  %v1086_v43 = vadd.f32 %v999_v39, %v605_v35  ;;  %v921_v44 = vpop.f32.mrb[17].mxu0  ;;  %v1001_v45 = vpop.f32.mrb[17].mxu1 }
 0x172   : > { %v1055_v48 = vadd.f32 %v921_v44, %v574_v36  ;;  %v1087_v49 = vadd.f32 %v1001_v45, %v606_v37  ;;  %v923_v50 = vpop.f32.mrb[18].mxu0  ;;  %v1003_v51 = vpop.f32.mrb[18].mxu1  ;;  %v586_v44 = vld [vmem:[#allocation2 + $0xe8] sm:$0xff] }
 0x173   : > { %1118 = vst [vmem:[#allocation2 + $0x80] sm:$0xff] %v1054_v42  ;;  %1150 = vst [vmem:[#allocation2 + $0x180] sm:$0xff] %v1086_v43  ;;  %v1056_v52 = vadd.f32 %v923_v50, %v575_v40  ;;  %v1088_v53 = vadd.f32 %v1003_v51, %v607_v41  ;;  %v925_v54 = vpop.f32.mrb[19].mxu0  ;;  %v1005_v55 = vpop.f32.mrb[19].mxu1  ;;  %v585_v42 = vld [vmem:[#allocation2 + $0xe0] sm:$0xff]  ;;  %v618_v45 = vld [vmem:[#allocation2 + $0x1e8] sm:$0xff] }
 0x174   : > { %1119 = vst [vmem:[#allocation2 + $0x88] sm:$0xff] %v1055_v48  ;;  %1151 = vst [vmem:[#allocation2 + $0x188] sm:$0xff] %v1087_v49  ;;  %v1057_v56 = vadd.f32 %v925_v54, %v576_v46  ;;  %v1089_v57 = vadd.f32 %v1005_v55, %v608_v47  ;;  %v617_v43 = vld [vmem:[#allocation2 + $0x1e0] sm:$0xff]  ;;  %v587_v48 = vld [vmem:[#allocation2 + $0xf0] sm:$0xff] }
 0x175   : > { %1120 = vst [vmem:[#allocation2 + $0x90] sm:$0xff] %v1056_v52  ;;  %1152 = vst [vmem:[#allocation2 + $0x190] sm:$0xff] %v1088_v53  ;;  %v619_v49 = vld [vmem:[#allocation2 + $0x1f0] sm:$0xff]  ;;  %v588_v54 = vld [vmem:[#allocation2 + $0xf8] sm:$0xff] }
 0x176   : > { %1121 = vst [vmem:[#allocation2 + $0x98] sm:$0xff] %v1057_v56  ;;  %1153 = vst [vmem:[#allocation2 + $0x198] sm:$0xff] %v1089_v57  ;;  %v620_v55 = vld [vmem:[#allocation2 + $0x1f8] sm:$0xff] }
 0x178   : > { %v929_v62 = vpop.f32.mrb[20].mxu0  ;;  %v1009_v63 = vpop.f32.mrb[20].mxu1 }
 0x179   : > { %v1058_v2 = vadd.f32 %v929_v62, %v577_v58  ;;  %v1090_v3 = vadd.f32 %v1009_v63, %v609_v59  ;;  %v931_v4 = vpop.f32.mrb[21].mxu0  ;;  %v1011_v5 = vpop.f32.mrb[21].mxu1 }
 0x17a   : > { %v1059_v8 = vadd.f32 %v931_v4, %v578_v60  ;;  %v1091_v9 = vadd.f32 %v1011_v5, %v610_v61  ;;  %v933_v10 = vpop.f32.mrb[22].mxu0  ;;  %v1013_v11 = vpop.f32.mrb[22].mxu1  ;;  %v4008_v4 = vld [vmem:[%s4902_s3 + $0x14] ss:$8 sps:$4 sm:$0xff] (!%p3230_p13)   ;;  %v4015_v5 = vld [vmem:[%s4902_s3 + $0x10] ss:$8 sps:$4 sm:$0xff] (!%p3230_p13)  }
 0x17b   : > { %1122 = vst [vmem:[#allocation2 + $0xa0] sm:$0xff] %v1058_v2  ;;  %1154 = vst [vmem:[#allocation2 + $0x1a0] sm:$0xff] %v1090_v3  ;;  %v1060_v12 = vadd.f32 %v933_v10, %v579_v0  ;;  %v1092_v13 = vadd.f32 %v1013_v11, %v611_v1  ;;  %v935_v14 = vpop.f32.mrb[23].mxu0  ;;  %v1015_v15 = vpop.f32.mrb[23].mxu1  ;;  %v3997_v2 = vld [vmem:[%s4902_s3 + $0x4] ss:$8 sps:$4 sm:$0xff] (!%p3230_p13)   ;;  %v1236_v10 = vlaneseq (!%p3230_p13) }
 0x17c   : > { %1123 = vst [vmem:[#allocation2 + $0xa8] sm:$0xff] %v1059_v8  ;;  %1155 = vst [vmem:[#allocation2 + $0x1a8] sm:$0xff] %v1091_v9  ;;  %v1061_v16 = vadd.f32 %v935_v14, %v580_v6  ;;  %v1093_v17 = vadd.f32 %v1015_v15, %v612_v7  ;;  %v4002_v3 = vld [vmem:[%s4902_s3] ss:$8 sps:$4 sm:$0xff] (!%p3230_p13)   ;;  %1610 = vmatprep.subr.bf16.mxu0 (!%p3230_p13), %v3997_v2  ;;  %3411 = vmatprep.subr.bf16.mxu1 (!%p3230_p13), %v3997_v2  ;;  %v4022_v6 = vld [vmem:[%s4902_s3 + $0x24] ss:$8 sps:$4 sm:$0xff] (!%p3230_p13)  }
 0x17d   : > { %1124 = vst [vmem:[#allocation2 + $0xb0] sm:$0xff] %v1060_v12  ;;  %1156 = vst [vmem:[#allocation2 + $0x1b0] sm:$0xff] %v1092_v13  ;;  %1611 = vmatpush1.bf16.msra.mxu0 (!%p3230_p13), %v4002_v3  ;;  %3427 = vmatpush1.bf16.msra.mxu1 (!%p3230_p13), %v4002_v3  ;;  %v4029_v7 = vld [vmem:[%s4902_s3 + $0x20] ss:$8 sps:$4 sm:$0xff] (!%p3230_p13)   ;;  %v4036_v8 = vld [vmem:[%s4902_s3 + $0x34] ss:$8 sps:$4 sm:$0xff] (!%p3230_p13)  }
 0x17e   : > { %1125 = vst [vmem:[#allocation2 + $0xb8] sm:$0xff] %v1061_v16  ;;  %1157 = vst [vmem:[#allocation2 + $0x1b8] sm:$0xff] %v1093_v17  ;;  %1612 = vmatprep.subr.bf16.mxu0 (!%p3230_p13), %v4008_v4  ;;  %3412 = vmatprep.subr.bf16.mxu1 (!%p3230_p13), %v4008_v4  ;;  %v4043_v9 = vld [vmem:[%s4902_s3 + $0x30] ss:$8 sps:$4 sm:$0xff] (!%p3230_p13)   ;;  %v4050_v11 = vld [vmem:[%s4902_s3 + $0x44] ss:$8 sps:$4 sm:$0xff] (!%p3230_p13)  }
 0x17f   : > { %v4057_v12 = vld [vmem:[%s4902_s3 + $0x40] ss:$8 sps:$4 sm:$0xff] (!%p3230_p13)   ;;  %v4059_v13 = vshrl.u32 (!%p3230_p13), %v1236_v10, 7  ;;  %v4066_v14 = vld [vmem:[%s4902_s3 + $0x54] ss:$8 sps:$4 sm:$0xff] (!%p3230_p13)  }
 0x180   : > { %v939_v22 = vpop.f32.mrb[24].mxu0  ;;  %v1019_v23 = vpop.f32.mrb[24].mxu1  ;;  %v4073_v15 = vld [vmem:[%s4902_s3 + $0x50] ss:$8 sps:$4 sm:$0xff] (!%p3230_p13)   ;;  %v4081_v17 = vld [vmem:[%s4902_s3 + $0x64] ss:$8 sps:$4 sm:$0xff] (!%p3230_p13)  }
 0x181   : > { %v1062_v26 = vadd.f32 %v939_v22, %v581_v18  ;;  %v1094_v27 = vadd.f32 %v1019_v23, %v613_v19  ;;  %v941_v28 = vpop.f32.mrb[25].mxu0  ;;  %v1021_v29 = vpop.f32.mrb[25].mxu1  ;;  %1613 = vmatpush1.bf16.msra.mxu0 (!%p3230_p13), %v4015_v5  ;;  %3428 = vmatpush1.bf16.msra.mxu1 (!%p3230_p13), %v4015_v5  ;;  %v1242_v16 = vsub.s32 (!%p3230_p13), 1, %v4059_v13  ;;  %v1171_v18 = vld [vmem:[#allocation2 + $0x8] sm:$0xff] (!%p3230_p13)  ;;  %v1173_v19 = vld [vmem:[#allocation2 + $0x18] sm:$0xff] (!%p3230_p13) }
 0x182   : > { %v1063_v32 = vadd.f32 %v941_v28, %v582_v20  ;;  %v1095_v33 = vadd.f32 %v1021_v29, %v614_v21  ;;  %v943_v34 = vpop.f32.mrb[26].mxu0  ;;  %v1023_v35 = vpop.f32.mrb[26].mxu1  ;;  %1614 = vmatprep.subr.bf16.mxu0 (!%p3230_p13), %v4022_v6  ;;  %3413 = vmatprep.subr.bf16.mxu1 (!%p3230_p13), %v4022_v6  ;;  %v1234_v20 = vld [vmem:[%s4901_s2] sm:$0x3] (!%p3230_p13)  ;;  %v4101_v23 = vld [vmem:[%s4902_s3 + $0x74] ss:$8 sps:$4 sm:$0xff] (!%p3230_p13)  }
 0x183   : > { %1126 = vst [vmem:[#allocation2 + $0xc0] sm:$0xff] %v1062_v26  ;;  %1158 = vst [vmem:[#allocation2 + $0x1c0] sm:$0xff] %v1094_v27  ;;  %v1064_v36 = vadd.f32 %v943_v34, %v583_v24  ;;  %v1096_v37 = vadd.f32 %v1023_v35, %v615_v25  ;;  %v945_v38 = vpop.f32.mrb[27].mxu0  ;;  %v1025_v39 = vpop.f32.mrb[27].mxu1  ;;  %v4091_v21 = vld [vmem:[%s4902_s3 + $0x60] ss:$8 sps:$4 sm:$0xff] (!%p3230_p13)   ;;  %v4095_v22 = vrot.slane (!%p3230_p13), %v1234_v20, %v1242_v16 }
 0x184   : > { %1127 = vst [vmem:[#allocation2 + $0xc8] sm:$0xff] %v1063_v32  ;;  %1159 = vst [vmem:[#allocation2 + $0x1c8] sm:$0xff] %v1095_v33  ;;  %v1065_v40 = vadd.f32 %v945_v38, %v584_v30  ;;  %v1097_v41 = vadd.f32 %v1025_v39, %v616_v31  ;;  %v4111_v26 = vld [vmem:[%s4902_s3 + $0x70] ss:$8 sps:$4 sm:$0xff] (!%p3230_p13)   ;;  %v4117_v29 = vld [vmem:[%s4902_s3 + $0x84] ss:$8 sps:$4 sm:$0xff] (!%p3230_p13)  }
 0x185   : > { %1128 = vst [vmem:[#allocation2 + $0xd0] sm:$0xff] %v1064_v36  ;;  %1160 = vst [vmem:[#allocation2 + $0x1d0] sm:$0xff] %v1096_v37  ;;  %1615 = vmatpush1.bf16.msra.mxu0 (!%p3230_p13), %v4029_v7  ;;  %3429 = vmatpush1.bf16.msra.mxu1 (!%p3230_p13), %v4029_v7  ;;  %v1247_v24 = vadd.f32 (!%p3230_p13), %v4095_v22, %v1171_v18  ;;  %v1249_v25 = vadd.f32 (!%p3230_p13), %v4095_v22, %v1173_v19  ;;  %v4125_v31 = vld [vmem:[%s4902_s3 + $0x80] ss:$8 sps:$4 sm:$0xff] (!%p3230_p13)   ;;  %v4131_v32 = vld [vmem:[%s4902_s3 + $0x94] ss:$8 sps:$4 sm:$0xff] (!%p3230_p13)  }
 0x186   : > { %1129 = vst [vmem:[#allocation2 + $0xd8] sm:$0xff] %v1065_v40  ;;  %1161 = vst [vmem:[#allocation2 + $0x1d8] sm:$0xff] %v1097_v41  ;;  %1616 = vmatprep.subr.bf16.mxu0 (!%p3230_p13), %v4036_v8  ;;  %3414 = vmatprep.subr.bf16.mxu1 (!%p3230_p13), %v4036_v8  ;;  %v4139_v33 = vld [vmem:[%s4902_s3 + $0x90] ss:$8 sps:$4 sm:$0xff] (!%p3230_p13)   ;;  %v4145_v34 = vld [vmem:[%s4902_s3 + $0xa4] ss:$8 sps:$4 sm:$0xff] (!%p3230_p13)  }
 0x187   : > { %v1311_v27 = vmax.f32 (!%p3230_p13), %v1247_v24, 0.0  ;;  %v1313_v28 = vmax.f32 (!%p3230_p13), %v1249_v25, 0.0  ;;  %v4153_v35 = vld [vmem:[%s4902_s3 + $0xa0] ss:$8 sps:$4 sm:$0xff] (!%p3230_p13)   ;;  %v4159_v36 = vld [vmem:[%s4902_s3 + $0xb4] ss:$8 sps:$4 sm:$0xff] (!%p3230_p13)  }
 0x188   : > { %v949_v46 = vpop.f32.mrb[28].mxu0  ;;  %v1029_v47 = vpop.f32.mrb[28].mxu1  ;;  %1169 = sbr.rel (%p3230_p13) target bundleno = 1672 (0x688), region = 97  ;;  %v1203_v37 = vld [vmem:[#allocation2 + $0x108] sm:$0xff] (!%p3230_p13)  ;;  %v1205_v38 = vld [vmem:[#allocation2 + $0x118] sm:$0xff] (!%p3230_p13)  ;;  %v1174_v19 = vld [vmem:[#allocation2 + $0x20] sm:$0xff] (!%p3230_p13) }
 0x189   : > { %v1066_v50 = vadd.f32 %v949_v46, %v585_v42  ;;  %v1098_v51 = vadd.f32 %v1029_v47, %v617_v43  ;;  %v951_v52 = vpop.f32.mrb[29].mxu0  ;;  %v1031_v53 = vpop.f32.mrb[29].mxu1  ;;  %1617 = vmatpush1.bf16.msra.mxu0 (!%p3230_p13), %v4043_v9  ;;  %3430 = vmatpush1.bf16.msra.mxu1 (!%p3230_p13), %v4043_v9  ;;  %v1375_v30 = vpack.c.bf16 (!%p3230_p13), %v1313_v28, %v1311_v27  ;;  %v4167_v39 = vld [vmem:[%s4902_s3 + $0xb0] ss:$8 sps:$4 sm:$0xff] (!%p3230_p13)   ;;  %v4174_v41 = vld [vmem:[%s4902_s3 + $0xc4] ss:$8 sps:$4 sm:$0xff] (!%p3230_p13)  }
 0x18a   : > { %v1067_v56 = vadd.f32 %v951_v52, %v586_v44  ;;  %v1099_v57 = vadd.f32 %v1031_v53, %v618_v45  ;;  %v953_v58 = vpop.f32.mrb[30].mxu0  ;;  %v1033_v59 = vpop.f32.mrb[30].mxu1  ;;  %1618 = vmatprep.subr.bf16.mxu0 (!%p3230_p13), %v4050_v11  ;;  %3415 = vmatprep.subr.bf16.mxu1 (!%p3230_p13), %v4050_v11  ;;  %v1279_v40 = vadd.f32 (!%p3230_p13), %v4095_v22, %v1203_v37  ;;  %v4181_v43 = vld [vmem:[%s4902_s3 + $0xc0] ss:$8 sps:$4 sm:$0xff] (!%p3230_p13)   ;;  %v1238_v44 = vsub.s32 (!%p3230_p13), 0, %v4059_v13 }
 0x18b   : > { %1130 = vst [vmem:[#allocation2 + $0xe0] sm:$0xff] %v1066_v50  ;;  %1162 = vst [vmem:[#allocation2 + $0x1e0] sm:$0xff] %v1098_v51  ;;  %v1068_v60 = vadd.f32 %v953_v58, %v587_v48  ;;  %v1100_v61 = vadd.f32 %v1033_v59, %v619_v49  ;;  %v955_v62 = vpop.f32.mrb[31].mxu0  ;;  %v1035_v63 = vpop.f32.mrb[31].mxu1  ;;  %1642 = vmatprep.mubr.bf16.mxu0 (!%p3230_p13), %v1375_v30  ;;  %v1281_v42 = vadd.f32 (!%p3230_p13), %v4095_v22, %v1205_v38  ;;  %v4189_v47 = vld [vmem:[%s4902_s3 + $0xd4] ss:$8 sps:$4 sm:$0xff] (!%p3230_p13)  }
 0x18c   : > { %1131 = vst [vmem:[#allocation2 + $0xe8] sm:$0xff] %v1067_v56  ;;  %1163 = vst [vmem:[#allocation2 + $0x1e8] sm:$0xff] %v1099_v57  ;;  %v1069_v0 = vadd.f32 %v955_v62, %v588_v54  ;;  %v1101_v1 = vadd.f32 %v1035_v63, %v620_v55  ;;  %v1343_v45 = vmax.f32 (!%p3230_p13), %v1279_v40, 0.0  ;;  %v1170_v48 = vld [vmem:[#allocation2] sm:$0xff] (!%p3230_p13)  ;;  %v1172_v49 = vld [vmem:[#allocation2 + $0x10] sm:$0xff] (!%p3230_p13)  ;;  %v4200_v52 = vrot.slane (!%p3230_p13), %v1234_v20, %v1238_v44 }
 0x18d   : > { %1132 = vst [vmem:[#allocation2 + $0xf0] sm:$0xff] %v1068_v60  ;;  %1164 = vst [vmem:[#allocation2 + $0x1f0] sm:$0xff] %v1100_v61  ;;  %1619 = vmatpush1.bf16.msra.mxu0 (!%p3230_p13), %v4057_v12  ;;  %3431 = vmatpush1.bf16.msra.mxu1 (!%p3230_p13), %v4057_v12  ;;  %v1345_v46 = vmax.f32 (!%p3230_p13), %v1281_v42, 0.0  ;;  %v4196_v51 = vld [vmem:[%s4902_s3 + $0xd0] ss:$8 sps:$4 sm:$0xff] (!%p3230_p13)   ;;  %v1175_v53 = vld [vmem:[#allocation2 + $0x28] sm:$0xff] (!%p3230_p13) }
 0x18e   : > { %1133 = vst [vmem:[#allocation2 + $0xf8] sm:$0xff] %v1069_v0  ;;  %1165 = vst [vmem:[#allocation2 + $0x1f8] sm:$0xff] %v1101_v1  ;;  %1620 = vmatprep.subr.bf16.mxu0 (!%p3230_p13), %v4066_v14  ;;  %3416 = vmatprep.subr.bf16.mxu1 (!%p3230_p13), %v4066_v14  ;;  %v1177_v54 = vld [vmem:[#allocation2 + $0x38] sm:$0xff] (!%p3230_p13)  ;;  %v4206_v55 = vld [vmem:[%s4902_s3 + $0xe4] ss:$8 sps:$4 sm:$0xff] (!%p3230_p13)   ;;  %v1246_v59 = vadd.f32 (!%p3230_p13), %v4200_v52, %v1170_v48  ;;  %v1248_v60 = vadd.f32 (!%p3230_p13), %v4200_v52, %v1172_v49 }
 0x18f   : > { %v1391_v50 = vpack.c.bf16 %v1345_v46, %v1343_v45  ;;  %v1202_v56 = vld [vmem:[#allocation2 + $0x100] sm:$0xff]  ;;  %v1204_v57 = vld [vmem:[#allocation2 + $0x110] sm:$0xff]  ;;  %v1207_v58 = vld [vmem:[#allocation2 + $0x128] sm:$0xff]  ;;  %v1251_v63 = vadd.f32 %v4095_v22, %v1175_v53  ;;  %v1253_v0 = vadd.f32 %v4095_v22, %v1177_v54  ;;  %v1250_v54 = vadd.f32 %v4200_v52, %v1174_v19 }
 0x190   : > { %v1209_v61 = vld [vmem:[#allocation2 + $0x138] sm:$0xff]  ;;  %v4217_v62 = vld [vmem:[%s4902_s3 + $0xe0] ss:$8 sps:$4 sm:$0xff]   ;;  %v1278_v10 = vadd.f32 %v4200_v52, %v1202_v56  ;;  %v1280_v18 = vadd.f32 %v4200_v52, %v1204_v57  ;;  %v1176_v20 = vld [vmem:[#allocation2 + $0x30] sm:$0xff]  ;;  %v1283_v24 = vadd.f32 %v4095_v22, %v1207_v58  ;;  %v1310_v28 = vmax.f32 %v1246_v59, 0.0 }
 0x191   : > { %1621 = vmatpush1.bf16.msra.mxu0 %v4073_v15  ;;  %3432 = vmatpush1.bf16.msra.mxu1 %v4073_v15  ;;  %v4225_v1 = vld [vmem:[%s4902_s3 + $0xf4] ss:$8 sps:$4 sm:$0xff]   ;;  %v1285_v25 = vadd.f32 %v4095_v22, %v1209_v61  ;;  %v4236_v27 = vld [vmem:[%s4902_s3 + $0xf0] ss:$8 sps:$4 sm:$0xff]   ;;  %v1312_v30 = vmax.f32 %v1248_v60, 0.0  ;;  %v1179_v37 = vld [vmem:[#allocation2 + $0x48] sm:$0xff]  ;;  %v1252_v56 = vadd.f32 %v4200_v52, %v1176_v20 }
 0x192   : > { %1622 = vmatprep.subr.bf16.mxu0 %v4081_v17  ;;  %3417 = vmatprep.subr.bf16.mxu1 %v4081_v17  ;;  %v1181_v38 = vld [vmem:[#allocation2 + $0x58] sm:$0xff]  ;;  %v1315_v40 = vmax.f32 %v1251_v63, 0.0  ;;  %v1317_v42 = vmax.f32 %v1253_v0, 0.0  ;;  %v1342_v45 = vmax.f32 %v1278_v10, 0.0  ;;  %v1344_v46 = vmax.f32 %v1280_v18, 0.0  ;;  %v1208_v53 = vld [vmem:[#allocation2 + $0x130] sm:$0xff] }
 0x193   : > { %1722 = vmatprep.mubr.bf16.mxu1 %v1391_v50  ;;  %v1347_v48 = vmax.f32 %v1283_v24, 0.0  ;;  %v1349_v49 = vmax.f32 %v1285_v25, 0.0  ;;  %v1206_v50 = vld [vmem:[#allocation2 + $0x120] sm:$0xff]  ;;  %v1211_v57 = vld [vmem:[#allocation2 + $0x148] sm:$0xff]  ;;  %v1213_v58 = vld [vmem:[#allocation2 + $0x158] sm:$0xff]  ;;  %v1374_v59 = vpack.c.bf16 %v1312_v30, %v1310_v28  ;;  %v1255_v60 = vadd.f32 %v4095_v22, %v1179_v37 }
 0x194   : > { %v1257_v61 = vadd.f32 %v4095_v22, %v1181_v38  ;;  %v1377_v63 = vpack.c.bf16 %v1317_v42, %v1315_v40  ;;  %v1390_v0 = vpack.c.bf16 %v1344_v46, %v1342_v45  ;;  %v1282_v10 = vadd.f32 %v4200_v52, %v1206_v50  ;;  %v1178_v30 = vld [vmem:[#allocation2 + $0x40] sm:$0xff]  ;;  %v1180_v37 = vld [vmem:[#allocation2 + $0x50] sm:$0xff]  ;;  %v1183_v42 = vld [vmem:[#allocation2 + $0x68] sm:$0xff] }
 0x195   : > { %1623 = vmatpush1.bf16.msra.mxu0 %v4091_v21  ;;  %3433 = vmatpush1.bf16.msra.mxu1 %v4091_v21  ;;  %v1284_v18 = vadd.f32 %v4200_v52, %v1208_v53  ;;  %v1393_v19 = vpack.c.bf16 %v1349_v49, %v1347_v48  ;;  %v1287_v20 = vadd.f32 %v4095_v22, %v1211_v57  ;;  %v1314_v25 = vmax.f32 %v1250_v54, 0.0  ;;  %v1185_v45 = vld [vmem:[#allocation2 + $0x78] sm:$0xff]  ;;  %v1210_v53 = vld [vmem:[#allocation2 + $0x140] sm:$0xff]  ;;  %v1212_v57 = vld [vmem:[#allocation2 + $0x150] sm:$0xff] }
 0x196   : > { %1624 = vmatprep.subr.bf16.mxu0 %v4101_v23  ;;  %3418 = vmatprep.subr.bf16.mxu1 %v4101_v23  ;;  %v1289_v24 = vadd.f32 %v4095_v22, %v1213_v58  ;;  %v1316_v28 = vmax.f32 %v1252_v56, 0.0  ;;  %v1319_v38 = vmax.f32 %v1255_v60, 0.0  ;;  %v1321_v40 = vmax.f32 %v1257_v61, 0.0  ;;  %v1215_v56 = vld [vmem:[#allocation2 + $0x168] sm:$0xff]  ;;  %v1217_v58 = vld [vmem:[#allocation2 + $0x178] sm:$0xff] }
 0x197   : > { %v1346_v46 = vmax.f32 %v1282_v10, 0.0  ;;  %v1348_v48 = vmax.f32 %v1284_v18, 0.0  ;;  %v1351_v49 = vmax.f32 %v1287_v20, 0.0  ;;  %v1256_v60 = vadd.f32 %v4200_v52, %v1180_v37 }
 0x198   : > { %v1353_v50 = vmax.f32 %v1289_v24, 0.0  ;;  %v1376_v54 = vpack.c.bf16 %v1316_v28, %v1314_v25  ;;  %v1259_v61 = vadd.f32 %v4095_v22, %v1183_v42  ;;  %v1286_v18 = vadd.f32 %v4200_v52, %v1210_v53  ;;  %v1182_v28 = vld [vmem:[#allocation2 + $0x60] sm:$0xff]  ;;  %v1189_v42 = vld [vmem:[#allocation2 + $0x98] sm:$0xff] }
 0x199   : > { %1625 = vmatpush1.bf16.msra.mxu0 %v4111_v26  ;;  %3434 = vmatpush1.bf16.msra.mxu1 %v4111_v26  ;;  %v1392_v10 = vpack.c.bf16 %v1348_v48, %v1346_v46  ;;  %v1291_v24 = vadd.f32 %v4095_v22, %v1215_v56  ;;  %v1258_v53 = vadd.f32 %v4200_v52, %v1182_v28  ;;  %v1193_v28 = vld [vmem:[#allocation2 + $0xb8] sm:$0xff] }
 0x19a   : > { %1626 = vmatprep.subr.bf16.mxu0 %v4117_v29  ;;  %3419 = vmatprep.subr.bf16.mxu1 %v4117_v29  ;;  %v1395_v20 = vpack.c.bf16 %v1353_v50, %v1351_v49  ;;  %v1323_v37 = vmax.f32 %v1259_v61, 0.0  ;;  %v1214_v50 = vld [vmem:[#allocation2 + $0x160] sm:$0xff] }
 0x19b   : > { %v1355_v48 = vmax.f32 %v1291_v24, 0.0  ;;  %v1188_v24 = vld [vmem:[#allocation2 + $0x90] sm:$0xff] }
 0x19d   : > { %1627 = vmatpush1.bf16.msra.mxu0 %v4125_v31  ;;  %3435 = vmatpush1.bf16.msra.mxu1 %v4125_v31 }
 0x19e   : > { %1628 = vmatprep.subr.bf16.mxu0 %v4131_v32  ;;  %3420 = vmatprep.subr.bf16.mxu1 %v4131_v32 }
 0x1a1   : > { %1629 = vmatpush1.bf16.msra.mxu0 %v4139_v33  ;;  %3436 = vmatpush1.bf16.msra.mxu1 %v4139_v33 }
 0x1a2   : > { %1630 = vmatprep.subr.bf16.mxu0 %v4145_v34  ;;  %3421 = vmatprep.subr.bf16.mxu1 %v4145_v34 }
 0x1a5   : > { %1631 = vmatpush1.bf16.msra.mxu0 %v4153_v35  ;;  %3437 = vmatpush1.bf16.msra.mxu1 %v4153_v35 }
 0x1a6   : > { %1632 = vmatprep.subr.bf16.mxu0 %v4159_v36  ;;  %3422 = vmatprep.subr.bf16.mxu1 %v4159_v36 }
 0x1a9   : > { %1633 = vmatpush1.bf16.msra.mxu0 %v4167_v39  ;;  %3438 = vmatpush1.bf16.msra.mxu1 %v4167_v39 }
 0x1aa   : > { %1634 = vmatprep.subr.bf16.mxu0 %v4174_v41  ;;  %3423 = vmatprep.subr.bf16.mxu1 %v4174_v41 }
 0x1ad   : > { %1635 = vmatpush1.bf16.msra.mxu0 %v4181_v43  ;;  %3439 = vmatpush1.bf16.msra.mxu1 %v4181_v43 }
 0x1ae   : > { %1636 = vmatprep.subr.bf16.mxu0 %v4189_v47  ;;  %3424 = vmatprep.subr.bf16.mxu1 %v4189_v47 }
 0x1b1   : > { %1637 = vmatpush1.bf16.msra.mxu0 %v4196_v51  ;;  %3440 = vmatpush1.bf16.msra.mxu1 %v4196_v51 }
 0x1b2   : > { %1638 = vmatprep.subr.bf16.mxu0 %v4206_v55  ;;  %3425 = vmatprep.subr.bf16.mxu1 %v4206_v55 }
 0x1b5   : > { %1639 = vmatpush1.bf16.msra.mxu0 %v4217_v62  ;;  %3441 = vmatpush1.bf16.msra.mxu1 %v4217_v62 }
 0x1b6   : > { %1640 = vmatprep.subr.bf16.mxu0 %v4225_v1  ;;  %3426 = vmatprep.subr.bf16.mxu1 %v4225_v1 }
 0x1b9   : > { %1641 = vmatpush1.bf16.msra.mxu0 %v4236_v27  ;;  %3442 = vmatpush1.bf16.msra.mxu1 %v4236_v27 }
 0x1ba   : > { %2188 = vmatprep.subr.bf16.mxu0 %v3997_v2  ;;  %1899 = vmatprep.subr.bf16.mxu1 %v3997_v2 }
 0x1bc   : > { %1643 = vmatmul.mubr.bf16.vlgmr.msra.gmra.mrb[0].mxu0 %v1374_v59  ;;  %1723 = vmatmul.mubr.bf16.vlgmr.msra.gmra.mrb[0].mxu1 %v1390_v0  ;;  %v1254_v59 = vadd.f32 %v4200_v52, %v1178_v30  ;;  %v1379_v0 = vpack.c.bf16 %v1321_v40, %v1319_v38  ;;  %v1184_v30 = vld [vmem:[#allocation2 + $0x70] sm:$0xff]  ;;  %v1187_v40 = vld [vmem:[#allocation2 + $0x88] sm:$0xff] }
 0x1bd   : > { %1652 = vmatprep.mubr.bf16.mxu0 %v1377_v63  ;;  %1732 = vmatprep.mubr.bf16.mxu1 %v1393_v19  ;;  %v1261_v63 = vadd.f32 %v4095_v22, %v1185_v45  ;;  %v1288_v19 = vadd.f32 %v4200_v52, %v1212_v57  ;;  %v1350_v45 = vmax.f32 %v1286_v18, 0.0  ;;  %v1219_v57 = vld [vmem:[#allocation2 + $0x188] sm:$0xff]  ;;  %v1260_v56 = vadd.f32 %v4200_v52, %v1184_v30 }
 0x1be   : > { %1900 = vmatpush1.bf16.msra.mxu1 %v4002_v3  ;;  %2189 = vmatpush1.bf16.msra.mxu0 %v4002_v3  ;;  %v1293_v3 = vadd.f32 %v4095_v22, %v1217_v58  ;;  %v1318_v25 = vmax.f32 %v1254_v59, 0.0  ;;  %v1263_v58 = vadd.f32 %v4095_v22, %v1187_v40  ;;  %v1265_v59 = vadd.f32 %v4095_v22, %v1189_v42  ;;  %v1218_v42 = vld [vmem:[#allocation2 + $0x180] sm:$0xff] }
 0x1bf   : > { %1901 = vmatprep.subr.bf16.mxu1 %v4008_v4  ;;  %2190 = vmatprep.subr.bf16.mxu0 %v4008_v4  ;;  %v1320_v4 = vmax.f32 %v1256_v60, 0.0  ;;  %v1325_v38 = vmax.f32 %v1261_v63, 0.0  ;;  %v1352_v46 = vmax.f32 %v1288_v19, 0.0  ;;  %v1290_v63 = vadd.f32 %v4200_v52, %v1214_v50 }
 0x1c0   : > { %v1357_v49 = vmax.f32 %v1293_v3, 0.0  ;;  %v1295_v18 = vadd.f32 %v4095_v22, %v1219_v57  ;;  %v1322_v19 = vmax.f32 %v1258_v53, 0.0  ;;  %v1327_v3 = vmax.f32 %v1263_v58, 0.0 }
 0x1c1   : > { %v1381_v60 = vpack.c.bf16 %v1325_v38, %v1323_v37  ;;  %v1394_v61 = vpack.c.bf16 %v1352_v46, %v1350_v45  ;;  %v1354_v30 = vmax.f32 %v1290_v63, 0.0  ;;  %v1223_v46 = vld [vmem:[#allocation2 + $0x1a8] sm:$0xff] }
 0x1c2   : > { %1902 = vmatpush1.bf16.msra.mxu1 %v4015_v5  ;;  %2191 = vmatpush1.bf16.msra.mxu0 %v4015_v5  ;;  %v1216_v5 = vld [vmem:[#allocation2 + $0x170] sm:$0xff]  ;;  %v1359_v38 = vmax.f32 %v1295_v18, 0.0  ;;  %v1299_v58 = vadd.f32 %v4095_v22, %v1223_v46  ;;  %v1197_v18 = vld [vmem:[#allocation2 + $0xd8] sm:$0xff] }
 0x1c3   : > { %1903 = vmatprep.subr.bf16.mxu1 %v4022_v6  ;;  %2192 = vmatprep.subr.bf16.mxu0 %v4022_v6  ;;  %v1378_v6 = vpack.c.bf16 %v1320_v4, %v1318_v25  ;;  %v1329_v25 = vmax.f32 %v1265_v59, 0.0  ;;  %v1191_v4 = vld [vmem:[#allocation2 + $0xa8] sm:$0xff] }
 0x1c4   : > { %1653 = vmatmul.mubr.bf16.gmra.mrb[4].mxu0 %v1376_v54  ;;  %1733 = vmatmul.mubr.bf16.gmra.mrb[4].mxu1 %v1392_v10  ;;  %v1221_v54 = vld [vmem:[#allocation2 + $0x198] sm:$0xff]  ;;  %v1397_v10 = vpack.c.bf16 %v1357_v49, %v1355_v48  ;;  %v1264_v49 = vadd.f32 %v4200_v52, %v1188_v24  ;;  %v1267_v50 = vadd.f32 %v4095_v22, %v1191_v4  ;;  %v1222_v24 = vld [vmem:[#allocation2 + $0x1a0] sm:$0xff] }
 0x1c5   : > { %1662 = vmatprep.mubr.bf16.mxu0 %v1379_v0  ;;  %1742 = vmatprep.mubr.bf16.mxu1 %v1395_v20  ;;  %v1292_v0 = vadd.f32 %v4200_v52, %v1216_v5  ;;  %v1186_v20 = vld [vmem:[#allocation2 + $0x80] sm:$0xff]  ;;  %v1225_v48 = vld [vmem:[#allocation2 + $0x1b8] sm:$0xff]  ;;  %v1269_v5 = vadd.f32 %v4095_v22, %v1193_v28  ;;  %v1383_v53 = vpack.c.bf16 %v1329_v25, %v1327_v3  ;;  %v1227_v25 = vld [vmem:[#allocation2 + $0x1c8] sm:$0xff] }
 0x1c6   : > { %1904 = vmatpush1.bf16.msra.mxu1 %v4029_v7  ;;  %2193 = vmatpush1.bf16.msra.mxu0 %v4029_v7  ;;  %v1297_v7 = vadd.f32 %v4095_v22, %v1221_v54  ;;  %v1262_v45 = vadd.f32 %v4200_v52, %v1186_v20  ;;  %v1294_v54 = vadd.f32 %v4200_v52, %v1218_v42  ;;  %v1331_v63 = vmax.f32 %v1267_v50, 0.0  ;;  %v1229_v4 = vld [vmem:[#allocation2 + $0x1d8] sm:$0xff] }
 0x1c7   : > { %1905 = vmatprep.subr.bf16.mxu1 %v4036_v8  ;;  %2194 = vmatprep.subr.bf16.mxu0 %v4036_v8  ;;  %v1324_v8 = vmax.f32 %v1260_v56, 0.0  ;;  %v1356_v37 = vmax.f32 %v1292_v0, 0.0  ;;  %v1333_v0 = vmax.f32 %v1269_v5, 0.0  ;;  %v1298_v42 = vadd.f32 %v4200_v52, %v1222_v24 }
 0x1c8   : > { %v1361_v40 = vmax.f32 %v1297_v7, 0.0  ;;  %v1326_v59 = vmax.f32 %v1262_v45, 0.0  ;;  %v1358_v7 = vmax.f32 %v1294_v54, 0.0  ;;  %v1303_v46 = vadd.f32 %v4095_v22, %v1227_v25  ;;  %v1198_v25 = vld [vmem:[#allocation2 + $0xe0] sm:$0xff] }
 0x1c9   : > { %v1396_v57 = vpack.c.bf16 %v1356_v37, %v1354_v30  ;;  %v1273_v37 = vadd.f32 %v4095_v22, %v1197_v18  ;;  %v1362_v54 = vmax.f32 %v1298_v42, 0.0 }
 0x1ca   : > { %1906 = vmatpush1.bf16.msra.mxu1 %v4043_v9  ;;  %2195 = vmatpush1.bf16.msra.mxu0 %v4043_v9  ;;  %v1220_v9 = vld [vmem:[#allocation2 + $0x190] sm:$0xff]  ;;  %v1399_v56 = vpack.c.bf16 %v1361_v40, %v1359_v38  ;;  %v1385_v38 = vpack.c.bf16 %v1333_v0, %v1331_v63 }
 0x1cb   : > { %1907 = vmatprep.subr.bf16.mxu1 %v4050_v11  ;;  %2196 = vmatprep.subr.bf16.mxu0 %v4050_v11  ;;  %v1380_v11 = vpack.c.bf16 %v1324_v8, %v1322_v19  ;;  %v1363_v8 = vmax.f32 %v1299_v58, 0.0  ;;  %v1337_v5 = vmax.f32 %v1273_v37, 0.0  ;;  %v1230_v37 = vld [vmem:[#allocation2 + $0x1e0] sm:$0xff] }
 0x1cc   : > { %1663 = vmatmul.mubr.bf16.gmra.mrb[8].mxu0 %v1378_v6  ;;  %1743 = vmatmul.mubr.bf16.gmra.mrb[8].mxu1 %v1394_v61  ;;  %v1296_v6 = vadd.f32 %v4200_v52, %v1220_v9  ;;  %v1192_v61 = vld [vmem:[#allocation2 + $0xb0] sm:$0xff] }
 0x1cd   : > { %1672 = vmatprep.mubr.bf16.mxu0 %v1381_v60  ;;  %1752 = vmatprep.mubr.bf16.mxu1 %v1397_v10  ;;  %v1190_v60 = vld [vmem:[#allocation2 + $0xa0] sm:$0xff]  ;;  %v1195_v10 = vld [vmem:[#allocation2 + $0xc8] sm:$0xff]  ;;  %v1268_v28 = vadd.f32 %v4200_v52, %v1192_v61 }
 0x1ce   : > { %1908 = vmatpush1.bf16.msra.mxu1 %v4057_v12  ;;  %2197 = vmatpush1.bf16.msra.mxu0 %v4057_v12  ;;  %v1301_v12 = vadd.f32 %v4095_v22, %v1225_v48  ;;  %v1360_v19 = vmax.f32 %v1296_v6, 0.0  ;;  %v1266_v3 = vadd.f32 %v4200_v52, %v1190_v60  ;;  %v1271_v30 = vadd.f32 %v4095_v22, %v1195_v10  ;;  %v1233_v60 = vld [vmem:[#allocation2 + $0x1f8] sm:$0xff] }
 0x1cf   : > { %1909 = vmatprep.subr.bf16.mxu1 %v4066_v14  ;;  %2198 = vmatprep.subr.bf16.mxu0 %v4066_v14  ;;  %v1328_v14 = vmax.f32 %v1264_v49, 0.0  ;;  %v1196_v49 = vld [vmem:[#allocation2 + $0xd0] sm:$0xff] }
 0x1d0   : > { %v1365_v20 = vmax.f32 %v1301_v12, 0.0  ;;  %v1398_v40 = vpack.c.bf16 %v1360_v19, %v1358_v7  ;;  %v1330_v48 = vmax.f32 %v1266_v3, 0.0  ;;  %v1335_v50 = vmax.f32 %v1271_v30, 0.0  ;;  %v1226_v12 = vld [vmem:[#allocation2 + $0x1c0] sm:$0xff] }
 0x1d1   : > { %v1272_v61 = vadd.f32 %v4200_v52, %v1196_v49  ;;  %v1302_v7 = vadd.f32 %v4200_v52, %v1226_v12 }
 0x1d2   : > { %1910 = vmatpush1.bf16.msra.mxu1 %v4073_v15  ;;  %2199 = vmatpush1.bf16.msra.mxu0 %v4073_v15  ;;  %v1224_v15 = vld [vmem:[#allocation2 + $0x1b0] sm:$0xff]  ;;  %v1401_v45 = vpack.c.bf16 %v1365_v20, %v1363_v8  ;;  %v1387_v10 = vpack.c.bf16 %v1337_v5, %v1335_v50 }
 0x1d3   : > { %1911 = vmatprep.subr.bf16.mxu1 %v4081_v17  ;;  %2200 = vmatprep.subr.bf16.mxu0 %v4081_v17  ;;  %v1382_v17 = vpack.c.bf16 %v1328_v14, %v1326_v59  ;;  %v1300_v9 = vadd.f32 %v4200_v52, %v1224_v15  ;;  %v1231_v14 = vld [vmem:[#allocation2 + $0x1e8] sm:$0xff] }
 0x1d4   : > { %1673 = vmatmul.mubr.bf16.gmra.mrb[12].mxu0 %v1380_v11  ;;  %1753 = vmatmul.mubr.bf16.gmra.mrb[12].mxu1 %v1396_v57  ;;  %v1194_v11 = vld [vmem:[#allocation2 + $0xc0] sm:$0xff]  ;;  %v1201_v57 = vld [vmem:[#allocation2 + $0xf8] sm:$0xff]  ;;  %v1307_v20 = vadd.f32 %v4095_v22, %v1231_v14 }
 0x1d5   : > { %1682 = vmatprep.mubr.bf16.mxu0 %v1383_v53  ;;  %1762 = vmatprep.mubr.bf16.mxu1 %v1399_v56  ;;  %v1199_v53 = vld [vmem:[#allocation2 + $0xe8] sm:$0xff]  ;;  %v1364_v6 = vmax.f32 %v1300_v9, 0.0  ;;  %v1367_v56 = vmax.f32 %v1303_v46, 0.0  ;;  %v1270_v59 = vadd.f32 %v4200_v52, %v1194_v11  ;;  %v1277_v0 = vadd.f32 %v4095_v22, %v1201_v57 }
 0x1d6   : > { %1912 = vmatpush1.bf16.msra.mxu1 %v4091_v21  ;;  %2201 = vmatpush1.bf16.msra.mxu0 %v4091_v21  ;;  %v1305_v21 = vadd.f32 %v4095_v22, %v1229_v4  ;;  %v1275_v63 = vadd.f32 %v4095_v22, %v1199_v53  ;;  %v1200_v4 = vld [vmem:[#allocation2 + $0xf0] sm:$0xff] }
 0x1d7   : > { %1913 = vmatprep.subr.bf16.mxu1 %v4101_v23  ;;  %2202 = vmatprep.subr.bf16.mxu0 %v4101_v23  ;;  %v1332_v23 = vmax.f32 %v1268_v28, 0.0  ;;  %v1400_v18 = vpack.c.bf16 %v1364_v6, %v1362_v54  ;;  %v1334_v24 = vmax.f32 %v1270_v59, 0.0  ;;  %v1341_v3 = vmax.f32 %v1277_v0, 0.0 }
 0x1d8   : > { %v1369_v58 = vmax.f32 %v1305_v21, 0.0  ;;  %v1339_v15 = vmax.f32 %v1275_v63, 0.0 }
 0x1da   : > { %1914 = vmatpush1.bf16.msra.mxu1 %v4111_v26  ;;  %2203 = vmatpush1.bf16.msra.mxu0 %v4111_v26  ;;  %v1228_v26 = vld [vmem:[#allocation2 + $0x1d0] sm:$0xff]  ;;  %v1403_v8 = vpack.c.bf16 %v1369_v58, %v1367_v56  ;;  %v1389_v42 = vpack.c.bf16 %v1341_v3, %v1339_v15 }
 0x1db   : > { %1915 = vmatprep.subr.bf16.mxu1 %v4117_v29  ;;  %2204 = vmatprep.subr.bf16.mxu0 %v4117_v29  ;;  %v1384_v29 = vpack.c.bf16 %v1332_v23, %v1330_v48  ;;  %v1304_v19 = vadd.f32 %v4200_v52, %v1228_v26 }
 0x1dc   : > { %1683 = vmatmul.mubr.bf16.gmra.mrb[16].mxu0 %v1382_v17  ;;  %1763 = vmatmul.mubr.bf16.gmra.mrb[16].mxu1 %v1398_v40  ;;  %v1366_v17 = vmax.f32 %v1302_v7, 0.0  ;;  %v1276_v40 = vadd.f32 %v4200_v52, %v1200_v4 }
 0x1dd   : > { %1692 = vmatprep.mubr.bf16.mxu0 %v1385_v38  ;;  %1772 = vmatprep.mubr.bf16.mxu1 %v1401_v45  ;;  %v1368_v28 = vmax.f32 %v1304_v19, 0.0  ;;  %v1232_v38 = vld [vmem:[#allocation2 + $0x1f0] sm:$0xff]  ;;  %v1306_v45 = vadd.f32 %v4200_v52, %v1230_v37 }
 0x1de   : > { %1916 = vmatpush1.bf16.msra.mxu1 %v4125_v31  ;;  %2205 = vmatpush1.bf16.msra.mxu0 %v4125_v31  ;;  %v1309_v31 = vadd.f32 %v4095_v22, %v1233_v60  ;;  %v1371_v22 = vmax.f32 %v1307_v20, 0.0  ;;  %v1308_v46 = vadd.f32 %v4200_v52, %v1232_v38  ;;  %v1340_v48 = vmax.f32 %v1276_v40, 0.0  ;;  %v3607_v40 = vld [vmem:[%s4902_s3 + $0x14] ss:$8 sps:$4 sm:$0xff]  }
 0x1df   : > { %1917 = vmatprep.subr.bf16.mxu1 %v4131_v32  ;;  %2206 = vmatprep.subr.bf16.mxu0 %v4131_v32  ;;  %v1336_v32 = vmax.f32 %v1272_v61, 0.0  ;;  %v1402_v9 = vpack.c.bf16 %v1368_v28, %v1366_v17 }
 0x1e0   : > { %v1373_v30 = vmax.f32 %v1309_v31, 0.0  ;;  %v1372_v23 = vmax.f32 %v1308_v46, 0.0 }
 0x1e2   : > { %1918 = vmatpush1.bf16.msra.mxu1 %v4139_v33  ;;  %2207 = vmatpush1.bf16.msra.mxu0 %v4139_v33  ;;  %v1386_v33 = vpack.c.bf16 %v1336_v32, %v1334_v24  ;;  %v1405_v21 = vpack.c.bf16 %v1373_v30, %v1371_v22  ;;  %v3606_v30 = vld [vmem:[%s4902_s3] ss:$8 sps:$4 sm:$0xff]  }
 0x1e3   : > { %1919 = vmatprep.subr.bf16.mxu1 %v4145_v34  ;;  %2208 = vmatprep.subr.bf16.mxu0 %v4145_v34  ;;  %v1274_v34 = vadd.f32 %v4200_v52, %v1198_v25 }
 0x1e4   : > { %1693 = vmatmul.mubr.bf16.gmra.mrb[20].mxu0 %v1384_v29  ;;  %1773 = vmatmul.mubr.bf16.gmra.mrb[20].mxu1 %v1400_v18 }
 0x1e5   : > { %1702 = vmatprep.mubr.bf16.mxu0 %v1387_v10  ;;  %1782 = vmatprep.mubr.bf16.mxu1 %v1403_v8 }
 0x1e6   : > { %1920 = vmatpush1.bf16.msra.mxu1 %v4153_v35  ;;  %2209 = vmatpush1.bf16.msra.mxu0 %v4153_v35  ;;  %v1338_v35 = vmax.f32 %v1274_v34, 0.0 }
 0x1e7   : > { %1921 = vmatprep.subr.bf16.mxu1 %v4159_v36  ;;  %2210 = vmatprep.subr.bf16.mxu0 %v4159_v36  ;;  %v1370_v36 = vmax.f32 %v1306_v45, 0.0 }
 0x1e8   : > { %v1388_v52 = vpack.c.bf16 %v1340_v48, %v1338_v35 }
 0x1ea   : > { %1922 = vmatpush1.bf16.msra.mxu1 %v4167_v39  ;;  %2211 = vmatpush1.bf16.msra.mxu0 %v4167_v39  ;;  %v1404_v39 = vpack.c.bf16 %v1372_v23, %v1370_v36  ;;  %v3608_v23 = vld [vmem:[%s4902_s3 + $0x10] ss:$8 sps:$4 sm:$0xff]  }
 0x1eb   : > { %1923 = vmatprep.subr.bf16.mxu1 %v4174_v41  ;;  %2212 = vmatprep.subr.bf16.mxu0 %v4174_v41  ;;  %v1438_v41 = vld [vmem:[%s4903_s4] sm:$0x3] }
 0x1ec   : > { %1703 = vmatmul.mubr.bf16.gmra.mrb[24].mxu0 %v1386_v33  ;;  %1783 = vmatmul.mubr.bf16.gmra.mrb[24].mxu1 %v1402_v9 }
 0x1ed   : > { %1712 = vmatprep.mubr.bf16.mxu0 %v1389_v42  ;;  %1792 = vmatprep.mubr.bf16.mxu1 %v1405_v21 }
 0x1ee   : > { %1924 = vmatpush1.bf16.msra.mxu1 %v4181_v43  ;;  %2213 = vmatpush1.bf16.msra.mxu0 %v4181_v43  ;;  %v4367_v43 = vrot.slane %v1438_v41, %v1238_v44 }
 0x1ef   : > { %1925 = vmatprep.subr.bf16.mxu1 %v4189_v47  ;;  %2214 = vmatprep.subr.bf16.mxu0 %v4189_v47  ;;  %v4371_v47 = vrot.slane %v1438_v41, %v1242_v16 }
 0x1f2   : > { %1926 = vmatpush1.bf16.msra.mxu1 %v4196_v51  ;;  %2215 = vmatpush1.bf16.msra.mxu0 %v4196_v51 }
 0x1f3   : > { %1927 = vmatprep.subr.bf16.mxu1 %v4206_v55  ;;  %2216 = vmatprep.subr.bf16.mxu0 %v4206_v55 }
 0x1f4   : > { %1713 = vmatmul.mubr.bf16.gmra.mrb[28].mxu0 %v1388_v52  ;;  %1793 = vmatmul.mubr.bf16.gmra.mrb[28].mxu1 %v1404_v39 }
 0x1f6   : > { %1928 = vmatpush1.bf16.msra.mxu1 %v4217_v62  ;;  %2217 = vmatpush1.bf16.msra.mxu0 %v4217_v62 }
 0x1f7   : > { %1929 = vmatprep.subr.bf16.mxu1 %v4225_v1  ;;  %2218 = vmatprep.subr.bf16.mxu0 %v4225_v1 }
 0x1fa   : > { %1930 = vmatpush1.bf16.msra.mxu1 %v4236_v27  ;;  %2219 = vmatpush1.bf16.msra.mxu0 %v4236_v27 }
 0x1fb   : > { %2477 = vmatprep.subr.bf16.mxu1 %v3997_v2 }
 0x28f   : > { %v1644_v51 = vpop.f32.mrb[0].mxu0  ;;  %v1724_v1 = vpop.f32.mrb[0].mxu1 }
 0x290   : > { %v1645_v55 = vadd.f32 %v1644_v51, %v4367_v43  ;;  %v1646_v62 = vpop.f32.mrb[1].mxu0  ;;  %v1725_v11 = vadd.f32 %v1724_v1, %v4367_v43  ;;  %v1726_v49 = vpop.f32.mrb[1].mxu1 }
 0x291   : > { %v1647_v27 = vadd.f32 %v1646_v62, %v4371_v47  ;;  %v1648_v2 = vpop.f32.mrb[2].mxu0  ;;  %v1727_v44 = vadd.f32 %v1726_v49, %v4371_v47  ;;  %v1728_v53 = vpop.f32.mrb[2].mxu1 }
 0x292   : > { %v1649_v50 = vadd.f32 %v1648_v2, %v4367_v43  ;;  %v1650_v5 = vpop.f32.mrb[3].mxu0  ;;  %v1835_v16 = vmax.f32 %v1725_v11, 0.0  ;;  %v1729_v57 = vadd.f32 %v1728_v53, %v4367_v43  ;;  %v1730_v54 = vpop.f32.mrb[3].mxu1  ;;  %v1803_v6 = vmax.f32 %v1645_v55, 0.0  ;;  %v3609_v55 = vld [vmem:[%s4902_s3 + $0x24] ss:$8 sps:$4 sm:$0xff]  }
 0x293   : > { %v1651_v13 = vadd.f32 %v1650_v5, %v4371_v47  ;;  %v1836_v58 = vmax.f32 %v1727_v44, 0.0  ;;  %v1731_v12 = vadd.f32 %v1730_v54, %v4371_v47  ;;  %v1804_v26 = vmax.f32 %v1647_v27, 0.0 }
 0x294   : > { %v1805_v56 = vmax.f32 %v1649_v50, 0.0  ;;  %v1837_v14 = vmax.f32 %v1729_v57, 0.0  ;;  %v3610_v57 = vld [vmem:[%s4902_s3 + $0x20] ss:$8 sps:$4 sm:$0xff]  }
 0x295   : > { %v1806_v59 = vmax.f32 %v1651_v13, 0.0  ;;  %v1838_v29 = vmax.f32 %v1731_v12, 0.0  ;;  %v3611_v12 = vld [vmem:[%s4902_s3 + $0x34] ss:$8 sps:$4 sm:$0xff]  }
 0x296   : > { %v1867_v60 = vpack.c.bf16 %v1805_v56, %v1803_v6  ;;  %v4381_v0 = vpack.c.bf16 %v1837_v14, %v1835_v16 }
 0x297   : > { %v1868_v61 = vpack.c.bf16 %v1806_v59, %v1804_v26  ;;  %v1654_v63 = vpop.f32.mrb[4].mxu0  ;;  %v4384_v7 = vpack.c.bf16 %v1838_v29, %v1836_v58  ;;  %v1734_v19 = vpop.f32.mrb[4].mxu1 }
 0x298   : > { %v1655_v10 = vadd.f32 %v1654_v63, %v4367_v43  ;;  %v1656_v18 = vpop.f32.mrb[5].mxu0  ;;  %v1735_v31 = vadd.f32 %v1734_v19, %v4367_v43  ;;  %v1736_v24 = vpop.f32.mrb[5].mxu1 }
 0x299   : > { %v1657_v8 = vadd.f32 %v1656_v18, %v4371_v47  ;;  %v1658_v20 = vpop.f32.mrb[6].mxu0  ;;  %1931 = vmatprep.mubr.bf16.mxu1 %v1868_v61  ;;  %v1737_v3 = vadd.f32 %v1736_v24, %v4371_v47  ;;  %v1738_v25 = vpop.f32.mrb[6].mxu1  ;;  %v3612_v18 = vld [vmem:[%s4902_s3 + $0x30] ss:$8 sps:$4 sm:$0xff]   ;;  %v3613_v24 = vld [vmem:[%s4902_s3 + $0x44] ss:$8 sps:$4 sm:$0xff]  }
 0x29a   : > { %v1659_v32 = vadd.f32 %v1658_v20, %v4367_v43  ;;  %v1660_v15 = vpop.f32.mrb[7].mxu0  ;;  %1932 = vmatmul.mubr.bf16.vlgmr.msra.gmra.mrb[32].mxu1 %v1867_v60  ;;  %v1839_v17 = vmax.f32 %v1735_v31, 0.0  ;;  %v1739_v28 = vadd.f32 %v1738_v25, %v4367_v43  ;;  %v1740_v22 = vpop.f32.mrb[7].mxu1  ;;  %v1807_v37 = vmax.f32 %v1655_v10, 0.0 }
 0x29b   : > { %v1661_v4 = vadd.f32 %v1660_v15, %v4371_v47  ;;  %2478 = vmatpush1.bf16.msra.mxu1 %v3606_v30  ;;  %v1840_v33 = vmax.f32 %v1737_v3, 0.0  ;;  %v1741_v34 = vadd.f32 %v1740_v22, %v4371_v47  ;;  %v1808_v42 = vmax.f32 %v1657_v8, 0.0 }
 0x29c   : > { %v1809_v38 = vmax.f32 %v1659_v32, 0.0  ;;  %2479 = vmatprep.subr.bf16.mxu1 %v3607_v40  ;;  %v1841_v45 = vmax.f32 %v1739_v28, 0.0 }
 0x29d   : > { %v1810_v9 = vmax.f32 %v1661_v4, 0.0  ;;  %v1842_v21 = vmax.f32 %v1741_v34, 0.0  ;;  %v3614_v34 = vld [vmem:[%s4902_s3 + $0x40] ss:$8 sps:$4 sm:$0xff]  }
 0x29e   : > { %v1869_v46 = vpack.c.bf16 %v1809_v38, %v1807_v37  ;;  %v4399_v36 = vpack.c.bf16 %v1841_v45, %v1839_v17 }
 0x29f   : > { %v1870_v35 = vpack.c.bf16 %v1810_v9, %v1808_v42  ;;  %v1664_v48 = vpop.f32.mrb[8].mxu0  ;;  %2480 = vmatpush1.bf16.msra.mxu1 %v3608_v23  ;;  %v4405_v41 = vpack.c.bf16 %v1842_v21, %v1840_v33  ;;  %v1744_v51 = vpop.f32.mrb[8].mxu1 }
 0x2a0   : > { %v1665_v52 = vadd.f32 %v1664_v48, %v4367_v43  ;;  %v1666_v39 = vpop.f32.mrb[9].mxu0  ;;  %2481 = vmatprep.subr.bf16.mxu1 %v3609_v55  ;;  %v1745_v27 = vadd.f32 %v1744_v51, %v4367_v43  ;;  %v1746_v2 = vpop.f32.mrb[9].mxu1 }
 0x2a1   : > { %v1667_v62 = vadd.f32 %v1666_v39, %v4371_v47  ;;  %v1668_v1 = vpop.f32.mrb[10].mxu0  ;;  %1941 = vmatprep.mubr.bf16.mxu1 %v1870_v35  ;;  %v1747_v50 = vadd.f32 %v1746_v2, %v4371_v47  ;;  %v1748_v5 = vpop.f32.mrb[10].mxu1 }
 0x2a2   : > { %v1669_v11 = vadd.f32 %v1668_v1, %v4367_v43  ;;  %v1670_v49 = vpop.f32.mrb[11].mxu0  ;;  %1942 = vmatmul.mubr.bf16.gmra.mrb[36].mxu1 %v1869_v46  ;;  %v1843_v53 = vmax.f32 %v1745_v27, 0.0  ;;  %v1749_v13 = vadd.f32 %v1748_v5, %v4367_v43  ;;  %v1750_v16 = vpop.f32.mrb[11].mxu1  ;;  %v1811_v54 = vmax.f32 %v1665_v52, 0.0  ;;  %v3615_v46 = vld [vmem:[%s4902_s3 + $0x54] ss:$8 sps:$4 sm:$0xff]  }
 0x2a3   : > { %v1671_v44 = vadd.f32 %v1670_v49, %v4371_v47  ;;  %2482 = vmatpush1.bf16.msra.mxu1 %v3610_v57  ;;  %v1844_v56 = vmax.f32 %v1747_v50, 0.0  ;;  %v1751_v58 = vadd.f32 %v1750_v16, %v4371_v47  ;;  %v1812_v26 = vmax.f32 %v1667_v62, 0.0  ;;  %v3616_v62 = vld [vmem:[%s4902_s3 + $0x50] ss:$8 sps:$4 sm:$0xff]   ;;  %v3617_v49 = vld [vmem:[%s4902_s3 + $0x64] ss:$8 sps:$4 sm:$0xff]  }
 0x2a4   : > { %v1813_v6 = vmax.f32 %v1669_v11, 0.0  ;;  %2483 = vmatprep.subr.bf16.mxu1 %v3611_v12  ;;  %v1845_v14 = vmax.f32 %v1749_v13, 0.0 }
 0x2a5   : > { %v1814_v59 = vmax.f32 %v1671_v44, 0.0  ;;  %v1846_v29 = vmax.f32 %v1751_v58, 0.0 }
 0x2a6   : > { %v1871_v60 = vpack.c.bf16 %v1813_v6, %v1811_v54  ;;  %v4423_v10 = vpack.c.bf16 %v1845_v14, %v1843_v53 }
 0x2a7   : > { %v1872_v61 = vpack.c.bf16 %v1814_v59, %v1812_v26  ;;  %v1674_v63 = vpop.f32.mrb[12].mxu0  ;;  %2484 = vmatpush1.bf16.msra.mxu1 %v3612_v18  ;;  %v4429_v20 = vpack.c.bf16 %v1846_v29, %v1844_v56  ;;  %v1754_v31 = vpop.f32.mrb[12].mxu1  ;;  %v3618_v26 = vld [vmem:[%s4902_s3 + $0x60] ss:$8 sps:$4 sm:$0xff]  }
 0x2a8   : > { %v1675_v19 = vadd.f32 %v1674_v63, %v4367_v43  ;;  %v1676_v8 = vpop.f32.mrb[13].mxu0  ;;  %2485 = vmatprep.subr.bf16.mxu1 %v3613_v24  ;;  %v1755_v3 = vadd.f32 %v1754_v31, %v4367_v43  ;;  %v1756_v25 = vpop.f32.mrb[13].mxu1 }
 0x2a9   : > { %v1677_v32 = vadd.f32 %v1676_v8, %v4371_v47  ;;  %v1678_v15 = vpop.f32.mrb[14].mxu0  ;;  %1951 = vmatprep.mubr.bf16.mxu1 %v1872_v61  ;;  %v1757_v28 = vadd.f32 %v1756_v25, %v4371_v47  ;;  %v1758_v22 = vpop.f32.mrb[14].mxu1  ;;  %v3619_v61 = vld [vmem:[%s4902_s3 + $0x74] ss:$8 sps:$4 sm:$0xff]  }
 0x2aa   : > { %v1679_v4 = vadd.f32 %v1678_v15, %v4367_v43  ;;  %v1680_v17 = vpop.f32.mrb[15].mxu0  ;;  %1952 = vmatmul.mubr.bf16.gmra.mrb[40].mxu1 %v1871_v60  ;;  %v1847_v37 = vmax.f32 %v1755_v3, 0.0  ;;  %v1759_v38 = vadd.f32 %v1758_v22, %v4367_v43  ;;  %v1760_v33 = vpop.f32.mrb[15].mxu1  ;;  %v1815_v40 = vmax.f32 %v1675_v19, 0.0  ;;  %v3620_v3 = vld [vmem:[%s4902_s3 + $0x70] ss:$8 sps:$4 sm:$0xff]  }
 0x2ab   : > { %v1681_v30 = vadd.f32 %v1680_v17, %v4371_v47  ;;  %2486 = vmatpush1.bf16.msra.mxu1 %v3614_v34  ;;  %v1848_v9 = vmax.f32 %v1757_v28, 0.0  ;;  %v1761_v45 = vadd.f32 %v1760_v33, %v4371_v47  ;;  %v1816_v21 = vmax.f32 %v1677_v32, 0.0  ;;  %v3621_v22 = vld [vmem:[%s4902_s3 + $0x84] ss:$8 sps:$4 sm:$0xff]  }
 0x2ac   : > { %v1817_v42 = vmax.f32 %v1679_v4, 0.0  ;;  %2487 = vmatprep.subr.bf16.mxu1 %v3615_v46  ;;  %v1849_v48 = vmax.f32 %v1759_v38, 0.0 }
 0x2ad   : > { %v1818_v35 = vmax.f32 %v1681_v30, 0.0  ;;  %v1850_v52 = vmax.f32 %v1761_v45, 0.0 }
 0x2ae   : > { %v1873_v23 = vpack.c.bf16 %v1817_v42, %v1815_v40  ;;  %v4447_v55 = vpack.c.bf16 %v1849_v48, %v1847_v37  ;;  %v3622_v48 = vld [vmem:[%s4902_s3 + $0x80] ss:$8 sps:$4 sm:$0xff]  }
 0x2af   : > { %v1874_v39 = vpack.c.bf16 %v1818_v35, %v1816_v21  ;;  %v1684_v51 = vpop.f32.mrb[16].mxu0  ;;  %2488 = vmatpush1.bf16.msra.mxu1 %v3616_v62  ;;  %v4453_v2 = vpack.c.bf16 %v1850_v52, %v1848_v9  ;;  %v1764_v11 = vpop.f32.mrb[16].mxu1  ;;  %v3623_v62 = vld [vmem:[%s4902_s3 + $0x94] ss:$8 sps:$4 sm:$0xff]  }
 0x2b0   : > { %v1685_v1 = vadd.f32 %v1684_v51, %v4367_v43  ;;  %v1686_v27 = vpop.f32.mrb[17].mxu0  ;;  %2489 = vmatprep.subr.bf16.mxu1 %v3617_v49  ;;  %v1765_v44 = vadd.f32 %v1764_v11, %v4367_v43  ;;  %v1766_v53 = vpop.f32.mrb[17].mxu1 }
 0x2b1   : > { %v1687_v50 = vadd.f32 %v1686_v27, %v4371_v47  ;;  %v1688_v5 = vpop.f32.mrb[18].mxu0  ;;  %1961 = vmatprep.mubr.bf16.mxu1 %v1874_v39  ;;  %v1767_v57 = vadd.f32 %v1766_v53, %v4371_v47  ;;  %v1768_v54 = vpop.f32.mrb[18].mxu1 }
 0x2b2   : > { %v1689_v13 = vadd.f32 %v1688_v5, %v4367_v43  ;;  %v1690_v16 = vpop.f32.mrb[19].mxu0  ;;  %1962 = vmatmul.mubr.bf16.gmra.mrb[44].mxu1 %v1873_v23  ;;  %v1851_v56 = vmax.f32 %v1765_v44, 0.0  ;;  %v1769_v58 = vadd.f32 %v1768_v54, %v4367_v43  ;;  %v1770_v12 = vpop.f32.mrb[19].mxu1  ;;  %v1819_v59 = vmax.f32 %v1685_v1, 0.0 }
 0x2b3   : > { %v1691_v6 = vadd.f32 %v1690_v16, %v4371_v47  ;;  %2490 = vmatpush1.bf16.msra.mxu1 %v3618_v26  ;;  %v1852_v60 = vmax.f32 %v1767_v57, 0.0  ;;  %v1771_v29 = vadd.f32 %v1770_v12, %v4371_v47  ;;  %v1820_v63 = vmax.f32 %v1687_v50, 0.0 }
 0x2b4   : > { %v1821_v14 = vmax.f32 %v1689_v13, 0.0  ;;  %2491 = vmatprep.subr.bf16.mxu1 %v3619_v61  ;;  %v1853_v19 = vmax.f32 %v1769_v58, 0.0  ;;  %v3624_v13 = vld [vmem:[%s4902_s3 + $0x90] ss:$8 sps:$4 sm:$0xff]  }
 0x2b5   : > { %v1822_v18 = vmax.f32 %v1691_v6, 0.0  ;;  %v1854_v31 = vmax.f32 %v1771_v29, 0.0 }
 0x2b6   : > { %v1875_v8 = vpack.c.bf16 %v1821_v14, %v1819_v59  ;;  %v4471_v15 = vpack.c.bf16 %v1853_v19, %v1851_v56  ;;  %v3625_v56 = vld [vmem:[%s4902_s3 + $0xa4] ss:$8 sps:$4 sm:$0xff]  }
 0x2b7   : > { %v1876_v24 = vpack.c.bf16 %v1822_v18, %v1820_v63  ;;  %v1694_v32 = vpop.f32.mrb[20].mxu0  ;;  %2492 = vmatpush1.bf16.msra.mxu1 %v3620_v3  ;;  %v4477_v17 = vpack.c.bf16 %v1854_v31, %v1852_v60  ;;  %v1774_v28 = vpop.f32.mrb[20].mxu1  ;;  %v3626_v31 = vld [vmem:[%s4902_s3 + $0xa0] ss:$8 sps:$4 sm:$0xff]  }
 0x2b8   : > { %v1695_v25 = vadd.f32 %v1694_v32, %v4367_v43  ;;  %v1696_v4 = vpop.f32.mrb[21].mxu0  ;;  %2493 = vmatprep.subr.bf16.mxu1 %v3621_v22  ;;  %v1775_v38 = vadd.f32 %v1774_v28, %v4367_v43  ;;  %v1776_v33 = vpop.f32.mrb[21].mxu1 }
 0x2b9   : > { %v1697_v30 = vadd.f32 %v1696_v4, %v4371_v47  ;;  %v1698_v37 = vpop.f32.mrb[22].mxu0  ;;  %1971 = vmatprep.mubr.bf16.mxu1 %v1876_v24  ;;  %v1777_v42 = vadd.f32 %v1776_v33, %v4371_v47  ;;  %v1778_v9 = vpop.f32.mrb[22].mxu1  ;;  %v3627_v4 = vld [vmem:[%s4902_s3 + $0xb4] ss:$8 sps:$4 sm:$0xff]  }
 0x2ba   : > { %v1699_v34 = vadd.f32 %v1698_v37, %v4367_v43  ;;  %v1700_v40 = vpop.f32.mrb[23].mxu0  ;;  %1972 = vmatmul.mubr.bf16.gmra.mrb[48].mxu1 %v1875_v8  ;;  %v1855_v46 = vmax.f32 %v1775_v38, 0.0  ;;  %v1779_v21 = vadd.f32 %v1778_v9, %v4367_v43  ;;  %v1780_v35 = vpop.f32.mrb[23].mxu1  ;;  %v1823_v23 = vmax.f32 %v1695_v25, 0.0 }
 0x2bb   : > { %v1701_v45 = vadd.f32 %v1700_v40, %v4371_v47  ;;  %2494 = vmatpush1.bf16.msra.mxu1 %v3622_v48  ;;  %v1856_v39 = vmax.f32 %v1777_v42, 0.0  ;;  %v1781_v51 = vadd.f32 %v1780_v35, %v4371_v47  ;;  %v1824_v1 = vmax.f32 %v1697_v30, 0.0  ;;  %v3628_v42 = vld [vmem:[%s4902_s3 + $0xb0] ss:$8 sps:$4 sm:$0xff]   ;;  %v3629_v35 = vld [vmem:[%s4902_s3 + $0xc4] ss:$8 sps:$4 sm:$0xff]  }
 0x2bc   : > { %v1825_v52 = vmax.f32 %v1699_v34, 0.0  ;;  %2495 = vmatprep.subr.bf16.mxu1 %v3623_v62  ;;  %v1857_v11 = vmax.f32 %v1779_v21, 0.0 }
 0x2bd   : > { %v1826_v27 = vmax.f32 %v1701_v45, 0.0  ;;  %v1858_v50 = vmax.f32 %v1781_v51, 0.0 }
 0x2be   : > { %v1877_v49 = vpack.c.bf16 %v1825_v52, %v1823_v23  ;;  %v4495_v53 = vpack.c.bf16 %v1857_v11, %v1855_v46 }
 0x2bf   : > { %v1878_v5 = vpack.c.bf16 %v1826_v27, %v1824_v1  ;;  %v1704_v44 = vpop.f32.mrb[24].mxu0  ;;  %2496 = vmatpush1.bf16.msra.mxu1 %v3624_v13  ;;  %v4501_v54 = vpack.c.bf16 %v1858_v50, %v1856_v39  ;;  %v1784_v6 = vpop.f32.mrb[24].mxu1 }
 0x2c0   : > { %v1705_v16 = vadd.f32 %v1704_v44, %v4367_v43  ;;  %v1706_v57 = vpop.f32.mrb[25].mxu0  ;;  %2497 = vmatprep.subr.bf16.mxu1 %v3625_v56  ;;  %v1785_v26 = vadd.f32 %v1784_v6, %v4367_v43  ;;  %v1786_v59 = vpop.f32.mrb[25].mxu1  ;;  %v3630_v44 = vld [vmem:[%s4902_s3 + $0xc0] ss:$8 sps:$4 sm:$0xff]   ;;  %v3631_v56 = vld [vmem:[%s4902_s3 + $0xd4] ss:$8 sps:$4 sm:$0xff]  }
 0x2c1   : > { %v1707_v58 = vadd.f32 %v1706_v57, %v4371_v47  ;;  %v1708_v12 = vpop.f32.mrb[26].mxu0  ;;  %1981 = vmatprep.mubr.bf16.mxu1 %v1878_v5  ;;  %v1787_v29 = vadd.f32 %v1786_v59, %v4371_v47  ;;  %v1788_v61 = vpop.f32.mrb[26].mxu1 }
 0x2c2   : > { %v1709_v14 = vadd.f32 %v1708_v12, %v4367_v43  ;;  %v1710_v60 = vpop.f32.mrb[27].mxu0  ;;  %1982 = vmatmul.mubr.bf16.gmra.mrb[52].mxu1 %v1877_v49  ;;  %v1859_v18 = vmax.f32 %v1785_v26, 0.0  ;;  %v1789_v19 = vadd.f32 %v1788_v61, %v4367_v43  ;;  %v1790_v8 = vpop.f32.mrb[27].mxu1  ;;  %v1827_v24 = vmax.f32 %v1705_v16, 0.0  ;;  %v3632_v61 = vld [vmem:[%s4902_s3 + $0xd0] ss:$8 sps:$4 sm:$0xff]  }
 0x2c3   : > { %v1711_v63 = vadd.f32 %v1710_v60, %v4371_v47  ;;  %2498 = vmatpush1.bf16.msra.mxu1 %v3626_v31  ;;  %v1860_v3 = vmax.f32 %v1787_v29, 0.0  ;;  %v1791_v25 = vadd.f32 %v1790_v8, %v4371_v47  ;;  %v1828_v28 = vmax.f32 %v1707_v58, 0.0  ;;  %v3635_v8 = vld [vmem:[%s4902_s3 + $0xf4] ss:$8 sps:$4 sm:$0xff]   ;;  %v3636_v31 = vld [vmem:[%s4902_s3 + $0xf0] ss:$8 sps:$4 sm:$0xff]  }
 0x2c4   : > { %v1829_v32 = vmax.f32 %v1709_v14, 0.0  ;;  %2499 = vmatprep.subr.bf16.mxu1 %v3627_v4  ;;  %v1861_v30 = vmax.f32 %v1789_v19, 0.0  ;;  %v3634_v19 = vld [vmem:[%s4902_s3 + $0xe0] ss:$8 sps:$4 sm:$0xff]  }
 0x2c5   : > { %v1830_v22 = vmax.f32 %v1711_v63, 0.0  ;;  %v1862_v38 = vmax.f32 %v1791_v25, 0.0 }
 0x2c6   : > { %v1879_v37 = vpack.c.bf16 %v1829_v32, %v1827_v24  ;;  %v4519_v40 = vpack.c.bf16 %v1861_v30, %v1859_v18  ;;  %v3633_v18 = vld [vmem:[%s4902_s3 + $0xe4] ss:$8 sps:$4 sm:$0xff]  }
 0x2c7   : > { %v1880_v33 = vpack.c.bf16 %v1830_v22, %v1828_v28  ;;  %v1714_v34 = vpop.f32.mrb[28].mxu0  ;;  %2500 = vmatpush1.bf16.msra.mxu1 %v3628_v42  ;;  %v1896_v46 = vpack.c.bf16 %v1862_v38, %v1860_v3  ;;  %v1794_v21 = vpop.f32.mrb[28].mxu1 }
 0x2c8   : > { %v1715_v9 = vadd.f32 %v1714_v34, %v4367_v43  ;;  %v1716_v45 = vpop.f32.mrb[29].mxu0  ;;  %2501 = vmatprep.subr.bf16.mxu1 %v3629_v35  ;;  %v1795_v52 = vadd.f32 %v1794_v21, %v4367_v43  ;;  %v1796_v39 = vpop.f32.mrb[29].mxu1 }
 0x2c9   : > { %v1717_v48 = vadd.f32 %v1716_v45, %v4371_v47  ;;  %v1718_v23 = vpop.f32.mrb[30].mxu0  ;;  %1991 = vmatprep.mubr.bf16.mxu1 %v1880_v33  ;;  %v1797_v1 = vadd.f32 %v1796_v39, %v4371_v47  ;;  %v1798_v27 = vpop.f32.mrb[30].mxu1 }
 0x2ca   : > { %v1719_v51 = vadd.f32 %v1718_v23, %v4367_v43  ;;  %v1720_v62 = vpop.f32.mrb[31].mxu0  ;;  %1992 = vmatmul.mubr.bf16.gmra.mrb[56].mxu1 %v1879_v37  ;;  %v1863_v49 = vmax.f32 %v1795_v52, 0.0  ;;  %v1799_v50 = vadd.f32 %v1798_v27, %v4367_v43  ;;  %v1800_v5 = vpop.f32.mrb[31].mxu1  ;;  %v1831_v13 = vmax.f32 %v1715_v9, 0.0 }
 0x2cb   : > { %v1721_v11 = vadd.f32 %v1720_v62, %v4371_v47  ;;  %2502 = vmatpush1.bf16.msra.mxu1 %v3630_v44  ;;  %v1864_v57 = vmax.f32 %v1797_v1, 0.0  ;;  %v1801_v6 = vadd.f32 %v1800_v5, %v4371_v47  ;;  %v1832_v58 = vmax.f32 %v1717_v48, 0.0 }
 0x2cc   : > { %v1833_v16 = vmax.f32 %v1719_v51, 0.0  ;;  %2503 = vmatprep.subr.bf16.mxu1 %v3631_v56  ;;  %v1865_v26 = vmax.f32 %v1799_v50, 0.0 }
 0x2cd   : > { %v1834_v12 = vmax.f32 %v1721_v11, 0.0  ;;  %v1866_v14 = vmax.f32 %v1801_v6, 0.0 }
 0x2ce   : > { %v1881_v59 = vpack.c.bf16 %v1833_v16, %v1831_v13  ;;  %v1897_v29 = vpack.c.bf16 %v1865_v26, %v1863_v49 }
 0x2cf   : > { %v1882_v60 = vpack.c.bf16 %v1834_v12, %v1832_v58  ;;  %2504 = vmatpush1.bf16.msra.mxu1 %v3632_v61  ;;  %v1898_v63 = vpack.c.bf16 %v1866_v14, %v1864_v57 }
 0x2d0   : > { %2505 = vmatprep.subr.bf16.mxu1 %v3633_v18 }
 0x2d1   : > { %2001 = vmatprep.mubr.bf16.mxu1 %v1882_v60 }
 0x2d2   : > { %2002 = vmatmul.mubr.bf16.gmra.mrb[60].mxu1 %v1881_v59 }
 0x2d3   : > { %2011 = vmatprep.mubr.bf16.mxu1 %v4384_v7  ;;  %2506 = vmatpush1.bf16.msra.mxu1 %v3634_v19 }
 0x2d4   : > { %2507 = vmatprep.subr.bf16.mxu1 %v3635_v8 }
 0x2d7   : > { %2508 = vmatpush1.bf16.msra.mxu1 %v3636_v31 }
 0x2da   : > { %2012 = vmatmul.mubr.bf16.gmra.mrb[64].mxu1 %v4381_v0 }
 0x2db   : > { %2021 = vmatprep.mubr.bf16.mxu1 %v4405_v41 }
 0x2e2   : > { %2022 = vmatmul.mubr.bf16.gmra.mrb[68].mxu1 %v4399_v36 }
 0x2e3   : > { %2031 = vmatprep.mubr.bf16.mxu1 %v4429_v20 }
 0x2ea   : > { %2032 = vmatmul.mubr.bf16.gmra.mrb[72].mxu1 %v4423_v10 }
 0x2eb   : > { %2041 = vmatprep.mubr.bf16.mxu1 %v4453_v2 }
 0x2f2   : > { %2042 = vmatmul.mubr.bf16.gmra.mrb[76].mxu1 %v4447_v55 }
 0x2f3   : > { %2051 = vmatprep.mubr.bf16.mxu1 %v4477_v17 }
 0x2fa   : > { %2052 = vmatmul.mubr.bf16.gmra.mrb[80].mxu1 %v4471_v15 }
 0x2fb   : > { %2061 = vmatprep.mubr.bf16.mxu1 %v4501_v54 }
 0x302   : > { %2062 = vmatmul.mubr.bf16.gmra.mrb[84].mxu1 %v4495_v53 }
 0x303   : > { %2071 = vmatprep.mubr.bf16.mxu1 %v1896_v46 }
 0x30a   : > { %2072 = vmatmul.mubr.bf16.gmra.mrb[88].mxu1 %v4519_v40 }
 0x30b   : > { %2081 = vmatprep.mubr.bf16.mxu1 %v1898_v63 }
 0x312   : > { %2082 = vmatmul.mubr.bf16.gmra.mrb[92].mxu1 %v1897_v29 }
 0x36d   : > { %v1933_v0 = vpop.f32.mrb[32].mxu1 }
 0x36e   : > { %v1934_v7 = vadd.f32 %v1933_v0, %v4367_v43  ;;  %v1935_v36 = vpop.f32.mrb[33].mxu1 }
 0x36f   : > { %v1936_v41 = vadd.f32 %v1935_v36, %v4371_v47  ;;  %v1937_v10 = vpop.f32.mrb[34].mxu1 }
 0x370   : > { %v1938_v20 = vadd.f32 %v1937_v10, %v4367_v43  ;;  %v1939_v55 = vpop.f32.mrb[35].mxu1  ;;  %v2092_v15 = vmax.f32 %v1934_v7, 0.0 }
 0x371   : > { %v1940_v2 = vadd.f32 %v1939_v55, %v4371_v47  ;;  %v2093_v53 = vmax.f32 %v1936_v41, 0.0 }
 0x372   : > { %v2094_v17 = vmax.f32 %v1938_v20, 0.0 }
 0x373   : > { %v2095_v54 = vmax.f32 %v1940_v2, 0.0 }
 0x374   : > { %v2156_v24 = vpack.c.bf16 %v2094_v17, %v2092_v15 }
 0x375   : > { %v2157_v32 = vpack.c.bf16 %v2095_v54, %v2093_v53  ;;  %v1943_v3 = vpop.f32.mrb[36].mxu1 }
 0x376   : > { %v1944_v25 = vadd.f32 %v1943_v3, %v4367_v43  ;;  %v1945_v4 = vpop.f32.mrb[37].mxu1 }
 0x377   : > { %v1946_v28 = vadd.f32 %v1945_v4, %v4371_v47  ;;  %v1947_v22 = vpop.f32.mrb[38].mxu1  ;;  %2220 = vmatprep.mubr.bf16.mxu0 %v2157_v32 }
 0x378   : > { %v1948_v30 = vadd.f32 %v1947_v22, %v4367_v43  ;;  %v1949_v37 = vpop.f32.mrb[39].mxu1  ;;  %2221 = vmatmul.mubr.bf16.vlgmr.msra.gmra.mrb[32].mxu0 %v2156_v24  ;;  %v2096_v33 = vmax.f32 %v1944_v25, 0.0 }
 0x379   : > { %v1950_v38 = vadd.f32 %v1949_v37, %v4371_v47  ;;  %v2097_v40 = vmax.f32 %v1946_v28, 0.0 }
 0x37a   : > { %v2098_v34 = vmax.f32 %v1948_v30, 0.0 }
 0x37b   : > { %v2099_v42 = vmax.f32 %v1950_v38, 0.0 }
 0x37c   : > { %v2158_v9 = vpack.c.bf16 %v2098_v34, %v2096_v33 }
 0x37d   : > { %v2159_v45 = vpack.c.bf16 %v2099_v42, %v2097_v40  ;;  %v1953_v46 = vpop.f32.mrb[40].mxu1 }
 0x37e   : > { %v1954_v21 = vadd.f32 %v1953_v46, %v4367_v43  ;;  %v1955_v35 = vpop.f32.mrb[41].mxu1 }
 0x37f   : > { %v1956_v48 = vadd.f32 %v1955_v35, %v4371_v47  ;;  %v1957_v23 = vpop.f32.mrb[42].mxu1  ;;  %2230 = vmatprep.mubr.bf16.mxu0 %v2159_v45 }
 0x380   : > { %v1958_v52 = vadd.f32 %v1957_v23, %v4367_v43  ;;  %v1959_v39 = vpop.f32.mrb[43].mxu1  ;;  %2231 = vmatmul.mubr.bf16.gmra.mrb[36].mxu0 %v2158_v9  ;;  %v2100_v62 = vmax.f32 %v1954_v21, 0.0 }
 0x381   : > { %v1960_v51 = vadd.f32 %v1959_v39, %v4371_v47  ;;  %v2101_v27 = vmax.f32 %v1956_v48, 0.0 }
 0x382   : > { %v2102_v1 = vmax.f32 %v1958_v52, 0.0 }
 0x383   : > { %v2103_v11 = vmax.f32 %v1960_v51, 0.0 }
 0x384   : > { %v2160_v49 = vpack.c.bf16 %v2102_v1, %v2100_v62 }
 0x385   : > { %v2161_v50 = vpack.c.bf16 %v2103_v11, %v2101_v27  ;;  %v1963_v5 = vpop.f32.mrb[44].mxu1 }
 0x386   : > { %v1964_v44 = vadd.f32 %v1963_v5, %v4367_v43  ;;  %v1965_v13 = vpop.f32.mrb[45].mxu1 }
 0x387   : > { %v1966_v16 = vadd.f32 %v1965_v13, %v4371_v47  ;;  %v1967_v57 = vpop.f32.mrb[46].mxu1  ;;  %2240 = vmatprep.mubr.bf16.mxu0 %v2161_v50 }
 0x388   : > { %v1968_v6 = vadd.f32 %v1967_v57, %v4367_v43  ;;  %v1969_v56 = vpop.f32.mrb[47].mxu1  ;;  %2241 = vmatmul.mubr.bf16.gmra.mrb[40].mxu0 %v2160_v49  ;;  %v2104_v12 = vmax.f32 %v1964_v44, 0.0 }
 0x389   : > { %v1970_v58 = vadd.f32 %v1969_v56, %v4371_v47  ;;  %v2105_v59 = vmax.f32 %v1966_v16, 0.0 }
 0x38a   : > { %v2106_v26 = vmax.f32 %v1968_v6, 0.0 }
 0x38b   : > { %v2107_v14 = vmax.f32 %v1970_v58, 0.0 }
 0x38c   : > { %v2162_v60 = vpack.c.bf16 %v2106_v26, %v2104_v12 }
 0x38d   : > { %v2163_v29 = vpack.c.bf16 %v2107_v14, %v2105_v59  ;;  %v1973_v61 = vpop.f32.mrb[48].mxu1 }
 0x38e   : > { %v1974_v63 = vadd.f32 %v1973_v61, %v4367_v43  ;;  %v1975_v18 = vpop.f32.mrb[49].mxu1 }
 0x38f   : > { %v1976_v19 = vadd.f32 %v1975_v18, %v4371_v47  ;;  %v1977_v8 = vpop.f32.mrb[50].mxu1  ;;  %2250 = vmatprep.mubr.bf16.mxu0 %v2163_v29 }
 0x390   : > { %v1978_v31 = vadd.f32 %v1977_v8, %v4367_v43  ;;  %v1979_v0 = vpop.f32.mrb[51].mxu1  ;;  %2251 = vmatmul.mubr.bf16.gmra.mrb[44].mxu0 %v2162_v60  ;;  %v2108_v36 = vmax.f32 %v1974_v63, 0.0 }
 0x391   : > { %v1980_v7 = vadd.f32 %v1979_v0, %v4371_v47  ;;  %v2109_v10 = vmax.f32 %v1976_v19, 0.0 }
 0x392   : > { %v2110_v41 = vmax.f32 %v1978_v31, 0.0 }
 0x393   : > { %v2111_v20 = vmax.f32 %v1980_v7, 0.0 }
 0x394   : > { %v2164_v55 = vpack.c.bf16 %v2110_v41, %v2108_v36 }
 0x395   : > { %v2165_v2 = vpack.c.bf16 %v2111_v20, %v2109_v10  ;;  %v1983_v15 = vpop.f32.mrb[52].mxu1 }
 0x396   : > { %v1984_v17 = vadd.f32 %v1983_v15, %v4367_v43  ;;  %v1985_v53 = vpop.f32.mrb[53].mxu1 }
 0x397   : > { %v1986_v54 = vadd.f32 %v1985_v53, %v4371_v47  ;;  %v1987_v24 = vpop.f32.mrb[54].mxu1  ;;  %2260 = vmatprep.mubr.bf16.mxu0 %v2165_v2 }
 0x398   : > { %v1988_v32 = vadd.f32 %v1987_v24, %v4367_v43  ;;  %v1989_v3 = vpop.f32.mrb[55].mxu1  ;;  %2261 = vmatmul.mubr.bf16.gmra.mrb[48].mxu0 %v2164_v55  ;;  %v2112_v4 = vmax.f32 %v1984_v17, 0.0 }
 0x399   : > { %v1990_v25 = vadd.f32 %v1989_v3, %v4371_v47  ;;  %v2113_v22 = vmax.f32 %v1986_v54, 0.0 }
 0x39a   : > { %v2114_v28 = vmax.f32 %v1988_v32, 0.0 }
 0x39b   : > { %v2115_v30 = vmax.f32 %v1990_v25, 0.0 }
 0x39c   : > { %v2166_v37 = vpack.c.bf16 %v2114_v28, %v2112_v4 }
 0x39d   : > { %v2167_v38 = vpack.c.bf16 %v2115_v30, %v2113_v22  ;;  %v1993_v33 = vpop.f32.mrb[56].mxu1 }
 0x39e   : > { %v1994_v34 = vadd.f32 %v1993_v33, %v4367_v43  ;;  %v1995_v40 = vpop.f32.mrb[57].mxu1 }
 0x39f   : > { %v1996_v42 = vadd.f32 %v1995_v40, %v4371_v47  ;;  %v1997_v9 = vpop.f32.mrb[58].mxu1  ;;  %2270 = vmatprep.mubr.bf16.mxu0 %v2167_v38 }
 0x3a0   : > { %v1998_v45 = vadd.f32 %v1997_v9, %v4367_v43  ;;  %v1999_v46 = vpop.f32.mrb[59].mxu1  ;;  %2271 = vmatmul.mubr.bf16.gmra.mrb[52].mxu0 %v2166_v37  ;;  %v2116_v35 = vmax.f32 %v1994_v34, 0.0 }
 0x3a1   : > { %v2000_v21 = vadd.f32 %v1999_v46, %v4371_v47  ;;  %v2117_v23 = vmax.f32 %v1996_v42, 0.0 }
 0x3a2   : > { %v2118_v48 = vmax.f32 %v1998_v45, 0.0 }
 0x3a3   : > { %v2119_v52 = vmax.f32 %v2000_v21, 0.0 }
 0x3a4   : > { %v2168_v39 = vpack.c.bf16 %v2118_v48, %v2116_v35 }
 0x3a5   : > { %v2169_v51 = vpack.c.bf16 %v2119_v52, %v2117_v23  ;;  %v2003_v62 = vpop.f32.mrb[60].mxu1 }
 0x3a6   : > { %v2004_v1 = vadd.f32 %v2003_v62, %v4367_v43  ;;  %v2005_v27 = vpop.f32.mrb[61].mxu1 }
 0x3a7   : > { %v2006_v11 = vadd.f32 %v2005_v27, %v4371_v47  ;;  %v2007_v49 = vpop.f32.mrb[62].mxu1  ;;  %2280 = vmatprep.mubr.bf16.mxu0 %v2169_v51 }
 0x3a8   : > { %v2008_v50 = vadd.f32 %v2007_v49, %v4367_v43  ;;  %v2009_v5 = vpop.f32.mrb[63].mxu1  ;;  %2281 = vmatmul.mubr.bf16.gmra.mrb[56].mxu0 %v2168_v39  ;;  %v2120_v13 = vmax.f32 %v2004_v1, 0.0 }
 0x3a9   : > { %v2010_v44 = vadd.f32 %v2009_v5, %v4371_v47  ;;  %v2121_v57 = vmax.f32 %v2006_v11, 0.0 }
 0x3aa   : > { %v2122_v16 = vmax.f32 %v2008_v50, 0.0 }
 0x3ab   : > { %v2123_v6 = vmax.f32 %v2010_v44, 0.0 }
 0x3ac   : > { %v2170_v56 = vpack.c.bf16 %v2122_v16, %v2120_v13 }
 0x3ad   : > { %v2171_v58 = vpack.c.bf16 %v2123_v6, %v2121_v57  ;;  %v2013_v12 = vpop.f32.mrb[64].mxu1 }
 0x3ae   : > { %v2014_v26 = vadd.f32 %v2013_v12, %v4367_v43  ;;  %v2015_v59 = vpop.f32.mrb[65].mxu1 }
 0x3af   : > { %v2016_v14 = vadd.f32 %v2015_v59, %v4371_v47  ;;  %v2017_v60 = vpop.f32.mrb[66].mxu1  ;;  %2290 = vmatprep.mubr.bf16.mxu0 %v2171_v58 }
 0x3b0   : > { %v2018_v29 = vadd.f32 %v2017_v60, %v4367_v43  ;;  %v2019_v61 = vpop.f32.mrb[67].mxu1  ;;  %2291 = vmatmul.mubr.bf16.gmra.mrb[60].mxu0 %v2170_v56  ;;  %v2124_v18 = vmax.f32 %v2014_v26, 0.0 }
 0x3b1   : > { %v2020_v63 = vadd.f32 %v2019_v61, %v4371_v47  ;;  %v2125_v8 = vmax.f32 %v2016_v14, 0.0 }
 0x3b2   : > { %v2126_v19 = vmax.f32 %v2018_v29, 0.0 }
 0x3b3   : > { %v2127_v31 = vmax.f32 %v2020_v63, 0.0 }
 0x3b4   : > { %v2172_v0 = vpack.c.bf16 %v2126_v19, %v2124_v18 }
 0x3b5   : > { %v2173_v7 = vpack.c.bf16 %v2127_v31, %v2125_v8  ;;  %v2023_v36 = vpop.f32.mrb[68].mxu1 }
 0x3b6   : > { %v2024_v41 = vadd.f32 %v2023_v36, %v4367_v43  ;;  %v2025_v10 = vpop.f32.mrb[69].mxu1 }
 0x3b7   : > { %v2026_v20 = vadd.f32 %v2025_v10, %v4371_v47  ;;  %v2027_v55 = vpop.f32.mrb[70].mxu1  ;;  %2300 = vmatprep.mubr.bf16.mxu0 %v2173_v7 }
 0x3b8   : > { %v2028_v2 = vadd.f32 %v2027_v55, %v4367_v43  ;;  %v2029_v15 = vpop.f32.mrb[71].mxu1  ;;  %2301 = vmatmul.mubr.bf16.gmra.mrb[64].mxu0 %v2172_v0  ;;  %v2128_v53 = vmax.f32 %v2024_v41, 0.0 }
 0x3b9   : > { %v2030_v17 = vadd.f32 %v2029_v15, %v4371_v47  ;;  %v2129_v24 = vmax.f32 %v2026_v20, 0.0 }
 0x3ba   : > { %v2130_v54 = vmax.f32 %v2028_v2, 0.0 }
 0x3bb   : > { %v2131_v32 = vmax.f32 %v2030_v17, 0.0 }
 0x3bc   : > { %v2174_v3 = vpack.c.bf16 %v2130_v54, %v2128_v53 }
 0x3bd   : > { %v2175_v25 = vpack.c.bf16 %v2131_v32, %v2129_v24  ;;  %v2033_v4 = vpop.f32.mrb[72].mxu1 }
 0x3be   : > { %v2034_v28 = vadd.f32 %v2033_v4, %v4367_v43  ;;  %v2035_v22 = vpop.f32.mrb[73].mxu1 }
 0x3bf   : > { %v2036_v30 = vadd.f32 %v2035_v22, %v4371_v47  ;;  %v2037_v37 = vpop.f32.mrb[74].mxu1  ;;  %2310 = vmatprep.mubr.bf16.mxu0 %v2175_v25 }
 0x3c0   : > { %v2038_v38 = vadd.f32 %v2037_v37, %v4367_v43  ;;  %v2039_v33 = vpop.f32.mrb[75].mxu1  ;;  %2311 = vmatmul.mubr.bf16.gmra.mrb[68].mxu0 %v2174_v3  ;;  %v2132_v40 = vmax.f32 %v2034_v28, 0.0 }
 0x3c1   : > { %v2040_v34 = vadd.f32 %v2039_v33, %v4371_v47  ;;  %v2133_v9 = vmax.f32 %v2036_v30, 0.0 }
 0x3c2   : > { %v2134_v42 = vmax.f32 %v2038_v38, 0.0 }
 0x3c3   : > { %v2135_v45 = vmax.f32 %v2040_v34, 0.0 }
 0x3c4   : > { %v2176_v46 = vpack.c.bf16 %v2134_v42, %v2132_v40 }
 0x3c5   : > { %v2177_v21 = vpack.c.bf16 %v2135_v45, %v2133_v9  ;;  %v2043_v35 = vpop.f32.mrb[76].mxu1 }
 0x3c6   : > { %v2044_v48 = vadd.f32 %v2043_v35, %v4367_v43  ;;  %v2045_v23 = vpop.f32.mrb[77].mxu1 }
 0x3c7   : > { %v2046_v52 = vadd.f32 %v2045_v23, %v4371_v47  ;;  %v2047_v39 = vpop.f32.mrb[78].mxu1  ;;  %2320 = vmatprep.mubr.bf16.mxu0 %v2177_v21 }
 0x3c8   : > { %v2048_v51 = vadd.f32 %v2047_v39, %v4367_v43  ;;  %v2049_v62 = vpop.f32.mrb[79].mxu1  ;;  %2321 = vmatmul.mubr.bf16.gmra.mrb[72].mxu0 %v2176_v46  ;;  %v2136_v27 = vmax.f32 %v2044_v48, 0.0 }
 0x3c9   : > { %v2050_v1 = vadd.f32 %v2049_v62, %v4371_v47  ;;  %v2137_v49 = vmax.f32 %v2046_v52, 0.0 }
 0x3ca   : > { %v2138_v11 = vmax.f32 %v2048_v51, 0.0 }
 0x3cb   : > { %v2139_v50 = vmax.f32 %v2050_v1, 0.0 }
 0x3cc   : > { %v2178_v5 = vpack.c.bf16 %v2138_v11, %v2136_v27  ;;  %v3590_v27 = vld [vmem:[%s4904_s5 + $0x40] sm:$0xff]  }
 0x3cd   : > { %v2179_v44 = vpack.c.bf16 %v2139_v50, %v2137_v49  ;;  %v2053_v13 = vpop.f32.mrb[80].mxu1  ;;  %v3591_v11 = vld [vmem:[%s4904_s5] sm:$0xff]   ;;  %3283 = vmatprep.subr.bf16.mxu0 %v3590_v27  ;;  %v3592_v49 = vld [vmem:[%s4904_s5 + $0x48] sm:$0xff]  }
 0x3ce   : > { %v2054_v16 = vadd.f32 %v2053_v13, %v4367_v43  ;;  %v2055_v57 = vpop.f32.mrb[81].mxu1  ;;  %3284 = vmatpush3.bf16.msra.mxu0 %v3591_v11  ;;  %v3593_v50 = vld [vmem:[%s4904_s5 + $0x8] sm:$0xff]  }
 0x3cf   : > { %v2056_v6 = vadd.f32 %v2055_v57, %v4371_v47  ;;  %v2057_v56 = vpop.f32.mrb[82].mxu1  ;;  %2330 = vmatprep.mubr.bf16.mxu0 %v2179_v44  ;;  %3285 = vmatprep.subr.bf16.mxu0 %v3592_v49 }
 0x3d0   : > { %v2058_v58 = vadd.f32 %v2057_v56, %v4367_v43  ;;  %v2059_v12 = vpop.f32.mrb[83].mxu1  ;;  %2331 = vmatmul.mubr.bf16.gmra.mrb[76].mxu0 %v2178_v5  ;;  %v2140_v59 = vmax.f32 %v2054_v16, 0.0 }
 0x3d1   : > { %v2060_v26 = vadd.f32 %v2059_v12, %v4371_v47  ;;  %v2141_v60 = vmax.f32 %v2056_v6, 0.0  ;;  %v3595_v12 = vld [vmem:[%s4904_s5 + $0x10] sm:$0xff]  }
 0x3d2   : > { %v2142_v14 = vmax.f32 %v2058_v58, 0.0  ;;  %3286 = vmatpush3.bf16.msra.mxu0 %v3593_v50  ;;  %v3594_v58 = vld [vmem:[%s4904_s5 + $0x50] sm:$0xff]  }
 0x3d3   : > { %v2143_v29 = vmax.f32 %v2060_v26, 0.0  ;;  %v3596_v26 = vld [vmem:[%s4904_s5 + $0x58] sm:$0xff]   ;;  %3287 = vmatprep.subr.bf16.mxu0 %v3594_v58 }
 0x3d4   : > { %v2180_v61 = vpack.c.bf16 %v2142_v14, %v2140_v59 }
 0x3d5   : > { %v2181_v63 = vpack.c.bf16 %v2143_v29, %v2141_v60  ;;  %v2063_v18 = vpop.f32.mrb[84].mxu1 }
 0x3d6   : > { %v2064_v19 = vadd.f32 %v2063_v18, %v4367_v43  ;;  %v2065_v8 = vpop.f32.mrb[85].mxu1  ;;  %3288 = vmatpush3.bf16.msra.mxu0 %v3595_v12 }
 0x3d7   : > { %v2066_v31 = vadd.f32 %v2065_v8, %v4371_v47  ;;  %v2067_v0 = vpop.f32.mrb[86].mxu1  ;;  %2340 = vmatprep.mubr.bf16.mxu0 %v2181_v63  ;;  %v3597_v63 = vld [vmem:[%s4904_s5 + $0x18] sm:$0xff]   ;;  %3289 = vmatprep.subr.bf16.mxu0 %v3596_v26 }
 0x3d8   : > { %v2068_v7 = vadd.f32 %v2067_v0, %v4367_v43  ;;  %v2069_v36 = vpop.f32.mrb[87].mxu1  ;;  %2341 = vmatmul.mubr.bf16.gmra.mrb[80].mxu0 %v2180_v61  ;;  %v2144_v10 = vmax.f32 %v2064_v19, 0.0  ;;  %v3598_v19 = vld [vmem:[%s4904_s5 + $0x60] sm:$0xff]  }
 0x3d9   : > { %v2070_v41 = vadd.f32 %v2069_v36, %v4371_v47  ;;  %v2145_v55 = vmax.f32 %v2066_v31, 0.0 }
 0x3da   : > { %v2146_v20 = vmax.f32 %v2068_v7, 0.0  ;;  %3290 = vmatpush3.bf16.msra.mxu0 %v3597_v63 }
 0x3db   : > { %v2147_v2 = vmax.f32 %v2070_v41, 0.0  ;;  %3291 = vmatprep.subr.bf16.mxu0 %v3598_v19 }
 0x3dc   : > { %v2182_v15 = vpack.c.bf16 %v2146_v20, %v2144_v10  ;;  %v3599_v10 = vld [vmem:[%s4904_s5 + $0x20] sm:$0xff]  }
 0x3dd   : > { %v2183_v17 = vpack.c.bf16 %v2147_v2, %v2145_v55  ;;  %v2073_v53 = vpop.f32.mrb[88].mxu1  ;;  %v3600_v2 = vld [vmem:[%s4904_s5 + $0x68] sm:$0xff]  }
 0x3de   : > { %v2074_v54 = vadd.f32 %v2073_v53, %v4367_v43  ;;  %v2075_v24 = vpop.f32.mrb[89].mxu1  ;;  %3292 = vmatpush3.bf16.msra.mxu0 %v3599_v10 }
 0x3df   : > { %v2076_v32 = vadd.f32 %v2075_v24, %v4371_v47  ;;  %v2077_v3 = vpop.f32.mrb[90].mxu1  ;;  %2350 = vmatprep.mubr.bf16.mxu0 %v2183_v17  ;;  %3293 = vmatprep.subr.bf16.mxu0 %v3600_v2 }
 0x3e0   : > { %v2078_v25 = vadd.f32 %v2077_v3, %v4367_v43  ;;  %v2079_v4 = vpop.f32.mrb[91].mxu1  ;;  %2351 = vmatmul.mubr.bf16.gmra.mrb[84].mxu0 %v2182_v15  ;;  %v2148_v22 = vmax.f32 %v2074_v54, 0.0 }
 0x3e1   : > { %v2080_v28 = vadd.f32 %v2079_v4, %v4371_v47  ;;  %v2149_v37 = vmax.f32 %v2076_v32, 0.0  ;;  %v3601_v32 = vld [vmem:[%s4904_s5 + $0x28] sm:$0xff]  }
 0x3e2   : > { %v2150_v30 = vmax.f32 %v2078_v25, 0.0  ;;  %v3602_v25 = vld [vmem:[%s4904_s5 + $0x70] sm:$0xff]   ;;  %3294 = vmatpush3.bf16.msra.mxu0 %v3601_v32 }
 0x3e3   : > { %v2151_v38 = vmax.f32 %v2080_v28, 0.0  ;;  %3295 = vmatprep.subr.bf16.mxu0 %v3602_v25 }
 0x3e4   : > { %v2184_v33 = vpack.c.bf16 %v2150_v30, %v2148_v22 }
 0x3e5   : > { %v2185_v34 = vpack.c.bf16 %v2151_v38, %v2149_v37  ;;  %v2083_v40 = vpop.f32.mrb[92].mxu1 }
 0x3e6   : > { %v2084_v42 = vadd.f32 %v2083_v40, %v4367_v43  ;;  %v2085_v9 = vpop.f32.mrb[93].mxu1 }
 0x3e7   : > { %v2086_v45 = vadd.f32 %v2085_v9, %v4371_v47  ;;  %v2087_v46 = vpop.f32.mrb[94].mxu1  ;;  %2360 = vmatprep.mubr.bf16.mxu0 %v2185_v34 }
 0x3e8   : > { %v2088_v21 = vadd.f32 %v2087_v46, %v4367_v43  ;;  %v2089_v35 = vpop.f32.mrb[95].mxu1  ;;  %2361 = vmatmul.mubr.bf16.gmra.mrb[88].mxu0 %v2184_v33  ;;  %v2152_v23 = vmax.f32 %v2084_v42, 0.0  ;;  %v3603_v33 = vld [vmem:[%s4904_s5 + $0x30] sm:$0xff]   ;;  %v3604_v42 = vld [vmem:[%s4904_s5 + $0x78] sm:$0xff]  }
 0x3e9   : > { %v2090_v48 = vadd.f32 %v2089_v35, %v4371_v47  ;;  %v2153_v39 = vmax.f32 %v2086_v45, 0.0  ;;  %3296 = vmatpush3.bf16.msra.mxu0 %v3603_v33 }
 0x3ea   : > { %v2154_v52 = vmax.f32 %v2088_v21, 0.0  ;;  %3297 = vmatprep.subr.bf16.mxu0 %v3604_v42 }
 0x3eb   : > { %v2155_v51 = vmax.f32 %v2090_v48, 0.0  ;;  %v3605_v48 = vld [vmem:[%s4904_s5 + $0x38] sm:$0xff]  }
 0x3ec   : > { %v2186_v62 = vpack.c.bf16 %v2154_v52, %v2152_v23 }
 0x3ed   : > { %v2187_v1 = vpack.c.bf16 %v2155_v51, %v2153_v39  ;;  %3298 = vmatpush3.bf16.msra.mxu0 %v3605_v48 }
 0x3ef   : > { %2370 = vmatprep.mubr.bf16.mxu0 %v2187_v1 }
 0x3f0   : > { %2371 = vmatmul.mubr.bf16.gmra.mrb[92].mxu0 %v2186_v62 }
 0x44b   : > { %v2222_v5 = vpop.f32.mrb[32].mxu0 }
 0x44c   : > { %v2223_v44 = vadd.f32 %v2222_v5, %v4367_v43  ;;  %v2224_v13 = vpop.f32.mrb[33].mxu0 }
 0x44d   : > { %v2225_v16 = vadd.f32 %v2224_v13, %v4371_v47  ;;  %v2226_v57 = vpop.f32.mrb[34].mxu0 }
 0x44e   : > { %v2227_v6 = vadd.f32 %v2226_v57, %v4367_v43  ;;  %v2228_v56 = vpop.f32.mrb[35].mxu0  ;;  %v2381_v14 = vmax.f32 %v2223_v44, 0.0 }
 0x44f   : > { %v2229_v59 = vadd.f32 %v2228_v56, %v4371_v47  ;;  %v2382_v29 = vmax.f32 %v2225_v16, 0.0 }
 0x450   : > { %v2383_v60 = vmax.f32 %v2227_v6, 0.0 }
 0x451   : > { %v2384_v61 = vmax.f32 %v2229_v59, 0.0 }
 0x452   : > { %v2445_v18 = vpack.c.bf16 %v2383_v60, %v2381_v14 }
 0x453   : > { %v2446_v8 = vpack.c.bf16 %v2384_v61, %v2382_v29  ;;  %v2232_v31 = vpop.f32.mrb[36].mxu0 }
 0x454   : > { %v2233_v0 = vadd.f32 %v2232_v31, %v4367_v43  ;;  %v2234_v7 = vpop.f32.mrb[37].mxu0 }
 0x455   : > { %v2235_v36 = vadd.f32 %v2234_v7, %v4371_v47  ;;  %v2236_v41 = vpop.f32.mrb[38].mxu0  ;;  %2509 = vmatprep.mubr.bf16.mxu1 %v2446_v8 }
 0x456   : > { %v2237_v20 = vadd.f32 %v2236_v41, %v4367_v43  ;;  %v2238_v55 = vpop.f32.mrb[39].mxu0  ;;  %2510 = vmatmul.mubr.bf16.vlgmr.msra.gmra.mrb[96].mxu1 %v2445_v18  ;;  %v2385_v17 = vmax.f32 %v2233_v0, 0.0 }
 0x457   : > { %v2239_v15 = vadd.f32 %v2238_v55, %v4371_v47  ;;  %v2386_v54 = vmax.f32 %v2235_v36, 0.0 }
 0x458   : > { %v2387_v53 = vmax.f32 %v2237_v20, 0.0 }
 0x459   : > { %v2388_v24 = vmax.f32 %v2239_v15, 0.0 }
 0x45a   : > { %v2447_v3 = vpack.c.bf16 %v2387_v53, %v2385_v17 }
 0x45b   : > { %v2448_v4 = vpack.c.bf16 %v2388_v24, %v2386_v54  ;;  %v2242_v28 = vpop.f32.mrb[40].mxu0 }
 0x45c   : > { %v2243_v22 = vadd.f32 %v2242_v28, %v4367_v43  ;;  %v2244_v30 = vpop.f32.mrb[41].mxu0 }
 0x45d   : > { %v2245_v37 = vadd.f32 %v2244_v30, %v4371_v47  ;;  %v2246_v38 = vpop.f32.mrb[42].mxu0  ;;  %2519 = vmatprep.mubr.bf16.mxu1 %v2448_v4 }
 0x45e   : > { %v2247_v34 = vadd.f32 %v2246_v38, %v4367_v43  ;;  %v2248_v40 = vpop.f32.mrb[43].mxu0  ;;  %2520 = vmatmul.mubr.bf16.gmra.mrb[100].mxu1 %v2447_v3  ;;  %v2389_v45 = vmax.f32 %v2243_v22, 0.0 }
 0x45f   : > { %v2249_v9 = vadd.f32 %v2248_v40, %v4371_v47  ;;  %v2390_v21 = vmax.f32 %v2245_v37, 0.0 }
 0x460   : > { %v2391_v46 = vmax.f32 %v2247_v34, 0.0 }
 0x461   : > { %v2392_v35 = vmax.f32 %v2249_v9, 0.0 }
 0x462   : > { %v2449_v23 = vpack.c.bf16 %v2391_v46, %v2389_v45 }
 0x463   : > { %v2450_v52 = vpack.c.bf16 %v2392_v35, %v2390_v21  ;;  %v2252_v39 = vpop.f32.mrb[44].mxu0 }
 0x464   : > { %v2253_v51 = vadd.f32 %v2252_v39, %v4367_v43  ;;  %v2254_v62 = vpop.f32.mrb[45].mxu0 }
 0x465   : > { %v2255_v1 = vadd.f32 %v2254_v62, %v4371_v47  ;;  %v2256_v27 = vpop.f32.mrb[46].mxu0  ;;  %2529 = vmatprep.mubr.bf16.mxu1 %v2450_v52 }
 0x466   : > { %v2257_v11 = vadd.f32 %v2256_v27, %v4367_v43  ;;  %v2258_v49 = vpop.f32.mrb[47].mxu0  ;;  %2530 = vmatmul.mubr.bf16.gmra.mrb[104].mxu1 %v2449_v23  ;;  %v2393_v5 = vmax.f32 %v2253_v51, 0.0 }
 0x467   : > { %v2259_v50 = vadd.f32 %v2258_v49, %v4371_v47  ;;  %v2394_v13 = vmax.f32 %v2255_v1, 0.0 }
 0x468   : > { %v2395_v44 = vmax.f32 %v2257_v11, 0.0 }
 0x469   : > { %v2396_v16 = vmax.f32 %v2259_v50, 0.0 }
 0x46a   : > { %v2451_v57 = vpack.c.bf16 %v2395_v44, %v2393_v5 }
 0x46b   : > { %v2452_v6 = vpack.c.bf16 %v2396_v16, %v2394_v13  ;;  %v2262_v56 = vpop.f32.mrb[48].mxu0 }
 0x46c   : > { %v2263_v58 = vadd.f32 %v2262_v56, %v4367_v43  ;;  %v2264_v12 = vpop.f32.mrb[49].mxu0 }
 0x46d   : > { %v2265_v26 = vadd.f32 %v2264_v12, %v4371_v47  ;;  %v2266_v59 = vpop.f32.mrb[50].mxu0  ;;  %2539 = vmatprep.mubr.bf16.mxu1 %v2452_v6 }
 0x46e   : > { %v2267_v14 = vadd.f32 %v2266_v59, %v4367_v43  ;;  %v2268_v60 = vpop.f32.mrb[51].mxu0  ;;  %2540 = vmatmul.mubr.bf16.gmra.mrb[108].mxu1 %v2451_v57  ;;  %v2397_v61 = vmax.f32 %v2263_v58, 0.0 }
 0x46f   : > { %v2269_v29 = vadd.f32 %v2268_v60, %v4371_v47  ;;  %v2398_v18 = vmax.f32 %v2265_v26, 0.0 }
 0x470   : > { %v2399_v63 = vmax.f32 %v2267_v14, 0.0 }
 0x471   : > { %v2400_v19 = vmax.f32 %v2269_v29, 0.0 }
 0x472   : > { %v2453_v8 = vpack.c.bf16 %v2399_v63, %v2397_v61 }
 0x473   : > { %v2454_v31 = vpack.c.bf16 %v2400_v19, %v2398_v18  ;;  %v2272_v0 = vpop.f32.mrb[52].mxu0 }
 0x474   : > { %v2273_v7 = vadd.f32 %v2272_v0, %v4367_v43  ;;  %v2274_v36 = vpop.f32.mrb[53].mxu0 }
 0x475   : > { %v2275_v41 = vadd.f32 %v2274_v36, %v4371_v47  ;;  %v2276_v10 = vpop.f32.mrb[54].mxu0  ;;  %2549 = vmatprep.mubr.bf16.mxu1 %v2454_v31 }
 0x476   : > { %v2277_v20 = vadd.f32 %v2276_v10, %v4367_v43  ;;  %v2278_v55 = vpop.f32.mrb[55].mxu0  ;;  %2550 = vmatmul.mubr.bf16.gmra.mrb[112].mxu1 %v2453_v8  ;;  %v2401_v15 = vmax.f32 %v2273_v7, 0.0 }
 0x477   : > { %v2279_v2 = vadd.f32 %v2278_v55, %v4371_v47  ;;  %v2402_v53 = vmax.f32 %v2275_v41, 0.0 }
 0x478   : > { %v2403_v17 = vmax.f32 %v2277_v20, 0.0 }
 0x479   : > { %v2404_v54 = vmax.f32 %v2279_v2, 0.0 }
 0x47a   : > { %v2455_v24 = vpack.c.bf16 %v2403_v17, %v2401_v15 }
 0x47b   : > { %v2456_v32 = vpack.c.bf16 %v2404_v54, %v2402_v53  ;;  %v2282_v3 = vpop.f32.mrb[56].mxu0 }
 0x47c   : > { %v2283_v25 = vadd.f32 %v2282_v3, %v4367_v43  ;;  %v2284_v4 = vpop.f32.mrb[57].mxu0 }
 0x47d   : > { %v2285_v28 = vadd.f32 %v2284_v4, %v4371_v47  ;;  %v2286_v22 = vpop.f32.mrb[58].mxu0  ;;  %2559 = vmatprep.mubr.bf16.mxu1 %v2456_v32 }
 0x47e   : > { %v2287_v30 = vadd.f32 %v2286_v22, %v4367_v43  ;;  %v2288_v37 = vpop.f32.mrb[59].mxu0  ;;  %2560 = vmatmul.mubr.bf16.gmra.mrb[116].mxu1 %v2455_v24  ;;  %v2405_v33 = vmax.f32 %v2283_v25, 0.0 }
 0x47f   : > { %v2289_v38 = vadd.f32 %v2288_v37, %v4371_v47  ;;  %v2406_v40 = vmax.f32 %v2285_v28, 0.0 }
 0x480   : > { %v2407_v34 = vmax.f32 %v2287_v30, 0.0 }
 0x481   : > { %v2408_v42 = vmax.f32 %v2289_v38, 0.0 }
 0x482   : > { %v2457_v9 = vpack.c.bf16 %v2407_v34, %v2405_v33 }
 0x483   : > { %v2458_v45 = vpack.c.bf16 %v2408_v42, %v2406_v40  ;;  %v2292_v46 = vpop.f32.mrb[60].mxu0 }
 0x484   : > { %v2293_v21 = vadd.f32 %v2292_v46, %v4367_v43  ;;  %v2294_v35 = vpop.f32.mrb[61].mxu0 }
 0x485   : > { %v2295_v48 = vadd.f32 %v2294_v35, %v4371_v47  ;;  %v2296_v23 = vpop.f32.mrb[62].mxu0  ;;  %2569 = vmatprep.mubr.bf16.mxu1 %v2458_v45 }
 0x486   : > { %v2297_v52 = vadd.f32 %v2296_v23, %v4367_v43  ;;  %v2298_v39 = vpop.f32.mrb[63].mxu0  ;;  %2570 = vmatmul.mubr.bf16.gmra.mrb[120].mxu1 %v2457_v9  ;;  %v2409_v62 = vmax.f32 %v2293_v21, 0.0 }
 0x487   : > { %v2299_v51 = vadd.f32 %v2298_v39, %v4371_v47  ;;  %v2410_v27 = vmax.f32 %v2295_v48, 0.0 }
 0x488   : > { %v2411_v1 = vmax.f32 %v2297_v52, 0.0 }
 0x489   : > { %v2412_v11 = vmax.f32 %v2299_v51, 0.0 }
 0x48a   : > { %v2459_v49 = vpack.c.bf16 %v2411_v1, %v2409_v62 }
 0x48b   : > { %v2460_v50 = vpack.c.bf16 %v2412_v11, %v2410_v27  ;;  %v2302_v5 = vpop.f32.mrb[64].mxu0 }
 0x48c   : > { %v2303_v44 = vadd.f32 %v2302_v5, %v4367_v43  ;;  %v2304_v13 = vpop.f32.mrb[65].mxu0 }
 0x48d   : > { %v2305_v16 = vadd.f32 %v2304_v13, %v4371_v47  ;;  %v2306_v57 = vpop.f32.mrb[66].mxu0  ;;  %2579 = vmatprep.mubr.bf16.mxu1 %v2460_v50 }
 0x48e   : > { %v2307_v6 = vadd.f32 %v2306_v57, %v4367_v43  ;;  %v2308_v56 = vpop.f32.mrb[67].mxu0  ;;  %2580 = vmatmul.mubr.bf16.gmra.mrb[124].mxu1 %v2459_v49  ;;  %v2413_v12 = vmax.f32 %v2303_v44, 0.0 }
 0x48f   : > { %v2309_v58 = vadd.f32 %v2308_v56, %v4371_v47  ;;  %v2414_v59 = vmax.f32 %v2305_v16, 0.0 }
 0x490   : > { %v2415_v26 = vmax.f32 %v2307_v6, 0.0 }
 0x491   : > { %v2416_v14 = vmax.f32 %v2309_v58, 0.0 }
 0x492   : > { %v2461_v60 = vpack.c.bf16 %v2415_v26, %v2413_v12 }
 0x493   : > { %v2462_v29 = vpack.c.bf16 %v2416_v14, %v2414_v59  ;;  %v2312_v61 = vpop.f32.mrb[68].mxu0 }
 0x494   : > { %v2313_v63 = vadd.f32 %v2312_v61, %v4367_v43  ;;  %v2314_v18 = vpop.f32.mrb[69].mxu0 }
 0x495   : > { %v2315_v19 = vadd.f32 %v2314_v18, %v4371_v47  ;;  %v2316_v8 = vpop.f32.mrb[70].mxu0  ;;  %2589 = vmatprep.mubr.bf16.mxu1 %v2462_v29 }
 0x496   : > { %v2317_v31 = vadd.f32 %v2316_v8, %v4367_v43  ;;  %v2318_v0 = vpop.f32.mrb[71].mxu0  ;;  %2590 = vmatmul.mubr.bf16.gmra.mrb[128].mxu1 %v2461_v60  ;;  %v2417_v36 = vmax.f32 %v2313_v63, 0.0 }
 0x497   : > { %v2319_v7 = vadd.f32 %v2318_v0, %v4371_v47  ;;  %v2418_v10 = vmax.f32 %v2315_v19, 0.0 }
 0x498   : > { %v2419_v41 = vmax.f32 %v2317_v31, 0.0 }
 0x499   : > { %v2420_v20 = vmax.f32 %v2319_v7, 0.0 }
 0x49a   : > { %v2463_v55 = vpack.c.bf16 %v2419_v41, %v2417_v36 }
 0x49b   : > { %v2464_v2 = vpack.c.bf16 %v2420_v20, %v2418_v10  ;;  %v2322_v15 = vpop.f32.mrb[72].mxu0 }
 0x49c   : > { %v2323_v17 = vadd.f32 %v2322_v15, %v4367_v43  ;;  %v2324_v53 = vpop.f32.mrb[73].mxu0 }
 0x49d   : > { %v2325_v54 = vadd.f32 %v2324_v53, %v4371_v47  ;;  %v2326_v24 = vpop.f32.mrb[74].mxu0  ;;  %2599 = vmatprep.mubr.bf16.mxu1 %v2464_v2 }
 0x49e   : > { %v2327_v32 = vadd.f32 %v2326_v24, %v4367_v43  ;;  %v2328_v3 = vpop.f32.mrb[75].mxu0  ;;  %2600 = vmatmul.mubr.bf16.gmra.mrb[132].mxu1 %v2463_v55  ;;  %v2421_v4 = vmax.f32 %v2323_v17, 0.0 }
 0x49f   : > { %v2329_v25 = vadd.f32 %v2328_v3, %v4371_v47  ;;  %v2422_v22 = vmax.f32 %v2325_v54, 0.0 }
 0x4a0   : > { %v2423_v28 = vmax.f32 %v2327_v32, 0.0 }
 0x4a1   : > { %v2424_v30 = vmax.f32 %v2329_v25, 0.0 }
 0x4a2   : > { %v2465_v37 = vpack.c.bf16 %v2423_v28, %v2421_v4 }
 0x4a3   : > { %v2466_v38 = vpack.c.bf16 %v2424_v30, %v2422_v22  ;;  %v2332_v33 = vpop.f32.mrb[76].mxu0 }
 0x4a4   : > { %v2333_v34 = vadd.f32 %v2332_v33, %v4367_v43  ;;  %v2334_v40 = vpop.f32.mrb[77].mxu0 }
 0x4a5   : > { %v2335_v42 = vadd.f32 %v2334_v40, %v4371_v47  ;;  %v2336_v9 = vpop.f32.mrb[78].mxu0  ;;  %2609 = vmatprep.mubr.bf16.mxu1 %v2466_v38 }
 0x4a6   : > { %v2337_v45 = vadd.f32 %v2336_v9, %v4367_v43  ;;  %v2338_v46 = vpop.f32.mrb[79].mxu0  ;;  %2610 = vmatmul.mubr.bf16.gmra.mrb[136].mxu1 %v2465_v37  ;;  %v2425_v35 = vmax.f32 %v2333_v34, 0.0 }
 0x4a7   : > { %v2339_v21 = vadd.f32 %v2338_v46, %v4371_v47  ;;  %v2426_v23 = vmax.f32 %v2335_v42, 0.0 }
 0x4a8   : > { %v2427_v48 = vmax.f32 %v2337_v45, 0.0 }
 0x4a9   : > { %v2428_v52 = vmax.f32 %v2339_v21, 0.0 }
 0x4aa   : > { %v2467_v39 = vpack.c.bf16 %v2427_v48, %v2425_v35 }
 0x4ab   : > { %v2468_v51 = vpack.c.bf16 %v2428_v52, %v2426_v23  ;;  %v2342_v62 = vpop.f32.mrb[80].mxu0 }
 0x4ac   : > { %v2343_v1 = vadd.f32 %v2342_v62, %v4367_v43  ;;  %v2344_v27 = vpop.f32.mrb[81].mxu0 }
 0x4ad   : > { %v2345_v11 = vadd.f32 %v2344_v27, %v4371_v47  ;;  %v2346_v49 = vpop.f32.mrb[82].mxu0  ;;  %2619 = vmatprep.mubr.bf16.mxu1 %v2468_v51 }
 0x4ae   : > { %v2347_v50 = vadd.f32 %v2346_v49, %v4367_v43  ;;  %v2348_v5 = vpop.f32.mrb[83].mxu0  ;;  %2620 = vmatmul.mubr.bf16.gmra.mrb[140].mxu1 %v2467_v39  ;;  %v2429_v13 = vmax.f32 %v2343_v1, 0.0 }
 0x4af   : > { %v2349_v44 = vadd.f32 %v2348_v5, %v4371_v47  ;;  %v2430_v57 = vmax.f32 %v2345_v11, 0.0 }
 0x4b0   : > { %v2431_v16 = vmax.f32 %v2347_v50, 0.0 }
 0x4b1   : > { %v2432_v6 = vmax.f32 %v2349_v44, 0.0 }
 0x4b2   : > { %v2469_v56 = vpack.c.bf16 %v2431_v16, %v2429_v13 }
 0x4b3   : > { %v2470_v58 = vpack.c.bf16 %v2432_v6, %v2430_v57  ;;  %v2352_v12 = vpop.f32.mrb[84].mxu0 }
 0x4b4   : > { %v2353_v26 = vadd.f32 %v2352_v12, %v4367_v43  ;;  %v2354_v59 = vpop.f32.mrb[85].mxu0 }
 0x4b5   : > { %v2355_v14 = vadd.f32 %v2354_v59, %v4371_v47  ;;  %v2356_v60 = vpop.f32.mrb[86].mxu0  ;;  %2629 = vmatprep.mubr.bf16.mxu1 %v2470_v58 }
 0x4b6   : > { %v2357_v29 = vadd.f32 %v2356_v60, %v4367_v43  ;;  %v2358_v61 = vpop.f32.mrb[87].mxu0  ;;  %2630 = vmatmul.mubr.bf16.gmra.mrb[144].mxu1 %v2469_v56  ;;  %v2433_v18 = vmax.f32 %v2353_v26, 0.0 }
 0x4b7   : > { %v2359_v63 = vadd.f32 %v2358_v61, %v4371_v47  ;;  %v2434_v8 = vmax.f32 %v2355_v14, 0.0 }
 0x4b8   : > { %v2435_v19 = vmax.f32 %v2357_v29, 0.0 }
 0x4b9   : > { %v2436_v31 = vmax.f32 %v2359_v63, 0.0 }
 0x4ba   : > { %v2471_v0 = vpack.c.bf16 %v2435_v19, %v2433_v18 }
 0x4bb   : > { %v2472_v7 = vpack.c.bf16 %v2436_v31, %v2434_v8  ;;  %v2362_v36 = vpop.f32.mrb[88].mxu0 }
 0x4bc   : > { %v2363_v41 = vadd.f32 %v2362_v36, %v4367_v43  ;;  %v2364_v10 = vpop.f32.mrb[89].mxu0 }
 0x4bd   : > { %v2365_v20 = vadd.f32 %v2364_v10, %v4371_v47  ;;  %v2366_v55 = vpop.f32.mrb[90].mxu0  ;;  %2639 = vmatprep.mubr.bf16.mxu1 %v2472_v7 }
 0x4be   : > { %v2367_v2 = vadd.f32 %v2366_v55, %v4367_v43  ;;  %v2368_v15 = vpop.f32.mrb[91].mxu0  ;;  %2640 = vmatmul.mubr.bf16.gmra.mrb[148].mxu1 %v2471_v0  ;;  %v2437_v53 = vmax.f32 %v2363_v41, 0.0 }
 0x4bf   : > { %v2369_v17 = vadd.f32 %v2368_v15, %v4371_v47  ;;  %v2438_v24 = vmax.f32 %v2365_v20, 0.0 }
 0x4c0   : > { %v2439_v54 = vmax.f32 %v2367_v2, 0.0 }
 0x4c1   : > { %v2440_v32 = vmax.f32 %v2369_v17, 0.0 }
 0x4c2   : > { %v2473_v3 = vpack.c.bf16 %v2439_v54, %v2437_v53 }
 0x4c3   : > { %v2474_v25 = vpack.c.bf16 %v2440_v32, %v2438_v24  ;;  %v2372_v4 = vpop.f32.mrb[92].mxu0 }
 0x4c4   : > { %v2373_v28 = vadd.f32 %v2372_v4, %v4367_v43  ;;  %v2374_v22 = vpop.f32.mrb[93].mxu0 }
 0x4c5   : > { %v2375_v30 = vadd.f32 %v2374_v22, %v4371_v47  ;;  %v2376_v37 = vpop.f32.mrb[94].mxu0  ;;  %2649 = vmatprep.mubr.bf16.mxu1 %v2474_v25 }
 0x4c6   : > { %v2377_v38 = vadd.f32 %v2376_v37, %v4367_v43  ;;  %v2378_v33 = vpop.f32.mrb[95].mxu0  ;;  %2650 = vmatmul.mubr.bf16.gmra.mrb[152].mxu1 %v2473_v3  ;;  %v2441_v40 = vmax.f32 %v2373_v28, 0.0 }
 0x4c7   : > { %v2379_v34 = vadd.f32 %v2378_v33, %v4371_v47  ;;  %v2442_v9 = vmax.f32 %v2375_v30, 0.0 }
 0x4c8   : > { %v2443_v42 = vmax.f32 %v2377_v38, 0.0 }
 0x4c9   : > { %v2444_v45 = vmax.f32 %v2379_v34, 0.0 }
 0x4ca   : > { %v2475_v46 = vpack.c.bf16 %v2443_v42, %v2441_v40 }
 0x4cb   : > { %v2476_v21 = vpack.c.bf16 %v2444_v45, %v2442_v9 }
 0x4cd   : > { %2659 = vmatprep.mubr.bf16.mxu1 %v2476_v21 }
 0x4ce   : > { %2660 = vmatmul.mubr.bf16.gmra.mrb[156].mxu1 %v2475_v46 }
 0x529   : > { %v2511_v35 = vpop.f32.mrb[96].mxu1 }
 0x52a   : > { %v2512_v48 = vadd.f32 %v2511_v35, %v4367_v43  ;;  %v2513_v23 = vpop.f32.mrb[97].mxu1 }
 0x52b   : > { %v2514_v52 = vadd.f32 %v2513_v23, %v4371_v47  ;;  %v2515_v39 = vpop.f32.mrb[98].mxu1 }
 0x52c   : > { %v2516_v51 = vadd.f32 %v2515_v39, %v4367_v43  ;;  %v2517_v62 = vpop.f32.mrb[99].mxu1  ;;  %v2670_v27 = vmax.f32 %v2512_v48, 0.0 }
 0x52d   : > { %v2518_v1 = vadd.f32 %v2517_v62, %v4371_v47  ;;  %v2671_v49 = vmax.f32 %v2514_v52, 0.0 }
 0x52e   : > { %v2672_v11 = vmax.f32 %v2516_v51, 0.0 }
 0x52f   : > { %v2673_v50 = vmax.f32 %v2518_v1, 0.0 }
 0x530   : > { %v2734_v5 = vpack.c.bf16 %v2672_v11, %v2670_v27 }
 0x531   : > { %v2735_v44 = vpack.c.bf16 %v2673_v50, %v2671_v49  ;;  %v2521_v13 = vpop.f32.mrb[100].mxu1 }
 0x532   : > { %v2522_v16 = vadd.f32 %v2521_v13, %v4367_v43  ;;  %v2523_v57 = vpop.f32.mrb[101].mxu1 }
 0x533   : > { %v2524_v6 = vadd.f32 %v2523_v57, %v4371_v47  ;;  %v2525_v56 = vpop.f32.mrb[102].mxu1  ;;  %2933 = vmatprep.mubr.bf16.mxu0 %v2735_v44 }
 0x534   : > { %v2526_v58 = vadd.f32 %v2525_v56, %v4367_v43  ;;  %v2527_v12 = vpop.f32.mrb[103].mxu1  ;;  %2934 = vmatmul.mubr.bf16.vlgmr.msra.gmra.mrb[96].mxu0 %v2734_v5  ;;  %v2674_v59 = vmax.f32 %v2522_v16, 0.0 }
 0x535   : > { %v2528_v26 = vadd.f32 %v2527_v12, %v4371_v47  ;;  %v2675_v60 = vmax.f32 %v2524_v6, 0.0 }
 0x536   : > { %v2676_v14 = vmax.f32 %v2526_v58, 0.0 }
 0x537   : > { %v2677_v29 = vmax.f32 %v2528_v26, 0.0 }
 0x538   : > { %v2736_v61 = vpack.c.bf16 %v2676_v14, %v2674_v59 }
 0x539   : > { %v2737_v63 = vpack.c.bf16 %v2677_v29, %v2675_v60  ;;  %v2531_v18 = vpop.f32.mrb[104].mxu1 }
 0x53a   : > { %v2532_v19 = vadd.f32 %v2531_v18, %v4367_v43  ;;  %v2533_v8 = vpop.f32.mrb[105].mxu1 }
 0x53b   : > { %v2534_v31 = vadd.f32 %v2533_v8, %v4371_v47  ;;  %v2535_v0 = vpop.f32.mrb[106].mxu1  ;;  %2941 = vmatprep.mubr.bf16.mxu0 %v2737_v63 }
 0x53c   : > { %v2536_v7 = vadd.f32 %v2535_v0, %v4367_v43  ;;  %v2537_v36 = vpop.f32.mrb[107].mxu1  ;;  %2942 = vmatmul.mubr.bf16.gmra.mrb[100].mxu0 %v2736_v61  ;;  %v2678_v10 = vmax.f32 %v2532_v19, 0.0 }
 0x53d   : > { %v2538_v41 = vadd.f32 %v2537_v36, %v4371_v47  ;;  %v2679_v55 = vmax.f32 %v2534_v31, 0.0 }
 0x53e   : > { %v2680_v20 = vmax.f32 %v2536_v7, 0.0 }
 0x53f   : > { %v2681_v2 = vmax.f32 %v2538_v41, 0.0 }
 0x540   : > { %v2738_v15 = vpack.c.bf16 %v2680_v20, %v2678_v10 }
 0x541   : > { %v2739_v17 = vpack.c.bf16 %v2681_v2, %v2679_v55  ;;  %v2541_v53 = vpop.f32.mrb[108].mxu1 }
 0x542   : > { %v2542_v54 = vadd.f32 %v2541_v53, %v4367_v43  ;;  %v2543_v24 = vpop.f32.mrb[109].mxu1 }
 0x543   : > { %v2544_v32 = vadd.f32 %v2543_v24, %v4371_v47  ;;  %v2545_v3 = vpop.f32.mrb[110].mxu1  ;;  %2949 = vmatprep.mubr.bf16.mxu0 %v2739_v17 }
 0x544   : > { %v2546_v25 = vadd.f32 %v2545_v3, %v4367_v43  ;;  %v2547_v4 = vpop.f32.mrb[111].mxu1  ;;  %2950 = vmatmul.mubr.bf16.gmra.mrb[104].mxu0 %v2738_v15  ;;  %v2682_v22 = vmax.f32 %v2542_v54, 0.0 }
 0x545   : > { %v2548_v28 = vadd.f32 %v2547_v4, %v4371_v47  ;;  %v2683_v37 = vmax.f32 %v2544_v32, 0.0 }
 0x546   : > { %v2684_v30 = vmax.f32 %v2546_v25, 0.0 }
 0x547   : > { %v2685_v38 = vmax.f32 %v2548_v28, 0.0 }
 0x548   : > { %v2740_v33 = vpack.c.bf16 %v2684_v30, %v2682_v22 }
 0x549   : > { %v2741_v34 = vpack.c.bf16 %v2685_v38, %v2683_v37  ;;  %v2551_v40 = vpop.f32.mrb[112].mxu1 }
 0x54a   : > { %v2552_v42 = vadd.f32 %v2551_v40, %v4367_v43  ;;  %v2553_v9 = vpop.f32.mrb[113].mxu1 }
 0x54b   : > { %v2554_v45 = vadd.f32 %v2553_v9, %v4371_v47  ;;  %v2555_v46 = vpop.f32.mrb[114].mxu1  ;;  %2957 = vmatprep.mubr.bf16.mxu0 %v2741_v34 }
 0x54c   : > { %v2556_v21 = vadd.f32 %v2555_v46, %v4367_v43  ;;  %v2557_v35 = vpop.f32.mrb[115].mxu1  ;;  %2958 = vmatmul.mubr.bf16.gmra.mrb[108].mxu0 %v2740_v33  ;;  %v2686_v23 = vmax.f32 %v2552_v42, 0.0 }
 0x54d   : > { %v2558_v48 = vadd.f32 %v2557_v35, %v4371_v47  ;;  %v2687_v39 = vmax.f32 %v2554_v45, 0.0 }
 0x54e   : > { %v2688_v52 = vmax.f32 %v2556_v21, 0.0 }
 0x54f   : > { %v2689_v51 = vmax.f32 %v2558_v48, 0.0 }
 0x550   : > { %v2742_v62 = vpack.c.bf16 %v2688_v52, %v2686_v23 }
 0x551   : > { %v2743_v1 = vpack.c.bf16 %v2689_v51, %v2687_v39  ;;  %v2561_v27 = vpop.f32.mrb[116].mxu1 }
 0x552   : > { %v2562_v11 = vadd.f32 %v2561_v27, %v4367_v43  ;;  %v2563_v49 = vpop.f32.mrb[117].mxu1 }
 0x553   : > { %v2564_v50 = vadd.f32 %v2563_v49, %v4371_v47  ;;  %v2565_v5 = vpop.f32.mrb[118].mxu1  ;;  %2965 = vmatprep.mubr.bf16.mxu0 %v2743_v1 }
 0x554   : > { %v2566_v44 = vadd.f32 %v2565_v5, %v4367_v43  ;;  %v2567_v13 = vpop.f32.mrb[119].mxu1  ;;  %2966 = vmatmul.mubr.bf16.gmra.mrb[112].mxu0 %v2742_v62  ;;  %v2690_v57 = vmax.f32 %v2562_v11, 0.0 }
 0x555   : > { %v2568_v16 = vadd.f32 %v2567_v13, %v4371_v47  ;;  %v2691_v56 = vmax.f32 %v2564_v50, 0.0 }
 0x556   : > { %v2692_v6 = vmax.f32 %v2566_v44, 0.0 }
 0x557   : > { %v2693_v58 = vmax.f32 %v2568_v16, 0.0 }
 0x558   : > { %v2744_v12 = vpack.c.bf16 %v2692_v6, %v2690_v57 }
 0x559   : > { %v2745_v26 = vpack.c.bf16 %v2693_v58, %v2691_v56  ;;  %v2571_v59 = vpop.f32.mrb[120].mxu1 }
 0x55a   : > { %v2572_v14 = vadd.f32 %v2571_v59, %v4367_v43  ;;  %v2573_v60 = vpop.f32.mrb[121].mxu1 }
 0x55b   : > { %v2574_v29 = vadd.f32 %v2573_v60, %v4371_v47  ;;  %v2575_v61 = vpop.f32.mrb[122].mxu1  ;;  %2973 = vmatprep.mubr.bf16.mxu0 %v2745_v26 }
 0x55c   : > { %v2576_v63 = vadd.f32 %v2575_v61, %v4367_v43  ;;  %v2577_v18 = vpop.f32.mrb[123].mxu1  ;;  %2974 = vmatmul.mubr.bf16.gmra.mrb[116].mxu0 %v2744_v12  ;;  %v2694_v8 = vmax.f32 %v2572_v14, 0.0 }
 0x55d   : > { %v2578_v19 = vadd.f32 %v2577_v18, %v4371_v47  ;;  %v2695_v0 = vmax.f32 %v2574_v29, 0.0 }
 0x55e   : > { %v2696_v31 = vmax.f32 %v2576_v63, 0.0 }
 0x55f   : > { %v2697_v7 = vmax.f32 %v2578_v19, 0.0 }
 0x560   : > { %v2746_v36 = vpack.c.bf16 %v2696_v31, %v2694_v8 }
 0x561   : > { %v2747_v41 = vpack.c.bf16 %v2697_v7, %v2695_v0  ;;  %v2581_v10 = vpop.f32.mrb[124].mxu1 }
 0x562   : > { %v2582_v20 = vadd.f32 %v2581_v10, %v4367_v43  ;;  %v2583_v55 = vpop.f32.mrb[125].mxu1 }
 0x563   : > { %v2584_v2 = vadd.f32 %v2583_v55, %v4371_v47  ;;  %v2585_v15 = vpop.f32.mrb[126].mxu1  ;;  %2981 = vmatprep.mubr.bf16.mxu0 %v2747_v41 }
 0x564   : > { %v2586_v17 = vadd.f32 %v2585_v15, %v4367_v43  ;;  %v2587_v53 = vpop.f32.mrb[127].mxu1  ;;  %2982 = vmatmul.mubr.bf16.gmra.mrb[120].mxu0 %v2746_v36  ;;  %v2698_v24 = vmax.f32 %v2582_v20, 0.0 }
 0x565   : > { %v2588_v54 = vadd.f32 %v2587_v53, %v4371_v47  ;;  %v2699_v3 = vmax.f32 %v2584_v2, 0.0 }
 0x566   : > { %v2700_v32 = vmax.f32 %v2586_v17, 0.0 }
 0x567   : > { %v2701_v25 = vmax.f32 %v2588_v54, 0.0 }
 0x568   : > { %v2748_v4 = vpack.c.bf16 %v2700_v32, %v2698_v24 }
 0x569   : > { %v2749_v28 = vpack.c.bf16 %v2701_v25, %v2699_v3  ;;  %v2591_v22 = vpop.f32.mrb[128].mxu1 }
 0x56a   : > { %v2592_v30 = vadd.f32 %v2591_v22, %v4367_v43  ;;  %v2593_v37 = vpop.f32.mrb[129].mxu1 }
 0x56b   : > { %v2594_v38 = vadd.f32 %v2593_v37, %v4371_v47  ;;  %v2595_v33 = vpop.f32.mrb[130].mxu1  ;;  %2989 = vmatprep.mubr.bf16.mxu0 %v2749_v28 }
 0x56c   : > { %v2596_v34 = vadd.f32 %v2595_v33, %v4367_v43  ;;  %v2597_v40 = vpop.f32.mrb[131].mxu1  ;;  %2990 = vmatmul.mubr.bf16.gmra.mrb[124].mxu0 %v2748_v4  ;;  %v2702_v9 = vmax.f32 %v2592_v30, 0.0 }
 0x56d   : > { %v2598_v42 = vadd.f32 %v2597_v40, %v4371_v47  ;;  %v2703_v46 = vmax.f32 %v2594_v38, 0.0 }
 0x56e   : > { %v2704_v45 = vmax.f32 %v2596_v34, 0.0 }
 0x56f   : > { %v2705_v21 = vmax.f32 %v2598_v42, 0.0 }
 0x570   : > { %v2750_v35 = vpack.c.bf16 %v2704_v45, %v2702_v9 }
 0x571   : > { %v2751_v48 = vpack.c.bf16 %v2705_v21, %v2703_v46  ;;  %v2601_v23 = vpop.f32.mrb[132].mxu1 }
 0x572   : > { %v2602_v52 = vadd.f32 %v2601_v23, %v4367_v43  ;;  %v2603_v39 = vpop.f32.mrb[133].mxu1 }
 0x573   : > { %v2604_v51 = vadd.f32 %v2603_v39, %v4371_v47  ;;  %v2605_v62 = vpop.f32.mrb[134].mxu1  ;;  %2997 = vmatprep.mubr.bf16.mxu0 %v2751_v48 }
 0x574   : > { %v2606_v1 = vadd.f32 %v2605_v62, %v4367_v43  ;;  %v2607_v27 = vpop.f32.mrb[135].mxu1  ;;  %2998 = vmatmul.mubr.bf16.gmra.mrb[128].mxu0 %v2750_v35  ;;  %v2706_v49 = vmax.f32 %v2602_v52, 0.0 }
 0x575   : > { %v2608_v11 = vadd.f32 %v2607_v27, %v4371_v47  ;;  %v2707_v5 = vmax.f32 %v2604_v51, 0.0 }
 0x576   : > { %v2708_v50 = vmax.f32 %v2606_v1, 0.0 }
 0x577   : > { %v2709_v44 = vmax.f32 %v2608_v11, 0.0 }
 0x578   : > { %v2752_v13 = vpack.c.bf16 %v2708_v50, %v2706_v49 }
 0x579   : > { %v2753_v16 = vpack.c.bf16 %v2709_v44, %v2707_v5  ;;  %v2611_v57 = vpop.f32.mrb[136].mxu1 }
 0x57a   : > { %v2612_v6 = vadd.f32 %v2611_v57, %v4367_v43  ;;  %v2613_v56 = vpop.f32.mrb[137].mxu1 }
 0x57b   : > { %v2614_v58 = vadd.f32 %v2613_v56, %v4371_v47  ;;  %v2615_v12 = vpop.f32.mrb[138].mxu1  ;;  %3005 = vmatprep.mubr.bf16.mxu0 %v2753_v16 }
 0x57c   : > { %v2616_v26 = vadd.f32 %v2615_v12, %v4367_v43  ;;  %v2617_v59 = vpop.f32.mrb[139].mxu1  ;;  %3006 = vmatmul.mubr.bf16.gmra.mrb[132].mxu0 %v2752_v13  ;;  %v2710_v60 = vmax.f32 %v2612_v6, 0.0 }
 0x57d   : > { %v2618_v14 = vadd.f32 %v2617_v59, %v4371_v47  ;;  %v2711_v61 = vmax.f32 %v2614_v58, 0.0 }
 0x57e   : > { %v2712_v29 = vmax.f32 %v2616_v26, 0.0 }
 0x57f   : > { %v2713_v63 = vmax.f32 %v2618_v14, 0.0 }
 0x580   : > { %v2754_v18 = vpack.c.bf16 %v2712_v29, %v2710_v60 }
 0x581   : > { %v2755_v19 = vpack.c.bf16 %v2713_v63, %v2711_v61  ;;  %v2621_v8 = vpop.f32.mrb[140].mxu1 }
 0x582   : > { %v2622_v31 = vadd.f32 %v2621_v8, %v4367_v43  ;;  %v2623_v0 = vpop.f32.mrb[141].mxu1 }
 0x583   : > { %v2624_v7 = vadd.f32 %v2623_v0, %v4371_v47  ;;  %v2625_v36 = vpop.f32.mrb[142].mxu1  ;;  %3013 = vmatprep.mubr.bf16.mxu0 %v2755_v19 }
 0x584   : > { %v2626_v41 = vadd.f32 %v2625_v36, %v4367_v43  ;;  %v2627_v10 = vpop.f32.mrb[143].mxu1  ;;  %3014 = vmatmul.mubr.bf16.gmra.mrb[136].mxu0 %v2754_v18  ;;  %v2714_v55 = vmax.f32 %v2622_v31, 0.0 }
 0x585   : > { %v2628_v20 = vadd.f32 %v2627_v10, %v4371_v47  ;;  %v2715_v15 = vmax.f32 %v2624_v7, 0.0 }
 0x586   : > { %v2716_v2 = vmax.f32 %v2626_v41, 0.0 }
 0x587   : > { %v2717_v17 = vmax.f32 %v2628_v20, 0.0 }
 0x588   : > { %v2756_v53 = vpack.c.bf16 %v2716_v2, %v2714_v55  ;;  %v4812_v2 = vld [vmem:[%s4905_s6] ss:$0 sm:$0xff] }
 0x589   : > { %v2757_v54 = vpack.c.bf16 %v2717_v17, %v2715_v15  ;;  %v2631_v24 = vpop.f32.mrb[144].mxu1 }
 0x58a   : > { %v2632_v32 = vadd.f32 %v2631_v24, %v4367_v43  ;;  %v2633_v3 = vpop.f32.mrb[145].mxu1 }
 0x58b   : > { %v2634_v25 = vadd.f32 %v2633_v3, %v4371_v47  ;;  %v2635_v4 = vpop.f32.mrb[146].mxu1  ;;  %3021 = vmatprep.mubr.bf16.mxu0 %v2757_v54 }
 0x58c   : > { %v2636_v28 = vadd.f32 %v2635_v4, %v4367_v43  ;;  %v2637_v22 = vpop.f32.mrb[147].mxu1  ;;  %3022 = vmatmul.mubr.bf16.gmra.mrb[140].mxu0 %v2756_v53  ;;  %v2718_v37 = vmax.f32 %v2632_v32, 0.0 }
 0x58d   : > { %v2638_v30 = vadd.f32 %v2637_v22, %v4371_v47  ;;  %v2719_v33 = vmax.f32 %v2634_v25, 0.0 }
 0x58e   : > { %v2720_v38 = vmax.f32 %v2636_v28, 0.0 }
 0x58f   : > { %v2721_v34 = vmax.f32 %v2638_v30, 0.0 }
 0x590   : > { %v2758_v40 = vpack.c.bf16 %v2720_v38, %v2718_v37 }
 0x591   : > { %v2759_v42 = vpack.c.bf16 %v2721_v34, %v2719_v33  ;;  %v2641_v9 = vpop.f32.mrb[148].mxu1 }
 0x592   : > { %v2642_v45 = vadd.f32 %v2641_v9, %v4367_v43  ;;  %v2643_v46 = vpop.f32.mrb[149].mxu1 }
 0x593   : > { %v2644_v21 = vadd.f32 %v2643_v46, %v4371_v47  ;;  %v2645_v35 = vpop.f32.mrb[150].mxu1  ;;  %3029 = vmatprep.mubr.bf16.mxu0 %v2759_v42 }
 0x594   : > { %v2646_v48 = vadd.f32 %v2645_v35, %v4367_v43  ;;  %v2647_v23 = vpop.f32.mrb[151].mxu1  ;;  %3030 = vmatmul.mubr.bf16.gmra.mrb[144].mxu0 %v2758_v40  ;;  %v2722_v39 = vmax.f32 %v2642_v45, 0.0 }
 0x595   : > { %v2648_v52 = vadd.f32 %v2647_v23, %v4371_v47  ;;  %v2723_v62 = vmax.f32 %v2644_v21, 0.0 }
 0x596   : > { %v2724_v51 = vmax.f32 %v2646_v48, 0.0 }
 0x597   : > { %v2725_v1 = vmax.f32 %v2648_v52, 0.0 }
 0x598   : > { %v2760_v27 = vpack.c.bf16 %v2724_v51, %v2722_v39 }
 0x599   : > { %v2761_v11 = vpack.c.bf16 %v2725_v1, %v2723_v62  ;;  %v2651_v49 = vpop.f32.mrb[152].mxu1 }
 0x59a   : > { %v2652_v50 = vadd.f32 %v2651_v49, %v4367_v43  ;;  %v2653_v5 = vpop.f32.mrb[153].mxu1 }
 0x59b   : > { %v2654_v44 = vadd.f32 %v2653_v5, %v4371_v47  ;;  %v2655_v13 = vpop.f32.mrb[154].mxu1  ;;  %3037 = vmatprep.mubr.bf16.mxu0 %v2761_v11 }
 0x59c   : > { %v2656_v16 = vadd.f32 %v2655_v13, %v4367_v43  ;;  %v2657_v57 = vpop.f32.mrb[155].mxu1  ;;  %3038 = vmatmul.mubr.bf16.gmra.mrb[148].mxu0 %v2760_v27  ;;  %v2726_v56 = vmax.f32 %v2652_v50, 0.0 }
 0x59d   : > { %v2658_v6 = vadd.f32 %v2657_v57, %v4371_v47  ;;  %v2727_v12 = vmax.f32 %v2654_v44, 0.0 }
 0x59e   : > { %v2728_v58 = vmax.f32 %v2656_v16, 0.0 }
 0x59f   : > { %v2729_v26 = vmax.f32 %v2658_v6, 0.0 }
 0x5a0   : > { %v2762_v59 = vpack.c.bf16 %v2728_v58, %v2726_v56 }
 0x5a1   : > { %v2763_v14 = vpack.c.bf16 %v2729_v26, %v2727_v12  ;;  %v2661_v60 = vpop.f32.mrb[156].mxu1 }
 0x5a2   : > { %v2662_v29 = vadd.f32 %v2661_v60, %v4367_v43  ;;  %v2663_v61 = vpop.f32.mrb[157].mxu1 }
 0x5a3   : > { %v2664_v63 = vadd.f32 %v2663_v61, %v4371_v47  ;;  %v2665_v18 = vpop.f32.mrb[158].mxu1  ;;  %3045 = vmatprep.mubr.bf16.mxu0 %v2763_v14 }
 0x5a4   : > { %v2666_v19 = vadd.f32 %v2665_v18, %v4367_v43  ;;  %v2667_v8 = vpop.f32.mrb[159].mxu1  ;;  %3046 = vmatmul.mubr.bf16.gmra.mrb[152].mxu0 %v2762_v59  ;;  %v2730_v0 = vmax.f32 %v2662_v29, 0.0 }
 0x5a5   : > { %v2668_v31 = vadd.f32 %v2667_v8, %v4371_v47  ;;  %v2731_v36 = vmax.f32 %v2664_v63, 0.0 }
 0x5a6   : > { %v2732_v7 = vmax.f32 %v2666_v19, 0.0 }
 0x5a7   : > { %v2733_v41 = vmax.f32 %v2668_v31, 0.0 }
 0x5a8   : > { %v2764_v10 = vpack.c.bf16 %v2732_v7, %v2730_v0 }
 0x5a9   : > { %v2765_v20 = vpack.c.bf16 %v2733_v41, %v2731_v36 }
 0x5ab   : > { %3053 = vmatprep.mubr.bf16.mxu0 %v2765_v20 }
 0x5ac   : > { %3054 = vmatmul.mubr.bf16.gmra.mrb[156].mxu0 %v2764_v10 }
 0x607   : > { %v3299_v55 = vpop.f32.mrb[96].mxu0 }
 0x608   : > { %v3300_v43 = vpop.f32.mrb[97].mxu0 }
 0x609   : > { %v3301_v15 = vadd.f32 %v3300_v43, %v3299_v55  ;;  %v3302_v47 = vpop.f32.mrb[98].mxu0 }
 0x60a   : > { %v3303_v17 = vpop.f32.mrb[99].mxu0 }
 0x60b   : > { %v2936_v53 = vadd.f32 %v3301_v15, %v4812_v2  ;;  %v3304_v54 = vadd.f32 %v3303_v17, %v3302_v47 }
 0x60d   : > { %3062 = vst [vmem:[%s3876_s22] sm:$0xff] %v2936_v53  ;;  %v2939_v24 = vadd.f32 %v3304_v54, %v4812_v2 }
 0x60f   : > { %3063 = vst [vmem:[%s3876_s22 + $0x8] sm:$0xff] %v2939_v24  ;;  %v3305_v32 = vpop.f32.mrb[100].mxu0 }
 0x610   : > { %v3306_v3 = vpop.f32.mrb[101].mxu0 }
 0x611   : > { %v3307_v25 = vadd.f32 %v3306_v3, %v3305_v32  ;;  %v3308_v4 = vpop.f32.mrb[102].mxu0 }
 0x612   : > { %v3309_v28 = vpop.f32.mrb[103].mxu0 }
 0x613   : > { %v2944_v22 = vadd.f32 %v3307_v25, %v4812_v2  ;;  %v3310_v30 = vadd.f32 %v3309_v28, %v3308_v4 }
 0x615   : > { %3064 = vst [vmem:[%s3876_s22 + $0x10] sm:$0xff] %v2944_v22  ;;  %v2947_v37 = vadd.f32 %v3310_v30, %v4812_v2 }
 0x617   : > { %3065 = vst [vmem:[%s3876_s22 + $0x18] sm:$0xff] %v2947_v37  ;;  %v3311_v38 = vpop.f32.mrb[104].mxu0 }
 0x618   : > { %v3312_v33 = vpop.f32.mrb[105].mxu0 }
 0x619   : > { %v3313_v34 = vadd.f32 %v3312_v33, %v3311_v38  ;;  %v3314_v40 = vpop.f32.mrb[106].mxu0 }
 0x61a   : > { %v3315_v42 = vpop.f32.mrb[107].mxu0 }
 0x61b   : > { %v2952_v9 = vadd.f32 %v3313_v34, %v4812_v2  ;;  %v3316_v45 = vadd.f32 %v3315_v42, %v3314_v40 }
 0x61d   : > { %3066 = vst [vmem:[%s3876_s22 + $0x20] sm:$0xff] %v2952_v9  ;;  %v2955_v46 = vadd.f32 %v3316_v45, %v4812_v2 }
 0x61f   : > { %3067 = vst [vmem:[%s3876_s22 + $0x28] sm:$0xff] %v2955_v46  ;;  %v3317_v21 = vpop.f32.mrb[108].mxu0 }
 0x620   : > { %v3318_v35 = vpop.f32.mrb[109].mxu0 }
 0x621   : > { %v3319_v48 = vadd.f32 %v3318_v35, %v3317_v21  ;;  %v3320_v23 = vpop.f32.mrb[110].mxu0 }
 0x622   : > { %v3321_v52 = vpop.f32.mrb[111].mxu0 }
 0x623   : > { %v2960_v39 = vadd.f32 %v3319_v48, %v4812_v2  ;;  %v3322_v51 = vadd.f32 %v3321_v52, %v3320_v23 }
 0x625   : > { %3068 = vst [vmem:[%s3876_s22 + $0x30] sm:$0xff] %v2960_v39  ;;  %v2963_v62 = vadd.f32 %v3322_v51, %v4812_v2 }
 0x627   : > { %3069 = vst [vmem:[%s3876_s22 + $0x38] sm:$0xff] %v2963_v62  ;;  %v3323_v1 = vpop.f32.mrb[112].mxu0 }
 0x628   : > { %v3324_v27 = vpop.f32.mrb[113].mxu0 }
 0x629   : > { %v3325_v11 = vadd.f32 %v3324_v27, %v3323_v1  ;;  %v3326_v49 = vpop.f32.mrb[114].mxu0 }
 0x62a   : > { %v3327_v50 = vpop.f32.mrb[115].mxu0 }
 0x62b   : > { %v2968_v5 = vadd.f32 %v3325_v11, %v4812_v2  ;;  %v3328_v44 = vadd.f32 %v3327_v50, %v3326_v49 }
 0x62d   : > { %3070 = vst [vmem:[%s3876_s22 + $0x40] sm:$0xff] %v2968_v5  ;;  %v2971_v13 = vadd.f32 %v3328_v44, %v4812_v2 }
 0x62f   : > { %3071 = vst [vmem:[%s3876_s22 + $0x48] sm:$0xff] %v2971_v13  ;;  %v3329_v16 = vpop.f32.mrb[116].mxu0 }
 0x630   : > { %v3330_v57 = vpop.f32.mrb[117].mxu0 }
 0x631   : > { %v3331_v6 = vadd.f32 %v3330_v57, %v3329_v16  ;;  %v3332_v56 = vpop.f32.mrb[118].mxu0 }
 0x632   : > { %v3333_v58 = vpop.f32.mrb[119].mxu0 }
 0x633   : > { %v2976_v12 = vadd.f32 %v3331_v6, %v4812_v2  ;;  %v3334_v26 = vadd.f32 %v3333_v58, %v3332_v56 }
 0x635   : > { %3072 = vst [vmem:[%s3876_s22 + $0x50] sm:$0xff] %v2976_v12  ;;  %v2979_v59 = vadd.f32 %v3334_v26, %v4812_v2 }
 0x637   : > { %3073 = vst [vmem:[%s3876_s22 + $0x58] sm:$0xff] %v2979_v59  ;;  %v3335_v14 = vpop.f32.mrb[120].mxu0 }
 0x638   : > { %v3336_v60 = vpop.f32.mrb[121].mxu0 }
 0x639   : > { %v3337_v29 = vadd.f32 %v3336_v60, %v3335_v14  ;;  %v3338_v61 = vpop.f32.mrb[122].mxu0 }
 0x63a   : > { %v3339_v63 = vpop.f32.mrb[123].mxu0 }
 0x63b   : > { %v2984_v18 = vadd.f32 %v3337_v29, %v4812_v2  ;;  %v3340_v19 = vadd.f32 %v3339_v63, %v3338_v61 }
 0x63d   : > { %3074 = vst [vmem:[%s3876_s22 + $0x60] sm:$0xff] %v2984_v18  ;;  %v2987_v8 = vadd.f32 %v3340_v19, %v4812_v2 }
 0x63f   : > { %3075 = vst [vmem:[%s3876_s22 + $0x68] sm:$0xff] %v2987_v8  ;;  %v3341_v31 = vpop.f32.mrb[124].mxu0 }
 0x640   : > { %v3342_v0 = vpop.f32.mrb[125].mxu0 }
 0x641   : > { %v3343_v7 = vadd.f32 %v3342_v0, %v3341_v31  ;;  %v3344_v36 = vpop.f32.mrb[126].mxu0 }
 0x642   : > { %v3345_v41 = vpop.f32.mrb[127].mxu0 }
 0x643   : > { %v2992_v10 = vadd.f32 %v3343_v7, %v4812_v2  ;;  %v3346_v20 = vadd.f32 %v3345_v41, %v3344_v36 }
 0x645   : > { %3076 = vst [vmem:[%s3876_s22 + $0x70] sm:$0xff] %v2992_v10  ;;  %v2995_v55 = vadd.f32 %v3346_v20, %v4812_v2 }
 0x647   : > { %3077 = vst [vmem:[%s3876_s22 + $0x78] sm:$0xff] %v2995_v55  ;;  %v3347_v43 = vpop.f32.mrb[128].mxu0 }
 0x648   : > { %v3348_v15 = vpop.f32.mrb[129].mxu0 }
 0x649   : > { %v3349_v47 = vadd.f32 %v3348_v15, %v3347_v43  ;;  %v3350_v17 = vpop.f32.mrb[130].mxu0 }
 0x64a   : > { %v3351_v53 = vpop.f32.mrb[131].mxu0 }
 0x64b   : > { %v3000_v54 = vadd.f32 %v3349_v47, %v4812_v2  ;;  %v3352_v24 = vadd.f32 %v3351_v53, %v3350_v17 }
 0x64d   : > { %3078 = vst [vmem:[%s3876_s22 + $0x80] sm:$0xff] %v3000_v54  ;;  %v3003_v32 = vadd.f32 %v3352_v24, %v4812_v2 }
 0x64f   : > { %3079 = vst [vmem:[%s3876_s22 + $0x88] sm:$0xff] %v3003_v32  ;;  %v3353_v3 = vpop.f32.mrb[132].mxu0 }
 0x650   : > { %v3354_v25 = vpop.f32.mrb[133].mxu0 }
 0x651   : > { %v3355_v4 = vadd.f32 %v3354_v25, %v3353_v3  ;;  %v3356_v28 = vpop.f32.mrb[134].mxu0 }
 0x652   : > { %v3357_v22 = vpop.f32.mrb[135].mxu0 }
 0x653   : > { %v3008_v30 = vadd.f32 %v3355_v4, %v4812_v2  ;;  %v3358_v37 = vadd.f32 %v3357_v22, %v3356_v28 }
 0x655   : > { %3080 = vst [vmem:[%s3876_s22 + $0x90] sm:$0xff] %v3008_v30  ;;  %v3011_v38 = vadd.f32 %v3358_v37, %v4812_v2 }
 0x657   : > { %3081 = vst [vmem:[%s3876_s22 + $0x98] sm:$0xff] %v3011_v38  ;;  %v3359_v33 = vpop.f32.mrb[136].mxu0 }
 0x658   : > { %v3360_v34 = vpop.f32.mrb[137].mxu0 }
 0x659   : > { %v3361_v40 = vadd.f32 %v3360_v34, %v3359_v33  ;;  %v3362_v42 = vpop.f32.mrb[138].mxu0 }
 0x65a   : > { %v3363_v9 = vpop.f32.mrb[139].mxu0 }
 0x65b   : > { %v3016_v45 = vadd.f32 %v3361_v40, %v4812_v2  ;;  %v3364_v46 = vadd.f32 %v3363_v9, %v3362_v42 }
 0x65d   : > { %3082 = vst [vmem:[%s3876_s22 + $0xa0] sm:$0xff] %v3016_v45  ;;  %v3019_v21 = vadd.f32 %v3364_v46, %v4812_v2 }
 0x65f   : > { %3083 = vst [vmem:[%s3876_s22 + $0xa8] sm:$0xff] %v3019_v21  ;;  %v3365_v35 = vpop.f32.mrb[140].mxu0 }
 0x660   : > { %v3366_v48 = vpop.f32.mrb[141].mxu0 }
 0x661   : > { %v3367_v23 = vadd.f32 %v3366_v48, %v3365_v35  ;;  %v3368_v52 = vpop.f32.mrb[142].mxu0 }
 0x662   : > { %v3369_v39 = vpop.f32.mrb[143].mxu0 }
 0x663   : > { %v3024_v51 = vadd.f32 %v3367_v23, %v4812_v2  ;;  %v3370_v62 = vadd.f32 %v3369_v39, %v3368_v52 }
 0x665   : > { %3084 = vst [vmem:[%s3876_s22 + $0xb0] sm:$0xff] %v3024_v51  ;;  %v3027_v1 = vadd.f32 %v3370_v62, %v4812_v2 }
 0x667   : > { %3085 = vst [vmem:[%s3876_s22 + $0xb8] sm:$0xff] %v3027_v1  ;;  %v3371_v27 = vpop.f32.mrb[144].mxu0 }
 0x668   : > { %v3372_v11 = vpop.f32.mrb[145].mxu0 }
 0x669   : > { %v3373_v49 = vadd.f32 %v3372_v11, %v3371_v27  ;;  %v3374_v50 = vpop.f32.mrb[146].mxu0 }
 0x66a   : > { %v3375_v5 = vpop.f32.mrb[147].mxu0 }
 0x66b   : > { %v3032_v44 = vadd.f32 %v3373_v49, %v4812_v2  ;;  %v3376_v13 = vadd.f32 %v3375_v5, %v3374_v50 }
 0x66d   : > { %3086 = vst [vmem:[%s3876_s22 + $0xc0] sm:$0xff] %v3032_v44  ;;  %v3035_v16 = vadd.f32 %v3376_v13, %v4812_v2 }
 0x66f   : > { %3087 = vst [vmem:[%s3876_s22 + $0xc8] sm:$0xff] %v3035_v16  ;;  %v3377_v57 = vpop.f32.mrb[148].mxu0 }
 0x670   : > { %v3378_v6 = vpop.f32.mrb[149].mxu0 }
 0x671   : > { %v3379_v56 = vadd.f32 %v3378_v6, %v3377_v57  ;;  %v3380_v58 = vpop.f32.mrb[150].mxu0 }
 0x672   : > { %v3381_v12 = vpop.f32.mrb[151].mxu0 }
 0x673   : > { %v3040_v26 = vadd.f32 %v3379_v56, %v4812_v2  ;;  %v3382_v59 = vadd.f32 %v3381_v12, %v3380_v58 }
 0x675   : > { %3088 = vst [vmem:[%s3876_s22 + $0xd0] sm:$0xff] %v3040_v26  ;;  %v3043_v14 = vadd.f32 %v3382_v59, %v4812_v2 }
 0x677   : > { %3089 = vst [vmem:[%s3876_s22 + $0xd8] sm:$0xff] %v3043_v14  ;;  %v3383_v60 = vpop.f32.mrb[152].mxu0 }
 0x678   : > { %v3384_v29 = vpop.f32.mrb[153].mxu0 }
 0x679   : > { %v3385_v61 = vadd.f32 %v3384_v29, %v3383_v60  ;;  %v3386_v63 = vpop.f32.mrb[154].mxu0 }
 0x67a   : > { %v3387_v18 = vpop.f32.mrb[155].mxu0 }
 0x67b   : > { %v3048_v19 = vadd.f32 %v3385_v61, %v4812_v2  ;;  %v3388_v8 = vadd.f32 %v3387_v18, %v3386_v63 }
 0x67d   : > { %3090 = vst [vmem:[%s3876_s22 + $0xe0] sm:$0xff] %v3048_v19  ;;  %v3051_v31 = vadd.f32 %v3388_v8, %v4812_v2 }
 0x67f   : > { %3091 = vst [vmem:[%s3876_s22 + $0xe8] sm:$0xff] %v3051_v31  ;;  %v3389_v0 = vpop.f32.mrb[156].mxu0 }
 0x680   : > { %v3390_v7 = vpop.f32.mrb[157].mxu0 }
 0x681   : > { %v3391_v36 = vadd.f32 %v3390_v7, %v3389_v0  ;;  %v3392_v41 = vpop.f32.mrb[158].mxu0 }
 0x682   : > { %v3393_v10 = vpop.f32.mrb[159].mxu0 }
 0x683   : > { %v3056_v20 = vadd.f32 %v3391_v36, %v4812_v2  ;;  %v3394_v55 = vadd.f32 %v3393_v10, %v3392_v41 }
 0x685   : > { %3092 = vst [vmem:[%s3876_s22 + $0xf0] sm:$0xff] %v3056_v20  ;;  %v3059_v43 = vadd.f32 %v3394_v55, %v4812_v2 }
 0x687   : > { %3093 = vst [vmem:[%s3876_s22 + $0xf8] sm:$0xff] %v3059_v43 }
 0x688 PF: > { %s17_s30 = sadd.s32 1, %s3691_s30   ;;  %s4907_s24 = smov %s3671_s25 }
 0x689   : > { %p14_p0 = scmp.ge.s32.totalorder %s17_s30, 8   ;;  %s4908_s25 = smov %s3786_s14 }
 0x68a   : > { %s4909_s26 = smov %s3683_s28  ;;  %s4910_s27 = smov %s3687_s29 }
 0x68b   : > { %s4911_s28 = smov %s4914_s8  ;;  %s4912_s29 = smov %s4918_s9 }
 0x68c   :  { %16 = sbr.rel (!%p14_p0) target bundleno = 4 (0x4), region = 135 }

</bundles_post_ra>
